<compile_context>
chip_gen: v7x
topology: tpu7x:2x2x1
jax: 0.10.0
libtpu: 0.0.40
codegen_flags: <defaults>
</compile_context>

<pallas_src>
import functools

import jax
import jax.numpy as jnp
from jax import lax
from jax.experimental import pallas as pl
from jax.experimental.pallas import tpu as pltpu

# f's scalar parameters (deterministic synthetic init)
GAMMA = 0.05
TAU = 0.5


def _round_up(x, m):
    return -(-x // m) * m


def _deq_kernel(z0_ref, aty_ref, rhs1_ref, rhs2_ref, out_ref, *, n_meas, n_iters):
    """All fixed-point iterations inside one kernel invocation.

    z0_ref  : (Bp, Np)          f32   initial iterate (aliased with out_ref)
    aty_ref : (Bp, Np)          f32   gamma * A^T y            (scalar pre-folded)
    rhs1_ref: (Np, Mp+Hidp)     bf16  [A^T | W1]               (shared-LHS fused operator)
    rhs2_ref: (Mp+Hidp, Np)     bf16  [gamma*A ; gamma*tau*W2] (fused correction operator)
    out_ref : (Bp, Np)          f32
    """
    z = z0_ref[...]
    aty = aty_ref[...]

    bp = z.shape[0]
    cols = rhs1_ref.shape[1]

    # ReLU as a single VPU max against a hoisted "floor":
    #   floor = -inf on the data (A^T) columns   -> max() is a no-op
    #   floor = 0    on the denoiser hidden cols -> max() is ReLU
    # n_meas (=Mp) is a multiple of 128, so the boundary is lane-aligned.
    col = lax.broadcasted_iota(jnp.int32, (bp, cols), 1)
    relu_floor = jnp.where(col >= n_meas, 0.0, -jnp.inf).astype(jnp.float32)

    def body(_, z):
        # Operators are re-read at the dot sites (not hoisted above the loop):
        # each wide bf16 operand is ~32 vregs, and vloads hide under MXU latency,
        # while keeping both live across the loop would exhaust the vreg file.
        u = jnp.dot(z.astype(jnp.bfloat16), rhs1_ref[...],
                    preferred_element_type=jnp.float32)
        u = jnp.maximum(u, relu_floor)
        corr = jnp.dot(u.astype(jnp.bfloat16), rhs2_ref[...],
                       preferred_element_type=jnp.float32)
        # f(z) = z - gamma*(A^T A z - A^T y) - gamma*tau*dnn(z)
        return z + aty - corr

    # Fully unrolled: small static trip count; lets the scheduler overlap the
    # f32 epilogue and bf16 casts with the next iteration's MXU push.
    z = lax.fori_loop(0, n_iters, body, z, unroll=True)
    out_ref[...] = z.astype(out_ref.dtype)


def deq_fixed_point_forward(n_ipt, n_y, A, W1, W2, *, num_solver_iters=20,
                            min_batch_rows=16):
    """DEQFixedPoint.forward (inference path).

    n_ipt: (B, 1, H, W) initial image (NCHW, like the PyTorch module)
    n_y  : (B, M)       measurements (sinogram)
    A    : (M, N)       measurement operator, N = H*W
    W1   : (N, Hid), W2: (Hid, N)  denoiser weights
    returns [z, None, tau] with z of shape (B, 1, H, W)

    NOTE: for throughput, batch as many problems as possible into one call; the
    MXU is 128/256 rows tall and per-matmul cost is ~flat up to that row count.
    """
    B, C, H, W = n_ipt.shape
    assert C == 1
    N = H * W
    M = A.shape[0]
    Hid = W1.shape[1]

    # ---- one-time glue (plain JAX): flatten, fold scalars, fuse + pad operators ----
    # Pad all contraction/lane dims to multiples of 128. Zero padding is exact:
    # padded operator rows/cols are zero, so padded z columns stay identically 0.
    Np = _round_up(N, 128)
    Mp = _round_up(M, 128)
    Hidp = _round_up(Hid, 128)

    A_p = jnp.zeros((Mp, Np), jnp.float32).at[:M, :N].set(A.astype(jnp.float32))
    W1_p = jnp.zeros((Np, Hidp), jnp.float32).at[:N, :Hid].set(W1.astype(jnp.float32))
    W2_p = jnp.zeros((Hidp, Np), jnp.float32).at[:Hid, :N].set(W2.astype(jnp.float32))

    rhs1 = jnp.concatenate([A_p.T, W1_p], axis=1).astype(jnp.bfloat16)        # (Np, Mp+Hidp)
    rhs2 = jnp.concatenate(
        [GAMMA * A_p, GAMMA * TAU * W2_p], axis=0).astype(jnp.bfloat16)       # (Mp+Hidp, Np)

    z0_flat = n_ipt.reshape(B, N).astype(jnp.float32)
    aty_flat = GAMMA * (n_y.astype(jnp.float32) @ A.astype(jnp.float32))      # gamma * A^T y

    # Pad batch rows: bf16 LHS sublane tile is 16 rows.
    Bp = _round_up(max(B, min_batch_rows), 16)
    z0 = jnp.zeros((Bp, Np), jnp.float32).at[:B, :N].set(z0_flat)
    aty = jnp.zeros((Bp, Np), jnp.float32).at[:B, :N].set(aty_flat)

    # solver_img iterations + 1 final application of f
    total_iters = num_solver_iters + 1

    # Explicit VMEM budget: resident bf16 operators + f32 state + headroom,
    # clamped under the v7x-safe window.  (See streaming TODO above for larger sizes.)
    est_bytes = (rhs1.size + rhs2.size) * 2 + 4 * Bp * Np * 4 + (2 << 20)
    vmem_limit = int(min(max(est_bytes, 16 << 20), 56 << 20))

    vmem_spec = pl.BlockSpec(memory_space=pltpu.MemorySpace.VMEM)
    kernel = functools.partial(_deq_kernel, n_meas=Mp, n_iters=total_iters)

    z_flat = pl.pallas_call(
        kernel,
        out_shape=jax.ShapeDtypeStruct((Bp, Np), jnp.float32),
        in_specs=[vmem_spec, vmem_spec, vmem_spec, vmem_spec],
        out_specs=vmem_spec,
        input_output_aliases={0: 0},   # reuse the z0 buffer as the output buffer
        compiler_params=pltpu.CompilerParams(vmem_limit_bytes=vmem_limit),
    )(z0, aty, rhs1, rhs2)

    z = z_flat[:B, :N].reshape(B, 1, H, W)
    return [z, None, TAU]


if __name__ == "__main__":
    key = jax.random.PRNGKey(0)
    k_x, k_A, k_W1, k_W2, k_noise = jax.random.split(key, 5)

    B, H, Wd = 2, 16, 16
    N = H * Wd           # 256
    M = 128              # number of measurements
    Hid = 128            # denoiser hidden width

    # ground-truth image, measurement operator, measurements
    x_true = jax.random.normal(k_x, (B, 1, H, Wd), dtype=jnp.float32)
    A = jax.random.normal(k_A, (M, N), dtype=jnp.float32) / jnp.sqrt(jnp.float32(M))
    n_y = x_true.reshape(B, N) @ A.T
    n_y = n_y + 0.01 * jax.random.normal(k_noise, n_y.shape, dtype=jnp.float32)

    # denoiser weights (small, deterministic)
    W1 = 0.05 * jax.random.normal(k_W1, (N, Hid), dtype=jnp.float32)
    W2 = 0.05 * jax.random.normal(k_W2, (Hid, N), dtype=jnp.float32)

    # initial iterate n_ipt
    n_ipt = jnp.zeros((B, 1, H, Wd), dtype=jnp.float32)

    z, _, tau = deq_fixed_point_forward(n_ipt, n_y, A, W1, W2, num_solver_iters=20)
    z = jax.block_until_ready(z)

    assert z.shape == (B, 1, H, Wd)
    assert bool(jnp.all(jnp.isfinite(z)))
    print("KERNEL_OK")
</pallas_src>

<mosaic_0001>
module attributes {stable_mosaic.version = 11 : i64} {
  func.func @_deq_kernel(%arg0: memref<16x256xf32, #tpu.memory_space<vmem>>, %arg1: memref<16x256xf32, #tpu.memory_space<vmem>>, %arg2: memref<256x256xbf16, #tpu.memory_space<vmem>>, %arg3: memref<256x256xbf16, #tpu.memory_space<vmem>>, %arg4: memref<16x256xf32, #tpu.memory_space<vmem>>) attributes {dimension_semantics = [], scalar_prefetch = 0 : i64, scratch_operands = 0 : i64, tpu.core_type = #tpu.core_type<tc>} {
    %c0 = arith.constant 0 : index
    %c0_0 = arith.constant 0 : index
    %0 = vector.load %arg0[%c0, %c0_0] : memref<16x256xf32, #tpu.memory_space<vmem>>, vector<16x256xf32>
    %c0_1 = arith.constant 0 : index
    %c0_2 = arith.constant 0 : index
    %1 = vector.load %arg1[%c0_1, %c0_2] : memref<16x256xf32, #tpu.memory_space<vmem>>, vector<16x256xf32>
    %2 = tpu.iota {dimensions = array<i32: 1>} : vector<16x256xi32>
    %c128_i32 = arith.constant 128 : i32
    %3 = vector.broadcast %c128_i32 : i32 to vector<16x256xi32>
    %4 = arith.cmpi sge, %2, %3 : vector<16x256xi32>
    %cst = arith.constant 0.000000e+00 : f32
    %cst_3 = arith.constant 0xFF800000 : f32
    %5 = vector.broadcast %cst : f32 to vector<16x256xf32>
    %6 = vector.broadcast %cst_3 : f32 to vector<16x256xf32>
    %7 = arith.select %4, %5, %6 : vector<16x256xi1>, vector<16x256xf32>
    %c0_i32 = arith.constant 0 : i32
    %8 = arith.truncf %0 : vector<16x256xf32> to vector<16x256xbf16>
    %c0_4 = arith.constant 0 : index
    %c0_5 = arith.constant 0 : index
    %9 = vector.load %arg2[%c0_4, %c0_5] : memref<256x256xbf16, #tpu.memory_space<vmem>>, vector<256x256xbf16>
    %cst_6 = arith.constant dense<0.000000e+00> : vector<16x256xf32>
    %10 = tpu.matmul %8, %9, %cst_6 {dimension_numbers = #tpu.dot_dimension_numbers<[1], [0], [0], [1], [0, 0, 1, 1], [], []>} : vector<16x256xbf16>, vector<256x256xbf16>, vector<16x256xf32> -> vector<16x256xf32>
    %11 = arith.maximumf %10, %7 : vector<16x256xf32>
    %12 = arith.truncf %11 : vector<16x256xf32> to vector<16x256xbf16>
    %c0_7 = arith.constant 0 : index
    %c0_8 = arith.constant 0 : index
    %13 = vector.load %arg3[%c0_7, %c0_8] : memref<256x256xbf16, #tpu.memory_space<vmem>>, vector<256x256xbf16>
    %cst_9 = arith.constant dense<0.000000e+00> : vector<16x256xf32>
    %14 = tpu.matmul %12, %13, %cst_9 {dimension_numbers = #tpu.dot_dimension_numbers<[1], [0], [0], [1], [0, 0, 1, 1], [], []>} : vector<16x256xbf16>, vector<256x256xbf16>, vector<16x256xf32> -> vector<16x256xf32>
    %15 = arith.addf %0, %1 : vector<16x256xf32>
    %16 = arith.subf %15, %14 : vector<16x256xf32>
    %c1_i32 = arith.constant 1 : i32
    %17 = arith.truncf %16 : vector<16x256xf32> to vector<16x256xbf16>
    %c0_10 = arith.constant 0 : index
    %c0_11 = arith.constant 0 : index
    %18 = vector.load %arg2[%c0_10, %c0_11] : memref<256x256xbf16, #tpu.memory_space<vmem>>, vector<256x256xbf16>
    %cst_12 = arith.constant dense<0.000000e+00> : vector<16x256xf32>
    %19 = tpu.matmul %17, %18, %cst_12 {dimension_numbers = #tpu.dot_dimension_numbers<[1], [0], [0], [1], [0, 0, 1, 1], [], []>} : vector<16x256xbf16>, vector<256x256xbf16>, vector<16x256xf32> -> vector<16x256xf32>
    %20 = arith.maximumf %19, %7 : vector<16x256xf32>
    %21 = arith.truncf %20 : vector<16x256xf32> to vector<16x256xbf16>
    %c0_13 = arith.constant 0 : index
    %c0_14 = arith.constant 0 : index
    %22 = vector.load %arg3[%c0_13, %c0_14] : memref<256x256xbf16, #tpu.memory_space<vmem>>, vector<256x256xbf16>
    %cst_15 = arith.constant dense<0.000000e+00> : vector<16x256xf32>
    %23 = tpu.matmul %21, %22, %cst_15 {dimension_numbers = #tpu.dot_dimension_numbers<[1], [0], [0], [1], [0, 0, 1, 1], [], []>} : vector<16x256xbf16>, vector<256x256xbf16>, vector<16x256xf32> -> vector<16x256xf32>
    %24 = arith.addf %16, %1 : vector<16x256xf32>
    %25 = arith.subf %24, %23 : vector<16x256xf32>
    %c2_i32 = arith.constant 2 : i32
    %26 = arith.truncf %25 : vector<16x256xf32> to vector<16x256xbf16>
    %c0_16 = arith.constant 0 : index
    %c0_17 = arith.constant 0 : index
    %27 = vector.load %arg2[%c0_16, %c0_17] : memref<256x256xbf16, #tpu.memory_space<vmem>>, vector<256x256xbf16>
    %cst_18 = arith.constant dense<0.000000e+00> : vector<16x256xf32>
    %28 = tpu.matmul %26, %27, %cst_18 {dimension_numbers = #tpu.dot_dimension_numbers<[1], [0], [0], [1], [0, 0, 1, 1], [], []>} : vector<16x256xbf16>, vector<256x256xbf16>, vector<16x256xf32> -> vector<16x256xf32>
    %29 = arith.maximumf %28, %7 : vector<16x256xf32>
    %30 = arith.truncf %29 : vector<16x256xf32> to vector<16x256xbf16>
    %c0_19 = arith.constant 0 : index
    %c0_20 = arith.constant 0 : index
    %31 = vector.load %arg3[%c0_19, %c0_20] : memref<256x256xbf16, #tpu.memory_space<vmem>>, vector<256x256xbf16>
    %cst_21 = arith.constant dense<0.000000e+00> : vector<16x256xf32>
    %32 = tpu.matmul %30, %31, %cst_21 {dimension_numbers = #tpu.dot_dimension_numbers<[1], [0], [0], [1], [0, 0, 1, 1], [], []>} : vector<16x256xbf16>, vector<256x256xbf16>, vector<16x256xf32> -> vector<16x256xf32>
    %33 = arith.addf %25, %1 : vector<16x256xf32>
    %34 = arith.subf %33, %32 : vector<16x256xf32>
    %c3_i32 = arith.constant 3 : i32
    %35 = arith.truncf %34 : vector<16x256xf32> to vector<16x256xbf16>
    %c0_22 = arith.constant 0 : index
    %c0_23 = arith.constant 0 : index
    %36 = vector.load %arg2[%c0_22, %c0_23] : memref<256x256xbf16, #tpu.memory_space<vmem>>, vector<256x256xbf16>
    %cst_24 = arith.constant dense<0.000000e+00> : vector<16x256xf32>
    %37 = tpu.matmul %35, %36, %cst_24 {dimension_numbers = #tpu.dot_dimension_numbers<[1], [0], [0], [1], [0, 0, 1, 1], [], []>} : vector<16x256xbf16>, vector<256x256xbf16>, vector<16x256xf32> -> vector<16x256xf32>
    %38 = arith.maximumf %37, %7 : vector<16x256xf32>
    %39 = arith.truncf %38 : vector<16x256xf32> to vector<16x256xbf16>
    %c0_25 = arith.constant 0 : index
    %c0_26 = arith.constant 0 : index
    %40 = vector.load %arg3[%c0_25, %c0_26] : memref<256x256xbf16, #tpu.memory_space<vmem>>, vector<256x256xbf16>
    %cst_27 = arith.constant dense<0.000000e+00> : vector<16x256xf32>
    %41 = tpu.matmul %39, %40, %cst_27 {dimension_numbers = #tpu.dot_dimension_numbers<[1], [0], [0], [1], [0, 0, 1, 1], [], []>} : vector<16x256xbf16>, vector<256x256xbf16>, vector<16x256xf32> -> vector<16x256xf32>
    %42 = arith.addf %34, %1 : vector<16x256xf32>
    %43 = arith.subf %42, %41 : vector<16x256xf32>
    %c4_i32 = arith.constant 4 : i32
    %44 = arith.truncf %43 : vector<16x256xf32> to vector<16x256xbf16>
    %c0_28 = arith.constant 0 : index
    %c0_29 = arith.constant 0 : index
    %45 = vector.load %arg2[%c0_28, %c0_29] : memref<256x256xbf16, #tpu.memory_space<vmem>>, vector<256x256xbf16>
    %cst_30 = arith.constant dense<0.000000e+00> : vector<16x256xf32>
    %46 = tpu.matmul %44, %45, %cst_30 {dimension_numbers = #tpu.dot_dimension_numbers<[1], [0], [0], [1], [0, 0, 1, 1], [], []>} : vector<16x256xbf16>, vector<256x256xbf16>, vector<16x256xf32> -> vector<16x256xf32>
    %47 = arith.maximumf %46, %7 : vector<16x256xf32>
    %48 = arith.truncf %47 : vector<16x256xf32> to vector<16x256xbf16>
    %c0_31 = arith.constant 0 : index
    %c0_32 = arith.constant 0 : index
    %49 = vector.load %arg3[%c0_31, %c0_32] : memref<256x256xbf16, #tpu.memory_space<vmem>>, vector<256x256xbf16>
    %cst_33 = arith.constant dense<0.000000e+00> : vector<16x256xf32>
    %50 = tpu.matmul %48, %49, %cst_33 {dimension_numbers = #tpu.dot_dimension_numbers<[1], [0], [0], [1], [0, 0, 1, 1], [], []>} : vector<16x256xbf16>, vector<256x256xbf16>, vector<16x256xf32> -> vector<16x256xf32>
    %51 = arith.addf %43, %1 : vector<16x256xf32>
    %52 = arith.subf %51, %50 : vector<16x256xf32>
    %c5_i32 = arith.constant 5 : i32
    %53 = arith.truncf %52 : vector<16x256xf32> to vector<16x256xbf16>
    %c0_34 = arith.constant 0 : index
    %c0_35 = arith.constant 0 : index
    %54 = vector.load %arg2[%c0_34, %c0_35] : memref<256x256xbf16, #tpu.memory_space<vmem>>, vector<256x256xbf16>
    %cst_36 = arith.constant dense<0.000000e+00> : vector<16x256xf32>
    %55 = tpu.matmul %53, %54, %cst_36 {dimension_numbers = #tpu.dot_dimension_numbers<[1], [0], [0], [1], [0, 0, 1, 1], [], []>} : vector<16x256xbf16>, vector<256x256xbf16>, vector<16x256xf32> -> vector<16x256xf32>
    %56 = arith.maximumf %55, %7 : vector<16x256xf32>
    %57 = arith.truncf %56 : vector<16x256xf32> to vector<16x256xbf16>
    %c0_37 = arith.constant 0 : index
    %c0_38 = arith.constant 0 : index
    %58 = vector.load %arg3[%c0_37, %c0_38] : memref<256x256xbf16, #tpu.memory_space<vmem>>, vector<256x256xbf16>
    %cst_39 = arith.constant dense<0.000000e+00> : vector<16x256xf32>
    %59 = tpu.matmul %57, %58, %cst_39 {dimension_numbers = #tpu.dot_dimension_numbers<[1], [0], [0], [1], [0, 0, 1, 1], [], []>} : vector<16x256xbf16>, vector<256x256xbf16>, vector<16x256xf32> -> vector<16x256xf32>
    %60 = arith.addf %52, %1 : vector<16x256xf32>
    %61 = arith.subf %60, %59 : vector<16x256xf32>
    %c6_i32 = arith.constant 6 : i32
    %62 = arith.truncf %61 : vector<16x256xf32> to vector<16x256xbf16>
    %c0_40 = arith.constant 0 : index
    %c0_41 = arith.constant 0 : index
    %63 = vector.load %arg2[%c0_40, %c0_41] : memref<256x256xbf16, #tpu.memory_space<vmem>>, vector<256x256xbf16>
    %cst_42 = arith.constant dense<0.000000e+00> : vector<16x256xf32>
    %64 = tpu.matmul %62, %63, %cst_42 {dimension_numbers = #tpu.dot_dimension_numbers<[1], [0], [0], [1], [0, 0, 1, 1], [], []>} : vector<16x256xbf16>, vector<256x256xbf16>, vector<16x256xf32> -> vector<16x256xf32>
    %65 = arith.maximumf %64, %7 : vector<16x256xf32>
    %66 = arith.truncf %65 : vector<16x256xf32> to vector<16x256xbf16>
    %c0_43 = arith.constant 0 : index
    %c0_44 = arith.constant 0 : index
    %67 = vector.load %arg3[%c0_43, %c0_44] : memref<256x256xbf16, #tpu.memory_space<vmem>>, vector<256x256xbf16>
    %cst_45 = arith.constant dense<0.000000e+00> : vector<16x256xf32>
    %68 = tpu.matmul %66, %67, %cst_45 {dimension_numbers = #tpu.dot_dimension_numbers<[1], [0], [0], [1], [0, 0, 1, 1], [], []>} : vector<16x256xbf16>, vector<256x256xbf16>, vector<16x256xf32> -> vector<16x256xf32>
    %69 = arith.addf %61, %1 : vector<16x256xf32>
    %70 = arith.subf %69, %68 : vector<16x256xf32>
    %c7_i32 = arith.constant 7 : i32
    %71 = arith.truncf %70 : vector<16x256xf32> to vector<16x256xbf16>
    %c0_46 = arith.constant 0 : index
    %c0_47 = arith.constant 0 : index
    %72 = vector.load %arg2[%c0_46, %c0_47] : memref<256x256xbf16, #tpu.memory_space<vmem>>, vector<256x256xbf16>
    %cst_48 = arith.constant dense<0.000000e+00> : vector<16x256xf32>
    %73 = tpu.matmul %71, %72, %cst_48 {dimension_numbers = #tpu.dot_dimension_numbers<[1], [0], [0], [1], [0, 0, 1, 1], [], []>} : vector<16x256xbf16>, vector<256x256xbf16>, vector<16x256xf32> -> vector<16x256xf32>
    %74 = arith.maximumf %73, %7 : vector<16x256xf32>
    %75 = arith.truncf %74 : vector<16x256xf32> to vector<16x256xbf16>
    %c0_49 = arith.constant 0 : index
    %c0_50 = arith.constant 0 : index
    %76 = vector.load %arg3[%c0_49, %c0_50] : memref<256x256xbf16, #tpu.memory_space<vmem>>, vector<256x256xbf16>
    %cst_51 = arith.constant dense<0.000000e+00> : vector<16x256xf32>
    %77 = tpu.matmul %75, %76, %cst_51 {dimension_numbers = #tpu.dot_dimension_numbers<[1], [0], [0], [1], [0, 0, 1, 1], [], []>} : vector<16x256xbf16>, vector<256x256xbf16>, vector<16x256xf32> -> vector<16x256xf32>
    %78 = arith.addf %70, %1 : vector<16x256xf32>
    %79 = arith.subf %78, %77 : vector<16x256xf32>
    %c8_i32 = arith.constant 8 : i32
    %80 = arith.truncf %79 : vector<16x256xf32> to vector<16x256xbf16>
    %c0_52 = arith.constant 0 : index
    %c0_53 = arith.constant 0 : index
    %81 = vector.load %arg2[%c0_52, %c0_53] : memref<256x256xbf16, #tpu.memory_space<vmem>>, vector<256x256xbf16>
    %cst_54 = arith.constant dense<0.000000e+00> : vector<16x256xf32>
    %82 = tpu.matmul %80, %81, %cst_54 {dimension_numbers = #tpu.dot_dimension_numbers<[1], [0], [0], [1], [0, 0, 1, 1], [], []>} : vector<16x256xbf16>, vector<256x256xbf16>, vector<16x256xf32> -> vector<16x256xf32>
    %83 = arith.maximumf %82, %7 : vector<16x256xf32>
    %84 = arith.truncf %83 : vector<16x256xf32> to vector<16x256xbf16>
    %c0_55 = arith.constant 0 : index
    %c0_56 = arith.constant 0 : index
    %85 = vector.load %arg3[%c0_55, %c0_56] : memref<256x256xbf16, #tpu.memory_space<vmem>>, vector<256x256xbf16>
    %cst_57 = arith.constant dense<0.000000e+00> : vector<16x256xf32>
    %86 = tpu.matmul %84, %85, %cst_57 {dimension_numbers = #tpu.dot_dimension_numbers<[1], [0], [0], [1], [0, 0, 1, 1], [], []>} : vector<16x256xbf16>, vector<256x256xbf16>, vector<16x256xf32> -> vector<16x256xf32>
    %87 = arith.addf %79, %1 : vector<16x256xf32>
    %88 = arith.subf %87, %86 : vector<16x256xf32>
    %c9_i32 = arith.constant 9 : i32
    %89 = arith.truncf %88 : vector<16x256xf32> to vector<16x256xbf16>
    %c0_58 = arith.constant 0 : index
    %c0_59 = arith.constant 0 : index
    %90 = vector.load %arg2[%c0_58, %c0_59] : memref<256x256xbf16, #tpu.memory_space<vmem>>, vector<256x256xbf16>
    %cst_60 = arith.constant dense<0.000000e+00> : vector<16x256xf32>
    %91 = tpu.matmul %89, %90, %cst_60 {dimension_numbers = #tpu.dot_dimension_numbers<[1], [0], [0], [1], [0, 0, 1, 1], [], []>} : vector<16x256xbf16>, vector<256x256xbf16>, vector<16x256xf32> -> vector<16x256xf32>
    %92 = arith.maximumf %91, %7 : vector<16x256xf32>
    %93 = arith.truncf %92 : vector<16x256xf32> to vector<16x256xbf16>
    %c0_61 = arith.constant 0 : index
    %c0_62 = arith.constant 0 : index
    %94 = vector.load %arg3[%c0_61, %c0_62] : memref<256x256xbf16, #tpu.memory_space<vmem>>, vector<256x256xbf16>
    %cst_63 = arith.constant dense<0.000000e+00> : vector<16x256xf32>
    %95 = tpu.matmul %93, %94, %cst_63 {dimension_numbers = #tpu.dot_dimension_numbers<[1], [0], [0], [1], [0, 0, 1, 1], [], []>} : vector<16x256xbf16>, vector<256x256xbf16>, vector<16x256xf32> -> vector<16x256xf32>
    %96 = arith.addf %88, %1 : vector<16x256xf32>
    %97 = arith.subf %96, %95 : vector<16x256xf32>
    %c10_i32 = arith.constant 10 : i32
    %98 = arith.truncf %97 : vector<16x256xf32> to vector<16x256xbf16>
    %c0_64 = arith.constant 0 : index
    %c0_65 = arith.constant 0 : index
    %99 = vector.load %arg2[%c0_64, %c0_65] : memref<256x256xbf16, #tpu.memory_space<vmem>>, vector<256x256xbf16>
    %cst_66 = arith.constant dense<0.000000e+00> : vector<16x256xf32>
    %100 = tpu.matmul %98, %99, %cst_66 {dimension_numbers = #tpu.dot_dimension_numbers<[1], [0], [0], [1], [0, 0, 1, 1], [], []>} : vector<16x256xbf16>, vector<256x256xbf16>, vector<16x256xf32> -> vector<16x256xf32>
    %101 = arith.maximumf %100, %7 : vector<16x256xf32>
    %102 = arith.truncf %101 : vector<16x256xf32> to vector<16x256xbf16>
    %c0_67 = arith.constant 0 : index
    %c0_68 = arith.constant 0 : index
    %103 = vector.load %arg3[%c0_67, %c0_68] : memref<256x256xbf16, #tpu.memory_space<vmem>>, vector<256x256xbf16>
    %cst_69 = arith.constant dense<0.000000e+00> : vector<16x256xf32>
    %104 = tpu.matmul %102, %103, %cst_69 {dimension_numbers = #tpu.dot_dimension_numbers<[1], [0], [0], [1], [0, 0, 1, 1], [], []>} : vector<16x256xbf16>, vector<256x256xbf16>, vector<16x256xf32> -> vector<16x256xf32>
    %105 = arith.addf %97, %1 : vector<16x256xf32>
    %106 = arith.subf %105, %104 : vector<16x256xf32>
    %c11_i32 = arith.constant 11 : i32
    %107 = arith.truncf %106 : vector<16x256xf32> to vector<16x256xbf16>
    %c0_70 = arith.constant 0 : index
    %c0_71 = arith.constant 0 : index
    %108 = vector.load %arg2[%c0_70, %c0_71] : memref<256x256xbf16, #tpu.memory_space<vmem>>, vector<256x256xbf16>
    %cst_72 = arith.constant dense<0.000000e+00> : vector<16x256xf32>
    %109 = tpu.matmul %107, %108, %cst_72 {dimension_numbers = #tpu.dot_dimension_numbers<[1], [0], [0], [1], [0, 0, 1, 1], [], []>} : vector<16x256xbf16>, vector<256x256xbf16>, vector<16x256xf32> -> vector<16x256xf32>
    %110 = arith.maximumf %109, %7 : vector<16x256xf32>
    %111 = arith.truncf %110 : vector<16x256xf32> to vector<16x256xbf16>
    %c0_73 = arith.constant 0 : index
    %c0_74 = arith.constant 0 : index
    %112 = vector.load %arg3[%c0_73, %c0_74] : memref<256x256xbf16, #tpu.memory_space<vmem>>, vector<256x256xbf16>
    %cst_75 = arith.constant dense<0.000000e+00> : vector<16x256xf32>
    %113 = tpu.matmul %111, %112, %cst_75 {dimension_numbers = #tpu.dot_dimension_numbers<[1], [0], [0], [1], [0, 0, 1, 1], [], []>} : vector<16x256xbf16>, vector<256x256xbf16>, vector<16x256xf32> -> vector<16x256xf32>
    %114 = arith.addf %106, %1 : vector<16x256xf32>
    %115 = arith.subf %114, %113 : vector<16x256xf32>
    %c12_i32 = arith.constant 12 : i32
    %116 = arith.truncf %115 : vector<16x256xf32> to vector<16x256xbf16>
    %c0_76 = arith.constant 0 : index
    %c0_77 = arith.constant 0 : index
    %117 = vector.load %arg2[%c0_76, %c0_77] : memref<256x256xbf16, #tpu.memory_space<vmem>>, vector<256x256xbf16>
    %cst_78 = arith.constant dense<0.000000e+00> : vector<16x256xf32>
    %118 = tpu.matmul %116, %117, %cst_78 {dimension_numbers = #tpu.dot_dimension_numbers<[1], [0], [0], [1], [0, 0, 1, 1], [], []>} : vector<16x256xbf16>, vector<256x256xbf16>, vector<16x256xf32> -> vector<16x256xf32>
    %119 = arith.maximumf %118, %7 : vector<16x256xf32>
    %120 = arith.truncf %119 : vector<16x256xf32> to vector<16x256xbf16>
    %c0_79 = arith.constant 0 : index
    %c0_80 = arith.constant 0 : index
    %121 = vector.load %arg3[%c0_79, %c0_80] : memref<256x256xbf16, #tpu.memory_space<vmem>>, vector<256x256xbf16>
    %cst_81 = arith.constant dense<0.000000e+00> : vector<16x256xf32>
    %122 = tpu.matmul %120, %121, %cst_81 {dimension_numbers = #tpu.dot_dimension_numbers<[1], [0], [0], [1], [0, 0, 1, 1], [], []>} : vector<16x256xbf16>, vector<256x256xbf16>, vector<16x256xf32> -> vector<16x256xf32>
    %123 = arith.addf %115, %1 : vector<16x256xf32>
    %124 = arith.subf %123, %122 : vector<16x256xf32>
    %c13_i32 = arith.constant 13 : i32
    %125 = arith.truncf %124 : vector<16x256xf32> to vector<16x256xbf16>
    %c0_82 = arith.constant 0 : index
    %c0_83 = arith.constant 0 : index
    %126 = vector.load %arg2[%c0_82, %c0_83] : memref<256x256xbf16, #tpu.memory_space<vmem>>, vector<256x256xbf16>
    %cst_84 = arith.constant dense<0.000000e+00> : vector<16x256xf32>
    %127 = tpu.matmul %125, %126, %cst_84 {dimension_numbers = #tpu.dot_dimension_numbers<[1], [0], [0], [1], [0, 0, 1, 1], [], []>} : vector<16x256xbf16>, vector<256x256xbf16>, vector<16x256xf32> -> vector<16x256xf32>
    %128 = arith.maximumf %127, %7 : vector<16x256xf32>
    %129 = arith.truncf %128 : vector<16x256xf32> to vector<16x256xbf16>
    %c0_85 = arith.constant 0 : index
    %c0_86 = arith.constant 0 : index
    %130 = vector.load %arg3[%c0_85, %c0_86] : memref<256x256xbf16, #tpu.memory_space<vmem>>, vector<256x256xbf16>
    %cst_87 = arith.constant dense<0.000000e+00> : vector<16x256xf32>
    %131 = tpu.matmul %129, %130, %cst_87 {dimension_numbers = #tpu.dot_dimension_numbers<[1], [0], [0], [1], [0, 0, 1, 1], [], []>} : vector<16x256xbf16>, vector<256x256xbf16>, vector<16x256xf32> -> vector<16x256xf32>
    %132 = arith.addf %124, %1 : vector<16x256xf32>
    %133 = arith.subf %132, %131 : vector<16x256xf32>
    %c14_i32 = arith.constant 14 : i32
    %134 = arith.truncf %133 : vector<16x256xf32> to vector<16x256xbf16>
    %c0_88 = arith.constant 0 : index
    %c0_89 = arith.constant 0 : index
    %135 = vector.load %arg2[%c0_88, %c0_89] : memref<256x256xbf16, #tpu.memory_space<vmem>>, vector<256x256xbf16>
    %cst_90 = arith.constant dense<0.000000e+00> : vector<16x256xf32>
    %136 = tpu.matmul %134, %135, %cst_90 {dimension_numbers = #tpu.dot_dimension_numbers<[1], [0], [0], [1], [0, 0, 1, 1], [], []>} : vector<16x256xbf16>, vector<256x256xbf16>, vector<16x256xf32> -> vector<16x256xf32>
    %137 = arith.maximumf %136, %7 : vector<16x256xf32>
    %138 = arith.truncf %137 : vector<16x256xf32> to vector<16x256xbf16>
    %c0_91 = arith.constant 0 : index
    %c0_92 = arith.constant 0 : index
    %139 = vector.load %arg3[%c0_91, %c0_92] : memref<256x256xbf16, #tpu.memory_space<vmem>>, vector<256x256xbf16>
    %cst_93 = arith.constant dense<0.000000e+00> : vector<16x256xf32>
    %140 = tpu.matmul %138, %139, %cst_93 {dimension_numbers = #tpu.dot_dimension_numbers<[1], [0], [0], [1], [0, 0, 1, 1], [], []>} : vector<16x256xbf16>, vector<256x256xbf16>, vector<16x256xf32> -> vector<16x256xf32>
    %141 = arith.addf %133, %1 : vector<16x256xf32>
    %142 = arith.subf %141, %140 : vector<16x256xf32>
    %c15_i32 = arith.constant 15 : i32
    %143 = arith.truncf %142 : vector<16x256xf32> to vector<16x256xbf16>
    %c0_94 = arith.constant 0 : index
    %c0_95 = arith.constant 0 : index
    %144 = vector.load %arg2[%c0_94, %c0_95] : memref<256x256xbf16, #tpu.memory_space<vmem>>, vector<256x256xbf16>
    %cst_96 = arith.constant dense<0.000000e+00> : vector<16x256xf32>
    %145 = tpu.matmul %143, %144, %cst_96 {dimension_numbers = #tpu.dot_dimension_numbers<[1], [0], [0], [1], [0, 0, 1, 1], [], []>} : vector<16x256xbf16>, vector<256x256xbf16>, vector<16x256xf32> -> vector<16x256xf32>
    %146 = arith.maximumf %145, %7 : vector<16x256xf32>
    %147 = arith.truncf %146 : vector<16x256xf32> to vector<16x256xbf16>
    %c0_97 = arith.constant 0 : index
    %c0_98 = arith.constant 0 : index
    %148 = vector.load %arg3[%c0_97, %c0_98] : memref<256x256xbf16, #tpu.memory_space<vmem>>, vector<256x256xbf16>
    %cst_99 = arith.constant dense<0.000000e+00> : vector<16x256xf32>
    %149 = tpu.matmul %147, %148, %cst_99 {dimension_numbers = #tpu.dot_dimension_numbers<[1], [0], [0], [1], [0, 0, 1, 1], [], []>} : vector<16x256xbf16>, vector<256x256xbf16>, vector<16x256xf32> -> vector<16x256xf32>
    %150 = arith.addf %142, %1 : vector<16x256xf32>
    %151 = arith.subf %150, %149 : vector<16x256xf32>
    %c16_i32 = arith.constant 16 : i32
    %152 = arith.truncf %151 : vector<16x256xf32> to vector<16x256xbf16>
    %c0_100 = arith.constant 0 : index
    %c0_101 = arith.constant 0 : index
    %153 = vector.load %arg2[%c0_100, %c0_101] : memref<256x256xbf16, #tpu.memory_space<vmem>>, vector<256x256xbf16>
    %cst_102 = arith.constant dense<0.000000e+00> : vector<16x256xf32>
    %154 = tpu.matmul %152, %153, %cst_102 {dimension_numbers = #tpu.dot_dimension_numbers<[1], [0], [0], [1], [0, 0, 1, 1], [], []>} : vector<16x256xbf16>, vector<256x256xbf16>, vector<16x256xf32> -> vector<16x256xf32>
    %155 = arith.maximumf %154, %7 : vector<16x256xf32>
    %156 = arith.truncf %155 : vector<16x256xf32> to vector<16x256xbf16>
    %c0_103 = arith.constant 0 : index
    %c0_104 = arith.constant 0 : index
    %157 = vector.load %arg3[%c0_103, %c0_104] : memref<256x256xbf16, #tpu.memory_space<vmem>>, vector<256x256xbf16>
    %cst_105 = arith.constant dense<0.000000e+00> : vector<16x256xf32>
    %158 = tpu.matmul %156, %157, %cst_105 {dimension_numbers = #tpu.dot_dimension_numbers<[1], [0], [0], [1], [0, 0, 1, 1], [], []>} : vector<16x256xbf16>, vector<256x256xbf16>, vector<16x256xf32> -> vector<16x256xf32>
    %159 = arith.addf %151, %1 : vector<16x256xf32>
    %160 = arith.subf %159, %158 : vector<16x256xf32>
    %c17_i32 = arith.constant 17 : i32
    %161 = arith.truncf %160 : vector<16x256xf32> to vector<16x256xbf16>
    %c0_106 = arith.constant 0 : index
    %c0_107 = arith.constant 0 : index
    %162 = vector.load %arg2[%c0_106, %c0_107] : memref<256x256xbf16, #tpu.memory_space<vmem>>, vector<256x256xbf16>
    %cst_108 = arith.constant dense<0.000000e+00> : vector<16x256xf32>
    %163 = tpu.matmul %161, %162, %cst_108 {dimension_numbers = #tpu.dot_dimension_numbers<[1], [0], [0], [1], [0, 0, 1, 1], [], []>} : vector<16x256xbf16>, vector<256x256xbf16>, vector<16x256xf32> -> vector<16x256xf32>
    %164 = arith.maximumf %163, %7 : vector<16x256xf32>
    %165 = arith.truncf %164 : vector<16x256xf32> to vector<16x256xbf16>
    %c0_109 = arith.constant 0 : index
    %c0_110 = arith.constant 0 : index
    %166 = vector.load %arg3[%c0_109, %c0_110] : memref<256x256xbf16, #tpu.memory_space<vmem>>, vector<256x256xbf16>
    %cst_111 = arith.constant dense<0.000000e+00> : vector<16x256xf32>
    %167 = tpu.matmul %165, %166, %cst_111 {dimension_numbers = #tpu.dot_dimension_numbers<[1], [0], [0], [1], [0, 0, 1, 1], [], []>} : vector<16x256xbf16>, vector<256x256xbf16>, vector<16x256xf32> -> vector<16x256xf32>
    %168 = arith.addf %160, %1 : vector<16x256xf32>
    %169 = arith.subf %168, %167 : vector<16x256xf32>
    %c18_i32 = arith.constant 18 : i32
    %170 = arith.truncf %169 : vector<16x256xf32> to vector<16x256xbf16>
    %c0_112 = arith.constant 0 : index
    %c0_113 = arith.constant 0 : index
    %171 = vector.load %arg2[%c0_112, %c0_113] : memref<256x256xbf16, #tpu.memory_space<vmem>>, vector<256x256xbf16>
    %cst_114 = arith.constant dense<0.000000e+00> : vector<16x256xf32>
    %172 = tpu.matmul %170, %171, %cst_114 {dimension_numbers = #tpu.dot_dimension_numbers<[1], [0], [0], [1], [0, 0, 1, 1], [], []>} : vector<16x256xbf16>, vector<256x256xbf16>, vector<16x256xf32> -> vector<16x256xf32>
    %173 = arith.maximumf %172, %7 : vector<16x256xf32>
    %174 = arith.truncf %173 : vector<16x256xf32> to vector<16x256xbf16>
    %c0_115 = arith.constant 0 : index
    %c0_116 = arith.constant 0 : index
    %175 = vector.load %arg3[%c0_115, %c0_116] : memref<256x256xbf16, #tpu.memory_space<vmem>>, vector<256x256xbf16>
    %cst_117 = arith.constant dense<0.000000e+00> : vector<16x256xf32>
    %176 = tpu.matmul %174, %175, %cst_117 {dimension_numbers = #tpu.dot_dimension_numbers<[1], [0], [0], [1], [0, 0, 1, 1], [], []>} : vector<16x256xbf16>, vector<256x256xbf16>, vector<16x256xf32> -> vector<16x256xf32>
    %177 = arith.addf %169, %1 : vector<16x256xf32>
    %178 = arith.subf %177, %176 : vector<16x256xf32>
    %c19_i32 = arith.constant 19 : i32
    %179 = arith.truncf %178 : vector<16x256xf32> to vector<16x256xbf16>
    %c0_118 = arith.constant 0 : index
    %c0_119 = arith.constant 0 : index
    %180 = vector.load %arg2[%c0_118, %c0_119] : memref<256x256xbf16, #tpu.memory_space<vmem>>, vector<256x256xbf16>
    %cst_120 = arith.constant dense<0.000000e+00> : vector<16x256xf32>
    %181 = tpu.matmul %179, %180, %cst_120 {dimension_numbers = #tpu.dot_dimension_numbers<[1], [0], [0], [1], [0, 0, 1, 1], [], []>} : vector<16x256xbf16>, vector<256x256xbf16>, vector<16x256xf32> -> vector<16x256xf32>
    %182 = arith.maximumf %181, %7 : vector<16x256xf32>
    %183 = arith.truncf %182 : vector<16x256xf32> to vector<16x256xbf16>
    %c0_121 = arith.constant 0 : index
    %c0_122 = arith.constant 0 : index
    %184 = vector.load %arg3[%c0_121, %c0_122] : memref<256x256xbf16, #tpu.memory_space<vmem>>, vector<256x256xbf16>
    %cst_123 = arith.constant dense<0.000000e+00> : vector<16x256xf32>
    %185 = tpu.matmul %183, %184, %cst_123 {dimension_numbers = #tpu.dot_dimension_numbers<[1], [0], [0], [1], [0, 0, 1, 1], [], []>} : vector<16x256xbf16>, vector<256x256xbf16>, vector<16x256xf32> -> vector<16x256xf32>
    %186 = arith.addf %178, %1 : vector<16x256xf32>
    %187 = arith.subf %186, %185 : vector<16x256xf32>
    %c20_i32 = arith.constant 20 : i32
    %188 = arith.truncf %187 : vector<16x256xf32> to vector<16x256xbf16>
    %c0_124 = arith.constant 0 : index
    %c0_125 = arith.constant 0 : index
    %189 = vector.load %arg2[%c0_124, %c0_125] : memref<256x256xbf16, #tpu.memory_space<vmem>>, vector<256x256xbf16>
    %cst_126 = arith.constant dense<0.000000e+00> : vector<16x256xf32>
    %190 = tpu.matmul %188, %189, %cst_126 {dimension_numbers = #tpu.dot_dimension_numbers<[1], [0], [0], [1], [0, 0, 1, 1], [], []>} : vector<16x256xbf16>, vector<256x256xbf16>, vector<16x256xf32> -> vector<16x256xf32>
    %191 = arith.maximumf %190, %7 : vector<16x256xf32>
    %192 = arith.truncf %191 : vector<16x256xf32> to vector<16x256xbf16>
    %c0_127 = arith.constant 0 : index
    %c0_128 = arith.constant 0 : index
    %193 = vector.load %arg3[%c0_127, %c0_128] : memref<256x256xbf16, #tpu.memory_space<vmem>>, vector<256x256xbf16>
    %cst_129 = arith.constant dense<0.000000e+00> : vector<16x256xf32>
    %194 = tpu.matmul %192, %193, %cst_129 {dimension_numbers = #tpu.dot_dimension_numbers<[1], [0], [0], [1], [0, 0, 1, 1], [], []>} : vector<16x256xbf16>, vector<256x256xbf16>, vector<16x256xf32> -> vector<16x256xf32>
    %195 = arith.addf %187, %1 : vector<16x256xf32>
    %196 = arith.subf %195, %194 : vector<16x256xf32>
    %c0_130 = arith.constant 0 : index
    %c0_131 = arith.constant 0 : index
    %197 = vector.load %arg4[%c0_130, %c0_131] : memref<16x256xf32, #tpu.memory_space<vmem>>, vector<16x256xf32>
    tpu.vector_store %arg4[%c0_130, %c0_131], %196 {strides = array<i32>} : memref<16x256xf32, #tpu.memory_space<vmem>>, vector<16x256xf32>,
    return
  }
}

</mosaic_0001>

<bundles_post_ra>
// kernel: tpu_custom_call.1
= control target key start
LH: loop header
LB: loop body
LE: loop exit
PB: predicated region body
PF: predicated region fallthrough
CT: control target
= control target key end

     0   :  { %9 = vsyncpa [#allocation3], 0  ;;  %s5521_s0 = inlined_call_operand.hbm [shape: f32[16,256], index: 0, kind: input, shape index: {}, may-alias: {0,4}]   ;;  %s5522_s1 = inlined_call_operand.vmem [shape: f32[16,256], index: 1, kind: input, shape index: {}]   ;;  %s5523_s2 = inlined_call_operand.hbm [shape: bf16[256,256], index: 2, kind: input, shape index: {}]   ;;  %s5524_s3 = inlined_call_operand.hbm [shape: bf16[256,256], index: 3, kind: input, shape index: {}]   ;;  %s5525_s4 = inlined_call_operand.hbm [shape: f32[16,256], index: 4, kind: output, shape index: {}, may-alias: {0,4}]  }
   0x1   :  { %10 = vsyncpa [#allocation6], 0 }
   0x2   :  { %11 = vsyncpa [#allocation4], 0  ;;  %s3088_s15 = smov [#allocation5]   ;;  %s2994_s19 = scalar_lea.hbm %s5523_s2, 4096 }
   0x3   :  { %s31_s16 = sshll.u32 %s3088_s15, 4  ;;  %p2995_p0 = scmp.ne.s32.totalorder %s5523_s2, %s2994_s19  ;;  %s32_s16 = int_to_ptr.vmem [resolvable:$true] %s31_s16 }
   0x4   :  { %p2998_p1 = scmp.lt.u32.totalorder %s2994_s19, %s5523_s2 }
   0x6   :  { %p3000_p2 = pnand %p2998_p1, %p2995_p0 }
   0x8   :  { %3003 = shalt.err (!%p3000_p2)
}
   0x9   :  { %s3004_s24 = scalar_lea.vmem %s32_s16, 4096  ;;  %p3009_p4 = scmp.lt.s32.totalorder %s32_s16, %s32_s16 }
   0xa   :  { %p3005_p3 = scmp.ne.s32.totalorder %s32_s16, %s3004_s24  ;;  %p3010_p5 = scmp.lt.s32.totalorder %s3004_s24, %s3004_s24 }
   0xc   :  { %p3011_p6 = por %p3010_p5, %p3009_p4 }
   0xe   :  { %p3012_p7 = pnand %p3011_p6, %p3005_p3 }
  0x10   :  { %3015 = shalt.err (!%p3012_p7)
}
  0x11   :  { %s3089_s25 = smov 128   ;;  %s3090_s26 = smov 8  }
  0x12   :  { %37 = dma.hbm_to_vmem [thread:$0]  %s5523_s2, 4096, %s32_s16, [#allocation6], %s3089_s25, %s3089_s25, %s3090_s26  }
  0x13   :  { %s3091_s29 = smov [#allocation2]   ;;  %s3016_s7 = scalar_lea.hbm %s5521_s0, 512 }
  0x14   :  { %s17_s30 = sshll.u32 %s3091_s29, 4  ;;  %p3017_p8 = scmp.ne.s32.totalorder %s5521_s0, %s3016_s7  ;;  %s18_s30 = int_to_ptr.vmem [resolvable:$true] %s17_s30 }
  0x15   :  { %p3020_p9 = scmp.lt.u32.totalorder %s3016_s7, %s5521_s0 }
  0x17   :  { %p3022_p10 = pnand %p3020_p9, %p3017_p8 }
  0x19   :  { %3025 = shalt.err (!%p3022_p10)
}
  0x1a   :  { %s3026_s12 = scalar_lea.vmem %s18_s30, 512  ;;  %p3031_p12 = scmp.lt.s32.totalorder %s18_s30, %s18_s30 }
  0x1b   :  { %p3027_p11 = scmp.ne.s32.totalorder %s18_s30, %s3026_s12  ;;  %p3032_p13 = scmp.lt.s32.totalorder %s3026_s12, %s3026_s12 }
  0x1d   :  { %p3033_p0 = por %p3032_p13, %p3031_p12 }
  0x1f   :  { %p3034_p1 = pnand %p3033_p0, %p3027_p11 }
  0x21   :  { %3037 = shalt.err (!%p3034_p1)
}
  0x22   :  { %s3092_s2 = smov 256   ;;  %s3093_s13 = smov 16  }
  0x23   :  { %23 = dma.hbm_to_vmem [thread:$0]  %s5521_s0, 512, %s18_s30, [#allocation3], %s3092_s2, %s3092_s2, %s3093_s13  }
  0x24   :  { %s3094_s16 = smov [#allocation7]   ;;  %s3038_s20 = scalar_lea.hbm %s5524_s3, 4096 }
  0x25   :  { %s43_s17 = sshll.u32 %s3094_s16, 4  ;;  %p3039_p2 = scmp.ne.s32.totalorder %s5524_s3, %s3038_s20  ;;  %s44_s17 = int_to_ptr.vmem [resolvable:$true] %s43_s17 }
  0x26   :  { %p3042_p3 = scmp.lt.u32.totalorder %s3038_s20, %s5524_s3 }
  0x28   :  { %p3044_p4 = pnand %p3042_p3, %p3039_p2 }
  0x2a   :  { %3047 = shalt.err (!%p3044_p4)
}
  0x2b   :  { %s3048_s27 = scalar_lea.vmem %s44_s17, 4096  ;;  %p3053_p6 = scmp.lt.s32.totalorder %s44_s17, %s44_s17 }
  0x2c   :  { %p3049_p5 = scmp.ne.s32.totalorder %s44_s17, %s3048_s27  ;;  %p3054_p7 = scmp.lt.s32.totalorder %s3048_s27, %s3048_s27 }
  0x2e   :  { %p3055_p8 = por %p3054_p7, %p3053_p6 }
  0x30   :  { %p3056_p9 = pnand %p3055_p8, %p3049_p5 }
  0x32   :  { %3059 = shalt.err (!%p3056_p9)
}
  0x33   :  { %49 = dma.hbm_to_vmem [thread:$0]  %s5524_s3, 4096, %s44_s17, [#allocation6], %s3089_s25, %s3089_s25, %s3090_s26  }
  0x34   :  { %3082 = dma.done.wait [#allocation3], 512  }
  0x35   :  { %3083 = vsyncadd [#allocation3], 4294966784 }
  0x36   :  { %3084 = dma.done.wait [#allocation6], 8192  }
  0x37   :  { %3085 = vsyncadd [#allocation6], 4294959104  ;;  %v3166_v0 = vld [vmem:[#allocation5 + $0x4] ss:$8 sps:$4 sm:$0xff]   ;;  %v3168_v1 = vld [vmem:[#allocation5] ss:$8 sps:$4 sm:$0xff]  }
  0x38   :  { %5711 = vst [vmem:[#allocation12_spill] sm:$0xff] %v3166_v0  ;;  %268 = vmatprep.subr.bf16.mxu0 %v3166_v0  ;;  %v3171_v2 = vld [vmem:[#allocation5 + $0x14] ss:$8 sps:$4 sm:$0xff]   ;;  %v3174_v3 = vld [vmem:[#allocation5 + $0x10] ss:$8 sps:$4 sm:$0xff]   ;;  %v3203_v13 = vld [vmem:[#allocation2 + $0x8] sm:$0xff] }
  0x39   :  { %269 = vmatpush1.bf16.msra.mxu0 %v3168_v1  ;;  %v3177_v4 = vld [vmem:[#allocation5 + $0x24] ss:$8 sps:$4 sm:$0xff]   ;;  %v3180_v5 = vld [vmem:[#allocation5 + $0x20] ss:$8 sps:$4 sm:$0xff]   ;;  %v3183_v6 = vld [vmem:[#allocation5 + $0x34] ss:$8 sps:$4 sm:$0xff]  }
  0x3a   :  { %270 = vmatprep.subr.bf16.mxu0 %v3171_v2  ;;  %v3186_v7 = vld [vmem:[#allocation5 + $0x30] ss:$8 sps:$4 sm:$0xff]   ;;  %v3189_v8 = vld [vmem:[#allocation5 + $0x44] ss:$8 sps:$4 sm:$0xff]   ;;  %v3192_v9 = vld [vmem:[#allocation5 + $0x40] ss:$8 sps:$4 sm:$0xff]  }
  0x3b   :  { %v3195_v10 = vld [vmem:[#allocation5 + $0x54] ss:$8 sps:$4 sm:$0xff]   ;;  %v3198_v11 = vld [vmem:[#allocation5 + $0x50] ss:$8 sps:$4 sm:$0xff]   ;;  %v3201_v12 = vld [vmem:[#allocation5 + $0x64] ss:$8 sps:$4 sm:$0xff]  }
  0x3c   :  { %v3205_v14 = vld [vmem:[#allocation2 + $0x18] sm:$0xff]  ;;  %v3207_v15 = vld [vmem:[#allocation5 + $0x60] ss:$8 sps:$4 sm:$0xff]   ;;  %v3215_v18 = vld [vmem:[#allocation7 + $0x4] ss:$8 sps:$4 sm:$0xff]  }
  0x3d   :  { %271 = vmatpush1.bf16.msra.mxu0 %v3174_v3  ;;  %v75_v16 = vpack.c.bf16 %v3205_v14, %v3203_v13  ;;  %v3212_v17 = vld [vmem:[#allocation5 + $0x74] ss:$8 sps:$4 sm:$0xff]   ;;  %5712 = vst [vmem:[#allocation13_spill] sm:$0xff] %v3215_v18  ;;  %v3217_v19 = vld [vmem:[#allocation7] ss:$8 sps:$4 sm:$0xff]   ;;  %509 = vmatprep.subr.bf16.mxu1 %v3215_v18 }
  0x3e   :  { %272 = vmatprep.subr.bf16.mxu0 %v3177_v4  ;;  %v3219_v20 = vld [vmem:[#allocation7 + $0x14] ss:$8 sps:$4 sm:$0xff]   ;;  %v3221_v21 = vld [vmem:[#allocation5 + $0x70] ss:$8 sps:$4 sm:$0xff]   ;;  %510 = vmatpush1.bf16.msra.mxu1 %v3217_v19  ;;  %v3229_v23 = vld [vmem:[#allocation5 + $0x84] ss:$8 sps:$4 sm:$0xff]  }
  0x3f   :  { %300 = vmatprep.mubr.bf16.mxu0 %v75_v16  ;;  %v3226_v22 = vld [vmem:[#allocation7 + $0x10] ss:$8 sps:$4 sm:$0xff]   ;;  %511 = vmatprep.subr.bf16.mxu1 %v3219_v20  ;;  %v3232_v24 = vld [vmem:[#allocation7 + $0x24] ss:$8 sps:$4 sm:$0xff]   ;;  %v3234_v25 = vld [vmem:[#allocation5 + $0x80] ss:$8 sps:$4 sm:$0xff]  }
  0x40   :  { %v3238_v26 = vld [vmem:[#allocation7 + $0x20] ss:$8 sps:$4 sm:$0xff]   ;;  %v3241_v27 = vld [vmem:[#allocation5 + $0x94] ss:$8 sps:$4 sm:$0xff]   ;;  %v3246_v29 = vld [vmem:[#allocation5 + $0x90] ss:$8 sps:$4 sm:$0xff]  }
  0x41   :  { %273 = vmatpush1.bf16.msra.mxu0 %v3180_v5  ;;  %5713 = vst [vmem:[#allocation14_spill] sm:$0xff] %v3241_v27  ;;  %v3244_v28 = vld [vmem:[#allocation7 + $0x34] ss:$8 sps:$4 sm:$0xff]   ;;  %5714 = vst [vmem:[#allocation15_spill] sm:$0xff] %v3246_v29  ;;  %v3250_v30 = vld [vmem:[#allocation7 + $0x30] ss:$8 sps:$4 sm:$0xff]  }
  0x42   :  { %274 = vmatprep.subr.bf16.mxu0 %v3183_v6  ;;  %512 = vmatpush1.bf16.msra.mxu1 %v3226_v22  ;;  %v3253_v31 = vld [vmem:[#allocation5 + $0xa4] ss:$8 sps:$4 sm:$0xff]   ;;  %v3258_v33 = vld [vmem:[#allocation5 + $0xa0] ss:$8 sps:$4 sm:$0xff]   ;;  %v3265_v35 = vld [vmem:[#allocation5 + $0xb4] ss:$8 sps:$4 sm:$0xff]  }
  0x43   :  { %513 = vmatprep.subr.bf16.mxu1 %v3232_v24  ;;  %5715 = vst [vmem:[#allocation16_spill] sm:$0xff] %v3253_v31  ;;  %v3256_v32 = vld [vmem:[#allocation7 + $0x44] ss:$8 sps:$4 sm:$0xff]   ;;  %5716 = vst [vmem:[#allocation17_spill] sm:$0xff] %v3258_v33  ;;  %v3262_v34 = vld [vmem:[#allocation7 + $0x40] ss:$8 sps:$4 sm:$0xff]  }
  0x44   :  { %5717 = vst [vmem:[#allocation18_spill] sm:$0xff] %v3265_v35  ;;  %v3268_v36 = vld [vmem:[#allocation7 + $0x54] ss:$8 sps:$4 sm:$0xff]   ;;  %v3271_v37 = vld [vmem:[#allocation5 + $0xb0] ss:$8 sps:$4 sm:$0xff]   ;;  %v3321_v54 = vld [vmem:[#allocation2] sm:$0xff] }
  0x45   :  { %275 = vmatpush1.bf16.msra.mxu0 %v3186_v7  ;;  %5718 = vst [vmem:[#allocation19_spill] sm:$0xff] %v3271_v37  ;;  %v3274_v38 = vld [vmem:[#allocation7 + $0x50] ss:$8 sps:$4 sm:$0xff]   ;;  %v3277_v39 = vld [vmem:[#allocation5 + $0xc4] ss:$8 sps:$4 sm:$0xff]  }
  0x46   :  { %276 = vmatprep.subr.bf16.mxu0 %v3189_v8  ;;  %514 = vmatpush1.bf16.msra.mxu1 %v3238_v26  ;;  %5719 = vst [vmem:[#allocation20_spill] sm:$0xff] %v3277_v39  ;;  %v3280_v40 = vld [vmem:[#allocation7 + $0x64] ss:$8 sps:$4 sm:$0xff]   ;;  %v3283_v41 = vld [vmem:[#allocation5 + $0xc0] ss:$8 sps:$4 sm:$0xff]   ;;  %v3323_v55 = vld [vmem:[#allocation2 + $0x10] sm:$0xff] }
  0x47   :  { %515 = vmatprep.subr.bf16.mxu1 %v3244_v28  ;;  %5720 = vst [vmem:[#allocation21_spill] sm:$0xff] %v3283_v41  ;;  %v3286_v42 = vld [vmem:[#allocation7 + $0x60] ss:$8 sps:$4 sm:$0xff]   ;;  %v3289_v43 = vld [vmem:[#allocation5 + $0xd4] ss:$8 sps:$4 sm:$0xff]   ;;  %v74_v58 = vpack.c.bf16 %v3323_v55, %v3321_v54 }
  0x48   :  { %5721 = vst [vmem:[#allocation22_spill] sm:$0xff] %v3289_v43  ;;  %v3292_v44 = vld [vmem:[#allocation7 + $0x74] ss:$8 sps:$4 sm:$0xff]   ;;  %v3295_v45 = vld [vmem:[#allocation5 + $0xd0] ss:$8 sps:$4 sm:$0xff]  }
  0x49   :  { %277 = vmatpush1.bf16.msra.mxu0 %v3192_v9  ;;  %5722 = vst [vmem:[#allocation23_spill] sm:$0xff] %v3295_v45  ;;  %v3298_v46 = vld [vmem:[#allocation7 + $0x70] ss:$8 sps:$4 sm:$0xff]   ;;  %v3301_v47 = vld [vmem:[#allocation5 + $0xe4] ss:$8 sps:$4 sm:$0xff]  }
  0x4a   :  { %278 = vmatprep.subr.bf16.mxu0 %v3195_v10  ;;  %516 = vmatpush1.bf16.msra.mxu1 %v3250_v30  ;;  %5723 = vst [vmem:[#allocation24_spill] sm:$0xff] %v3301_v47  ;;  %v3304_v48 = vld [vmem:[#allocation7 + $0x84] ss:$8 sps:$4 sm:$0xff]   ;;  %v3307_v49 = vld [vmem:[#allocation5 + $0xe0] ss:$8 sps:$4 sm:$0xff]  }
  0x4b   :  { %517 = vmatprep.subr.bf16.mxu1 %v3256_v32  ;;  %5724 = vst [vmem:[#allocation25_spill] sm:$0xff] %v3307_v49  ;;  %v3310_v50 = vld [vmem:[#allocation7 + $0x80] ss:$8 sps:$4 sm:$0xff]   ;;  %v3313_v51 = vld [vmem:[#allocation5 + $0xf4] ss:$8 sps:$4 sm:$0xff]  }
  0x4c   :  { %5725 = vst [vmem:[#allocation26_spill] sm:$0xff] %v3313_v51  ;;  %v3316_v52 = vld [vmem:[#allocation7 + $0x94] ss:$8 sps:$4 sm:$0xff]   ;;  %v3318_v53 = vld [vmem:[#allocation5 + $0xf0] ss:$8 sps:$4 sm:$0xff]  }
  0x4d   :  { %279 = vmatpush1.bf16.msra.mxu0 %v3198_v11  ;;  %5726 = vst [vmem:[#allocation27_spill] sm:$0xff] %v3318_v53  ;;  %v3326_v56 = vld [vmem:[#allocation7 + $0x90] ss:$8 sps:$4 sm:$0xff]   ;;  %v3330_v57 = vld [vmem:[#allocation7 + $0xa4] ss:$8 sps:$4 sm:$0xff]  }
  0x4e   :  { %280 = vmatprep.subr.bf16.mxu0 %v3201_v12  ;;  %518 = vmatpush1.bf16.msra.mxu1 %v3262_v34  ;;  %5727 = vst [vmem:[#allocation28_spill] sm:$0xff] %v3330_v57  ;;  %v3336_v59 = vld [vmem:[#allocation7 + $0xa0] ss:$8 sps:$4 sm:$0xff]   ;;  %v3339_v60 = vld [vmem:[#allocation7 + $0xb4] ss:$8 sps:$4 sm:$0xff]  }
  0x4f   :  { %519 = vmatprep.subr.bf16.mxu1 %v3268_v36  ;;  %5728 = vst [vmem:[#allocation29_spill] sm:$0xff] %v3336_v59  ;;  %5729 = vst [vmem:[#allocation30_spill] sm:$0xff] %v3339_v60  ;;  %v3343_v61 = vld [vmem:[#allocation7 + $0xb0] ss:$8 sps:$4 sm:$0xff]   ;;  %v3347_v62 = vld [vmem:[#allocation7 + $0xc4] ss:$8 sps:$4 sm:$0xff]  }
  0x50   :  { %5730 = vst [vmem:[#allocation31_spill] sm:$0xff] %v3343_v61  ;;  %5731 = vst [vmem:[#allocation32_spill] sm:$0xff] %v3347_v62  ;;  %v3351_v63 = vld [vmem:[#allocation7 + $0xc0] ss:$8 sps:$4 sm:$0xff]   ;;  %v3355_v16 = vld [vmem:[#allocation7 + $0xd4] ss:$8 sps:$4 sm:$0xff]  }
  0x51   :  { %281 = vmatpush1.bf16.msra.mxu0 %v3207_v15  ;;  %5732 = vst [vmem:[#allocation33_spill] sm:$0xff] %v3351_v63  ;;  %5733 = vst [vmem:[#allocation34_spill] sm:$0xff] %v3355_v16 }
  0x52   :  { %282 = vmatprep.subr.bf16.mxu0 %v3212_v17  ;;  %520 = vmatpush1.bf16.msra.mxu1 %v3274_v38 }
  0x53   :  { %521 = vmatprep.subr.bf16.mxu1 %v3280_v40 }
  0x55   :  { %283 = vmatpush1.bf16.msra.mxu0 %v3221_v21 }
  0x56   :  { %284 = vmatprep.subr.bf16.mxu0 %v3229_v23  ;;  %522 = vmatpush1.bf16.msra.mxu1 %v3286_v42 }
  0x57   :  { %523 = vmatprep.subr.bf16.mxu1 %v3292_v44 }
  0x59   :  { %285 = vmatpush1.bf16.msra.mxu0 %v3234_v25 }
  0x5a   :  { %286 = vmatprep.subr.bf16.mxu0 %v3241_v27  ;;  %524 = vmatpush1.bf16.msra.mxu1 %v3298_v46 }
  0x5b   :  { %525 = vmatprep.subr.bf16.mxu1 %v3304_v48 }
  0x5d   :  { %287 = vmatpush1.bf16.msra.mxu0 %v3246_v29 }
  0x5e   :  { %288 = vmatprep.subr.bf16.mxu0 %v3253_v31  ;;  %526 = vmatpush1.bf16.msra.mxu1 %v3310_v50 }
  0x5f   :  { %527 = vmatprep.subr.bf16.mxu1 %v3316_v52 }
  0x61   :  { %289 = vmatpush1.bf16.msra.mxu0 %v3258_v33 }
  0x62   :  { %290 = vmatprep.subr.bf16.mxu0 %v3265_v35  ;;  %528 = vmatpush1.bf16.msra.mxu1 %v3326_v56 }
  0x63   :  { %529 = vmatprep.subr.bf16.mxu1 %v3330_v57 }
  0x65   :  { %291 = vmatpush1.bf16.msra.mxu0 %v3271_v37 }
  0x66   :  { %292 = vmatprep.subr.bf16.mxu0 %v3277_v39  ;;  %530 = vmatpush1.bf16.msra.mxu1 %v3336_v59 }
  0x67   :  { %531 = vmatprep.subr.bf16.mxu1 %v3339_v60 }
  0x69   :  { %293 = vmatpush1.bf16.msra.mxu0 %v3283_v41 }
  0x6a   :  { %294 = vmatprep.subr.bf16.mxu0 %v3289_v43  ;;  %532 = vmatpush1.bf16.msra.mxu1 %v3343_v61 }
  0x6b   :  { %533 = vmatprep.subr.bf16.mxu1 %v3347_v62 }
  0x6d   :  { %295 = vmatpush1.bf16.msra.mxu0 %v3295_v45 }
  0x6e   :  { %296 = vmatprep.subr.bf16.mxu0 %v3301_v47  ;;  %534 = vmatpush1.bf16.msra.mxu1 %v3351_v63 }
  0x6f   :  { %535 = vmatprep.subr.bf16.mxu1 %v3355_v16 }
  0x71   :  { %297 = vmatpush1.bf16.msra.mxu0 %v3307_v49 }
  0x72   :  { %298 = vmatprep.subr.bf16.mxu0 %v3313_v51 }
  0x75   :  { %299 = vmatpush1.bf16.msra.mxu0 %v3318_v53 }
  0x76   :  { %562 = vmatprep.subr.bf16.mxu0 %v3166_v0 }
  0x78   :  { %301 = vmatmul.mubr.bf16.vlgmr.msra.gmra.mrb[0].mxu0 %v74_v58  ;;  %v3359_v58 = vld [vmem:[#allocation7 + $0xd0] ss:$8 sps:$4 sm:$0xff]  }
  0x79   :  { %563 = vmatpush1.bf16.msra.mxu0 %v3168_v1  ;;  %5734 = vst [vmem:[#allocation35_spill] sm:$0xff] %v3359_v58  ;;  %536 = vmatpush1.bf16.msra.mxu1 %v3359_v58 }
  0x7a   :  { %564 = vmatprep.subr.bf16.mxu0 %v3171_v2 }
  0x7d   :  { %565 = vmatpush1.bf16.msra.mxu0 %v3174_v3 }
  0x7e   :  { %566 = vmatprep.subr.bf16.mxu0 %v3177_v4 }
  0x81   :  { %567 = vmatpush1.bf16.msra.mxu0 %v3180_v5 }
  0x82   :  { %568 = vmatprep.subr.bf16.mxu0 %v3183_v6 }
  0x85   :  { %569 = vmatpush1.bf16.msra.mxu0 %v3186_v7 }
  0x86   :  { %570 = vmatprep.subr.bf16.mxu0 %v3189_v8 }
  0x89   :  { %571 = vmatpush1.bf16.msra.mxu0 %v3192_v9 }
  0x8a   :  { %572 = vmatprep.subr.bf16.mxu0 %v3195_v10 }
  0x8d   :  { %573 = vmatpush1.bf16.msra.mxu0 %v3198_v11 }
  0x8e   :  { %574 = vmatprep.subr.bf16.mxu0 %v3201_v12 }
  0x91   :  { %575 = vmatpush1.bf16.msra.mxu0 %v3207_v15 }
  0x92   :  { %576 = vmatprep.subr.bf16.mxu0 %v3212_v17 }
  0x95   :  { %577 = vmatpush1.bf16.msra.mxu0 %v3221_v21 }
  0x96   :  { %578 = vmatprep.subr.bf16.mxu0 %v3229_v23 }
  0x99   :  { %579 = vmatpush1.bf16.msra.mxu0 %v3234_v25 }
  0x9a   :  { %580 = vmatprep.subr.bf16.mxu0 %v3241_v27 }
  0x9d   :  { %581 = vmatpush1.bf16.msra.mxu0 %v3246_v29 }
  0x9e   :  { %582 = vmatprep.subr.bf16.mxu0 %v3253_v31 }
  0xa1   :  { %583 = vmatpush1.bf16.msra.mxu0 %v3258_v33 }
  0xa2   :  { %584 = vmatprep.subr.bf16.mxu0 %v3265_v35  ;;  %v3391_v35 = vld [vmem:[#allocation7 + $0xe4] ss:$8 sps:$4 sm:$0xff]  }
  0xa3   :  { %5735 = vst [vmem:[#allocation36_spill] sm:$0xff] %v3391_v35  ;;  %537 = vmatprep.subr.bf16.mxu1 %v3391_v35 }
  0xa5   :  { %585 = vmatpush1.bf16.msra.mxu0 %v3271_v37  ;;  %v3393_v37 = vld [vmem:[#allocation7 + $0xe0] ss:$8 sps:$4 sm:$0xff]  }
  0xa6   :  { %586 = vmatprep.subr.bf16.mxu0 %v3277_v39  ;;  %5736 = vst [vmem:[#allocation37_spill] sm:$0xff] %v3393_v37  ;;  %538 = vmatpush1.bf16.msra.mxu1 %v3393_v37 }
  0xa9   :  { %587 = vmatpush1.bf16.msra.mxu0 %v3283_v41 }
  0xaa   :  { %588 = vmatprep.subr.bf16.mxu0 %v3289_v43  ;;  %v3397_v43 = vld [vmem:[#allocation7 + $0xf4] ss:$8 sps:$4 sm:$0xff]  }
  0xab   :  { %5737 = vst [vmem:[#allocation38_spill] sm:$0xff] %v3397_v43  ;;  %539 = vmatprep.subr.bf16.mxu1 %v3397_v43 }
  0xad   :  { %589 = vmatpush1.bf16.msra.mxu0 %v3295_v45  ;;  %v3399_v45 = vld [vmem:[#allocation7 + $0xf0] ss:$8 sps:$4 sm:$0xff]  }
  0xae   :  { %590 = vmatprep.subr.bf16.mxu0 %v3301_v47  ;;  %5738 = vst [vmem:[#allocation39_spill] sm:$0xff] %v3399_v45  ;;  %540 = vmatpush1.bf16.msra.mxu1 %v3399_v45 }
  0xaf   :  { %611 = vmatprep.subr.bf16.mxu1 %v3215_v18 }
  0xb1   :  { %591 = vmatpush1.bf16.msra.mxu0 %v3307_v49 }
  0xb2   :  { %592 = vmatprep.subr.bf16.mxu0 %v3313_v51 }
  0xb5   :  { %593 = vmatpush1.bf16.msra.mxu0 %v3318_v53 }
  0xb6   :  { %664 = vmatprep.subr.bf16.mxu0 %v3166_v0 }
 0x14b   :  { %v302_v53 = vpop.f32.mrb[0].mxu0 }
 0x14c   :  { %v304_v0 = vpop.f32.mrb[1].mxu0 }
 0x14d   :  { %v306_v51 = vpop.f32.mrb[2].mxu0  ;;  %v312_v41 = vmax.f32 %v304_v0, 0.0  ;;  %v3439_v0 = vld [vmem:[%s5522_s1 + $0x8] sm:$0xff] }
 0x14e   :  { %v315_v49 = vpack.c.bf16 %v306_v51, %v302_v53  ;;  %v308_v47 = vpop.f32.mrb[3].mxu0 }
 0x14f   :  { %v314_v39 = vmax.f32 %v308_v47, 0.0  ;;  %v553_v47 = vadd.f32 %v3439_v0, %v3203_v13 }
 0x151   :  { %v316_v33 = vpack.c.bf16 %v314_v39, %v312_v41  ;;  %v3449_v39 = vld [vmem:[%s5522_s1 + $0x10] sm:$0xff]  ;;  %v3454_v41 = vld [vmem:[%s5522_s1 + $0x18] sm:$0xff] }
 0x152   :  { %v554_v51 = vadd.f32 %v3449_v39, %v3323_v55  ;;  %v555_v53 = vadd.f32 %v3454_v41, %v3205_v14  ;;  %v5739_v14 = vld [vmem:[#allocation17_spill] sm:$0xff] }
 0x153   :  { %541 = vmatprep.mubr.bf16.mxu1 %v316_v33  ;;  %v3444_v33 = vld [vmem:[%s5522_s1] sm:$0xff] }
 0x154   :  { %542 = vmatmul.mubr.bf16.vlgmr.msra.gmra.mrb[0].mxu1 %v315_v49  ;;  %v552_v49 = vadd.f32 %v3444_v33, %v3321_v54 }
 0x155   :  { %612 = vmatpush1.bf16.msra.mxu1 %v3217_v19 }
 0x156   :  { %613 = vmatprep.subr.bf16.mxu1 %v3219_v20 }
 0x159   :  { %614 = vmatpush1.bf16.msra.mxu1 %v3226_v22 }
 0x15a   :  { %615 = vmatprep.subr.bf16.mxu1 %v3232_v24 }
 0x15d   :  { %616 = vmatpush1.bf16.msra.mxu1 %v3238_v26 }
 0x15e   :  { %617 = vmatprep.subr.bf16.mxu1 %v3244_v28 }
 0x161   :  { %618 = vmatpush1.bf16.msra.mxu1 %v3250_v30 }
 0x162   :  { %619 = vmatprep.subr.bf16.mxu1 %v3256_v32 }
 0x165   :  { %620 = vmatpush1.bf16.msra.mxu1 %v3262_v34 }
 0x166   :  { %621 = vmatprep.subr.bf16.mxu1 %v3268_v36 }
 0x169   :  { %622 = vmatpush1.bf16.msra.mxu1 %v3274_v38 }
 0x16a   :  { %623 = vmatprep.subr.bf16.mxu1 %v3280_v40 }
 0x16d   :  { %624 = vmatpush1.bf16.msra.mxu1 %v3286_v42 }
 0x16e   :  { %625 = vmatprep.subr.bf16.mxu1 %v3292_v44 }
 0x171   :  { %626 = vmatpush1.bf16.msra.mxu1 %v3298_v46 }
 0x172   :  { %627 = vmatprep.subr.bf16.mxu1 %v3304_v48 }
 0x175   :  { %628 = vmatpush1.bf16.msra.mxu1 %v3310_v50 }
 0x176   :  { %629 = vmatprep.subr.bf16.mxu1 %v3316_v52 }
 0x179   :  { %630 = vmatpush1.bf16.msra.mxu1 %v3326_v56 }
 0x17a   :  { %631 = vmatprep.subr.bf16.mxu1 %v3330_v57 }
 0x17d   :  { %632 = vmatpush1.bf16.msra.mxu1 %v3336_v59 }
 0x17e   :  { %633 = vmatprep.subr.bf16.mxu1 %v3339_v60 }
 0x181   :  { %634 = vmatpush1.bf16.msra.mxu1 %v3343_v61 }
 0x182   :  { %635 = vmatprep.subr.bf16.mxu1 %v3347_v62 }
 0x185   :  { %636 = vmatpush1.bf16.msra.mxu1 %v3351_v63 }
 0x186   :  { %637 = vmatprep.subr.bf16.mxu1 %v3355_v16 }
 0x189   :  { %638 = vmatpush1.bf16.msra.mxu1 %v3359_v58 }
 0x18a   :  { %639 = vmatprep.subr.bf16.mxu1 %v3391_v35 }
 0x18d   :  { %640 = vmatpush1.bf16.msra.mxu1 %v3393_v37 }
 0x18e   :  { %641 = vmatprep.subr.bf16.mxu1 %v3397_v43 }
 0x191   :  { %642 = vmatpush1.bf16.msra.mxu1 %v3399_v45 }
 0x192   :  { %713 = vmatprep.subr.bf16.mxu1 %v3215_v18 }
 0x227   :  { %v543_v18 = vpop.f32.mrb[0].mxu1 }
 0x228   :  { %v545_v45 = vpop.f32.mrb[1].mxu1  ;;  %v3466_v35 = vsub.f32 %v552_v49, %v543_v18  ;;  %v5740_v18 = vld [vmem:[#allocation18_spill] sm:$0xff]  ;;  %v5745_v49 = vld [vmem:[#allocation23_spill] sm:$0xff] }
 0x229   :  { %v3464_v43 = vsub.f32 %v553_v47, %v545_v45  ;;  %v547_v37 = vpop.f32.mrb[2].mxu1  ;;  %v5742_v45 = vld [vmem:[#allocation20_spill] sm:$0xff]  ;;  %v5744_v47 = vld [vmem:[#allocation22_spill] sm:$0xff] }
 0x22a   :  { %v3468_v58 = vsub.f32 %v554_v51, %v547_v37  ;;  %v549_v16 = vpop.f32.mrb[3].mxu1  ;;  %v5741_v37 = vld [vmem:[#allocation19_spill] sm:$0xff]  ;;  %v5746_v51 = vld [vmem:[#allocation24_spill] sm:$0xff] }
 0x22b   :  { %v3470_v13 = vsub.f32 %v555_v53, %v549_v16  ;;  %v5743_v16 = vld [vmem:[#allocation21_spill] sm:$0xff] }
 0x22c   :  { %v560_v54 = vpack.c.bf16 %v3468_v58, %v3466_v35  ;;  %v5747_v53 = vld [vmem:[#allocation25_spill] sm:$0xff] }
 0x22d   :  { %v561_v55 = vpack.c.bf16 %v3470_v13, %v3464_v43 }
 0x22f   :  { %594 = vmatprep.mubr.bf16.mxu0 %v561_v55  ;;  %v5749_v55 = vld [vmem:[#allocation27_spill] sm:$0xff] }
 0x230   :  { %595 = vmatmul.mubr.bf16.vlgmr.msra.gmra.mrb[4].mxu0 %v560_v54  ;;  %v5748_v54 = vld [vmem:[#allocation26_spill] sm:$0xff] }
 0x231   :  { %665 = vmatpush1.bf16.msra.mxu0 %v3168_v1 }
 0x232   :  { %666 = vmatprep.subr.bf16.mxu0 %v3171_v2 }
 0x235   :  { %667 = vmatpush1.bf16.msra.mxu0 %v3174_v3 }
 0x236   :  { %668 = vmatprep.subr.bf16.mxu0 %v3177_v4 }
 0x239   :  { %669 = vmatpush1.bf16.msra.mxu0 %v3180_v5 }
 0x23a   :  { %670 = vmatprep.subr.bf16.mxu0 %v3183_v6 }
 0x23d   :  { %671 = vmatpush1.bf16.msra.mxu0 %v3186_v7 }
 0x23e   :  { %672 = vmatprep.subr.bf16.mxu0 %v3189_v8 }
 0x241   :  { %673 = vmatpush1.bf16.msra.mxu0 %v3192_v9 }
 0x242   :  { %674 = vmatprep.subr.bf16.mxu0 %v3195_v10 }
 0x245   :  { %675 = vmatpush1.bf16.msra.mxu0 %v3198_v11 }
 0x246   :  { %676 = vmatprep.subr.bf16.mxu0 %v3201_v12 }
 0x249   :  { %677 = vmatpush1.bf16.msra.mxu0 %v3207_v15 }
 0x24a   :  { %678 = vmatprep.subr.bf16.mxu0 %v3212_v17 }
 0x24d   :  { %679 = vmatpush1.bf16.msra.mxu0 %v3221_v21 }
 0x24e   :  { %680 = vmatprep.subr.bf16.mxu0 %v3229_v23 }
 0x251   :  { %681 = vmatpush1.bf16.msra.mxu0 %v3234_v25 }
 0x252   :  { %682 = vmatprep.subr.bf16.mxu0 %v3241_v27 }
 0x255   :  { %683 = vmatpush1.bf16.msra.mxu0 %v3246_v29 }
 0x256   :  { %684 = vmatprep.subr.bf16.mxu0 %v3253_v31 }
 0x259   :  { %685 = vmatpush1.bf16.msra.mxu0 %v5739_v14  ;;  %v5750_v14 = vld [vmem:[#allocation12_spill] sm:$0xff] }
 0x25a   :  { %686 = vmatprep.subr.bf16.mxu0 %v5740_v18 }
 0x25d   :  { %687 = vmatpush1.bf16.msra.mxu0 %v5741_v37 }
 0x25e   :  { %688 = vmatprep.subr.bf16.mxu0 %v5742_v45 }
 0x261   :  { %689 = vmatpush1.bf16.msra.mxu0 %v5743_v16 }
 0x262   :  { %690 = vmatprep.subr.bf16.mxu0 %v5744_v47 }
 0x265   :  { %691 = vmatpush1.bf16.msra.mxu0 %v5745_v49 }
 0x266   :  { %692 = vmatprep.subr.bf16.mxu0 %v5746_v51 }
 0x269   :  { %693 = vmatpush1.bf16.msra.mxu0 %v5747_v53 }
 0x26a   :  { %694 = vmatprep.subr.bf16.mxu0 %v5748_v54 }
 0x26d   :  { %695 = vmatpush1.bf16.msra.mxu0 %v5749_v55 }
 0x26e   :  { %766 = vmatprep.subr.bf16.mxu0 %v5750_v14 }
 0x303   :  { %v596_v18 = vpop.f32.mrb[4].mxu0 }
 0x304   :  { %v598_v37 = vpop.f32.mrb[5].mxu0 }
 0x305   :  { %v600_v31 = vpop.f32.mrb[6].mxu0  ;;  %v606_v16 = vmax.f32 %v598_v37, 0.0  ;;  %v5755_v37 = vld [vmem:[#allocation38_spill] sm:$0xff] }
 0x306   :  { %v609_v45 = vpack.c.bf16 %v600_v31, %v596_v18  ;;  %v602_v29 = vpop.f32.mrb[7].mxu0  ;;  %v5753_v31 = vld [vmem:[#allocation36_spill] sm:$0xff]  ;;  %v5754_v18 = vld [vmem:[#allocation37_spill] sm:$0xff] }
 0x307   :  { %v608_v27 = vmax.f32 %v602_v29, 0.0  ;;  %v5752_v29 = vld [vmem:[#allocation35_spill] sm:$0xff] }
 0x309   :  { %v610_v47 = vpack.c.bf16 %v608_v27, %v606_v16  ;;  %v5751_v27 = vld [vmem:[#allocation34_spill] sm:$0xff]  ;;  %v5757_v16 = vld [vmem:[#allocation13_spill] sm:$0xff] }
 0x30b   :  { %643 = vmatprep.mubr.bf16.mxu1 %v610_v47  ;;  %v654_v47 = vadd.f32 %v3466_v35, %v3444_v33 }
 0x30c   :  { %644 = vmatmul.mubr.bf16.vlgmr.msra.gmra.mrb[4].mxu1 %v609_v45  ;;  %v5756_v45 = vld [vmem:[#allocation39_spill] sm:$0xff] }
 0x30d   :  { %714 = vmatpush1.bf16.msra.mxu1 %v3217_v19 }
 0x30e   :  { %715 = vmatprep.subr.bf16.mxu1 %v3219_v20 }
 0x311   :  { %716 = vmatpush1.bf16.msra.mxu1 %v3226_v22 }
 0x312   :  { %717 = vmatprep.subr.bf16.mxu1 %v3232_v24 }
 0x315   :  { %718 = vmatpush1.bf16.msra.mxu1 %v3238_v26 }
 0x316   :  { %719 = vmatprep.subr.bf16.mxu1 %v3244_v28 }
 0x319   :  { %720 = vmatpush1.bf16.msra.mxu1 %v3250_v30 }
 0x31a   :  { %721 = vmatprep.subr.bf16.mxu1 %v3256_v32 }
 0x31d   :  { %722 = vmatpush1.bf16.msra.mxu1 %v3262_v34 }
 0x31e   :  { %723 = vmatprep.subr.bf16.mxu1 %v3268_v36 }
 0x321   :  { %724 = vmatpush1.bf16.msra.mxu1 %v3274_v38 }
 0x322   :  { %725 = vmatprep.subr.bf16.mxu1 %v3280_v40 }
 0x325   :  { %726 = vmatpush1.bf16.msra.mxu1 %v3286_v42 }
 0x326   :  { %727 = vmatprep.subr.bf16.mxu1 %v3292_v44 }
 0x329   :  { %728 = vmatpush1.bf16.msra.mxu1 %v3298_v46 }
 0x32a   :  { %729 = vmatprep.subr.bf16.mxu1 %v3304_v48 }
 0x32d   :  { %730 = vmatpush1.bf16.msra.mxu1 %v3310_v50 }
 0x32e   :  { %731 = vmatprep.subr.bf16.mxu1 %v3316_v52 }
 0x331   :  { %732 = vmatpush1.bf16.msra.mxu1 %v3326_v56 }
 0x332   :  { %733 = vmatprep.subr.bf16.mxu1 %v3330_v57 }
 0x335   :  { %734 = vmatpush1.bf16.msra.mxu1 %v3336_v59 }
 0x336   :  { %735 = vmatprep.subr.bf16.mxu1 %v3339_v60 }
 0x339   :  { %736 = vmatpush1.bf16.msra.mxu1 %v3343_v61 }
 0x33a   :  { %737 = vmatprep.subr.bf16.mxu1 %v3347_v62 }
 0x33d   :  { %738 = vmatpush1.bf16.msra.mxu1 %v3351_v63  ;;  %v655_v63 = vadd.f32 %v3464_v43, %v3439_v0 }
 0x33e   :  { %739 = vmatprep.subr.bf16.mxu1 %v5751_v27 }
 0x341   :  { %740 = vmatpush1.bf16.msra.mxu1 %v5752_v29 }
 0x342   :  { %741 = vmatprep.subr.bf16.mxu1 %v5753_v31  ;;  %v656_v31 = vadd.f32 %v3468_v58, %v3449_v39  ;;  %v5760_v58 = vld [vmem:[#allocation16_spill] sm:$0xff] }
 0x345   :  { %742 = vmatpush1.bf16.msra.mxu1 %v5754_v18 }
 0x346   :  { %743 = vmatprep.subr.bf16.mxu1 %v5755_v37 }
 0x349   :  { %744 = vmatpush1.bf16.msra.mxu1 %v5756_v45  ;;  %v657_v45 = vadd.f32 %v3470_v13, %v3454_v41  ;;  %v5761_v13 = vld [vmem:[#allocation17_spill] sm:$0xff] }
 0x34a   :  { %815 = vmatprep.subr.bf16.mxu1 %v5757_v16 }
 0x3df   :  { %v645_v62 = vpop.f32.mrb[4].mxu1 }
 0x3e0   :  { %v3544_v27 = vsub.f32 %v654_v47, %v645_v62  ;;  %v647_v29 = vpop.f32.mrb[5].mxu1  ;;  %v5766_v47 = vld [vmem:[#allocation22_spill] sm:$0xff] }
 0x3e1   :  { %v3548_v18 = vsub.f32 %v655_v63, %v647_v29  ;;  %v649_v37 = vpop.f32.mrb[6].mxu1  ;;  %v5759_v63 = vld [vmem:[#allocation15_spill] sm:$0xff]  ;;  %v5762_v29 = vld [vmem:[#allocation18_spill] sm:$0xff] }
 0x3e2   :  { %v3552_v16 = vsub.f32 %v656_v31, %v649_v37  ;;  %v651_v61 = vpop.f32.mrb[7].mxu1  ;;  %v5763_v31 = vld [vmem:[#allocation19_spill] sm:$0xff]  ;;  %v5764_v37 = vld [vmem:[#allocation20_spill] sm:$0xff] }
 0x3e3   :  { %v3554_v35 = vsub.f32 %v657_v45, %v651_v61  ;;  %v5758_v61 = vld [vmem:[#allocation14_spill] sm:$0xff]  ;;  %v5765_v45 = vld [vmem:[#allocation21_spill] sm:$0xff] }
 0x3e4   :  { %v662_v43 = vpack.c.bf16 %v3552_v16, %v3544_v27 }
 0x3e5   :  { %v663_v62 = vpack.c.bf16 %v3554_v35, %v3548_v18 }
 0x3e7   :  { %696 = vmatprep.mubr.bf16.mxu0 %v663_v62 }
 0x3e8   :  { %697 = vmatmul.mubr.bf16.vlgmr.msra.gmra.mrb[8].mxu0 %v662_v43 }
 0x3e9   :  { %767 = vmatpush1.bf16.msra.mxu0 %v3168_v1 }
 0x3ea   :  { %768 = vmatprep.subr.bf16.mxu0 %v3171_v2 }
 0x3ed   :  { %769 = vmatpush1.bf16.msra.mxu0 %v3174_v3 }
 0x3ee   :  { %770 = vmatprep.subr.bf16.mxu0 %v3177_v4 }
 0x3f1   :  { %771 = vmatpush1.bf16.msra.mxu0 %v3180_v5 }
 0x3f2   :  { %772 = vmatprep.subr.bf16.mxu0 %v3183_v6 }
 0x3f5   :  { %773 = vmatpush1.bf16.msra.mxu0 %v3186_v7 }
 0x3f6   :  { %774 = vmatprep.subr.bf16.mxu0 %v3189_v8 }
 0x3f9   :  { %775 = vmatpush1.bf16.msra.mxu0 %v3192_v9 }
 0x3fa   :  { %776 = vmatprep.subr.bf16.mxu0 %v3195_v10 }
 0x3fd   :  { %777 = vmatpush1.bf16.msra.mxu0 %v3198_v11 }
 0x3fe   :  { %778 = vmatprep.subr.bf16.mxu0 %v3201_v12 }
 0x401   :  { %779 = vmatpush1.bf16.msra.mxu0 %v3207_v15 }
 0x402   :  { %780 = vmatprep.subr.bf16.mxu0 %v3212_v17 }
 0x405   :  { %781 = vmatpush1.bf16.msra.mxu0 %v3221_v21 }
 0x406   :  { %782 = vmatprep.subr.bf16.mxu0 %v3229_v23 }
 0x409   :  { %783 = vmatpush1.bf16.msra.mxu0 %v3234_v25 }
 0x40a   :  { %784 = vmatprep.subr.bf16.mxu0 %v5758_v61 }
 0x40d   :  { %785 = vmatpush1.bf16.msra.mxu0 %v5759_v63 }
 0x40e   :  { %786 = vmatprep.subr.bf16.mxu0 %v5760_v58 }
 0x411   :  { %787 = vmatpush1.bf16.msra.mxu0 %v5761_v13 }
 0x412   :  { %788 = vmatprep.subr.bf16.mxu0 %v5762_v29 }
 0x415   :  { %789 = vmatpush1.bf16.msra.mxu0 %v5763_v31 }
 0x416   :  { %790 = vmatprep.subr.bf16.mxu0 %v5764_v37 }
 0x419   :  { %791 = vmatpush1.bf16.msra.mxu0 %v5765_v45 }
 0x41a   :  { %792 = vmatprep.subr.bf16.mxu0 %v5766_v47 }
 0x41d   :  { %793 = vmatpush1.bf16.msra.mxu0 %v5745_v49 }
 0x41e   :  { %794 = vmatprep.subr.bf16.mxu0 %v5746_v51 }
 0x421   :  { %795 = vmatpush1.bf16.msra.mxu0 %v5747_v53 }
 0x422   :  { %796 = vmatprep.subr.bf16.mxu0 %v5748_v54 }
 0x425   :  { %797 = vmatpush1.bf16.msra.mxu0 %v5749_v55 }
 0x426   :  { %868 = vmatprep.subr.bf16.mxu0 %v5750_v14 }
 0x4bb   :  { %v698_v43 = vpop.f32.mrb[8].mxu0 }
 0x4bc   :  { %v700_v62 = vpop.f32.mrb[9].mxu0 }
 0x4bd   :  { %v702_v31 = vpop.f32.mrb[10].mxu0  ;;  %v708_v45 = vmax.f32 %v700_v62, 0.0  ;;  %v5774_v62 = vld [vmem:[#allocation38_spill] sm:$0xff] }
 0x4be   :  { %v711_v37 = vpack.c.bf16 %v702_v31, %v698_v43  ;;  %v704_v29 = vpop.f32.mrb[11].mxu0  ;;  %v5769_v31 = vld [vmem:[#allocation33_spill] sm:$0xff] }
 0x4bf   :  { %v710_v13 = vmax.f32 %v704_v29, 0.0  ;;  %v5768_v29 = vld [vmem:[#allocation32_spill] sm:$0xff]  ;;  %v5773_v43 = vld [vmem:[#allocation37_spill] sm:$0xff] }
 0x4c1   :  { %v712_v47 = vpack.c.bf16 %v710_v13, %v708_v45  ;;  %v5767_v13 = vld [vmem:[#allocation31_spill] sm:$0xff] }
 0x4c2   :  { %v5771_v45 = vld [vmem:[#allocation35_spill] sm:$0xff] }
 0x4c3   :  { %745 = vmatprep.mubr.bf16.mxu1 %v712_v47  ;;  %v5772_v47 = vld [vmem:[#allocation36_spill] sm:$0xff] }
 0x4c4   :  { %746 = vmatmul.mubr.bf16.vlgmr.msra.gmra.mrb[8].mxu1 %v711_v37  ;;  %v5770_v37 = vld [vmem:[#allocation34_spill] sm:$0xff] }
 0x4c5   :  { %816 = vmatpush1.bf16.msra.mxu1 %v3217_v19 }
 0x4c6   :  { %817 = vmatprep.subr.bf16.mxu1 %v3219_v20 }
 0x4c9   :  { %818 = vmatpush1.bf16.msra.mxu1 %v3226_v22 }
 0x4ca   :  { %819 = vmatprep.subr.bf16.mxu1 %v3232_v24 }
 0x4cd   :  { %820 = vmatpush1.bf16.msra.mxu1 %v3238_v26 }
 0x4ce   :  { %821 = vmatprep.subr.bf16.mxu1 %v3244_v28 }
 0x4d1   :  { %822 = vmatpush1.bf16.msra.mxu1 %v3250_v30 }
 0x4d2   :  { %823 = vmatprep.subr.bf16.mxu1 %v3256_v32 }
 0x4d5   :  { %824 = vmatpush1.bf16.msra.mxu1 %v3262_v34 }
 0x4d6   :  { %825 = vmatprep.subr.bf16.mxu1 %v3268_v36 }
 0x4d9   :  { %826 = vmatpush1.bf16.msra.mxu1 %v3274_v38 }
 0x4da   :  { %827 = vmatprep.subr.bf16.mxu1 %v3280_v40 }
 0x4dd   :  { %828 = vmatpush1.bf16.msra.mxu1 %v3286_v42 }
 0x4de   :  { %829 = vmatprep.subr.bf16.mxu1 %v3292_v44 }
 0x4e1   :  { %830 = vmatpush1.bf16.msra.mxu1 %v3298_v46 }
 0x4e2   :  { %831 = vmatprep.subr.bf16.mxu1 %v3304_v48 }
 0x4e5   :  { %832 = vmatpush1.bf16.msra.mxu1 %v3310_v50 }
 0x4e6   :  { %833 = vmatprep.subr.bf16.mxu1 %v3316_v52 }
 0x4e9   :  { %834 = vmatpush1.bf16.msra.mxu1 %v3326_v56 }
 0x4ea   :  { %835 = vmatprep.subr.bf16.mxu1 %v3330_v57  ;;  %v5775_v57 = vld [vmem:[#allocation39_spill] sm:$0xff] }
 0x4ed   :  { %836 = vmatpush1.bf16.msra.mxu1 %v3336_v59  ;;  %v5776_v59 = vld [vmem:[#allocation13_spill] sm:$0xff] }
 0x4ee   :  { %837 = vmatprep.subr.bf16.mxu1 %v3339_v60 }
 0x4f1   :  { %838 = vmatpush1.bf16.msra.mxu1 %v5767_v13  ;;  %v756_v13 = vadd.f32 %v3544_v27, %v3444_v33 }
 0x4f2   :  { %839 = vmatprep.subr.bf16.mxu1 %v5768_v29 }
 0x4f5   :  { %840 = vmatpush1.bf16.msra.mxu1 %v5769_v31  ;;  %v757_v31 = vadd.f32 %v3548_v18, %v3439_v0 }
 0x4f6   :  { %841 = vmatprep.subr.bf16.mxu1 %v5770_v37 }
 0x4f9   :  { %842 = vmatpush1.bf16.msra.mxu1 %v5771_v45 }
 0x4fa   :  { %843 = vmatprep.subr.bf16.mxu1 %v5772_v47  ;;  %v758_v47 = vadd.f32 %v3552_v16, %v3449_v39  ;;  %v5792_v16 = vld [vmem:[#allocation37_spill] sm:$0xff] }
 0x4fd   :  { %844 = vmatpush1.bf16.msra.mxu1 %v5773_v43 }
 0x4fe   :  { %845 = vmatprep.subr.bf16.mxu1 %v5774_v62 }
 0x501   :  { %846 = vmatpush1.bf16.msra.mxu1 %v5775_v57  ;;  %v759_v57 = vadd.f32 %v3554_v35, %v3454_v41  ;;  %v5793_v35 = vld [vmem:[#allocation38_spill] sm:$0xff] }
 0x502   :  { %917 = vmatprep.subr.bf16.mxu1 %v5776_v59 }
 0x597   :  { %v747_v29 = vpop.f32.mrb[8].mxu1 }
 0x598   :  { %v3628_v37 = vsub.f32 %v756_v13, %v747_v29  ;;  %v749_v45 = vpop.f32.mrb[9].mxu1  ;;  %v5794_v29 = vld [vmem:[#allocation39_spill] sm:$0xff] }
 0x599   :  { %v3632_v43 = vsub.f32 %v757_v31, %v749_v45  ;;  %v751_v62 = vpop.f32.mrb[10].mxu1  ;;  %v5795_v31 = vld [vmem:[#allocation13_spill] sm:$0xff] }
 0x59a   :  { %v3636_v59 = vsub.f32 %v758_v47, %v751_v62  ;;  %v753_v60 = vpop.f32.mrb[11].mxu1  ;;  %v858_v45 = vadd.f32 %v3628_v37, %v3444_v33 }
 0x59b   :  { %v3638_v27 = vsub.f32 %v759_v57, %v753_v60  ;;  %v5789_v57 = vld [vmem:[#allocation34_spill] sm:$0xff]  ;;  %v5790_v60 = vld [vmem:[#allocation35_spill] sm:$0xff]  ;;  %v859_v62 = vadd.f32 %v3632_v43, %v3439_v0 }
 0x59c   :  { %v764_v18 = vpack.c.bf16 %v3636_v59, %v3628_v37 }
 0x59d   :  { %v765_v13 = vpack.c.bf16 %v3638_v27, %v3632_v43 }
 0x59f   :  { %798 = vmatprep.mubr.bf16.mxu0 %v765_v13 }
 0x5a0   :  { %799 = vmatmul.mubr.bf16.vlgmr.msra.gmra.mrb[12].mxu0 %v764_v18 }
 0x5a1   :  { %869 = vmatpush1.bf16.msra.mxu0 %v3168_v1  ;;  %v5777_v1 = vld [vmem:[#allocation17_spill] sm:$0xff] }
 0x5a2   :  { %870 = vmatprep.subr.bf16.mxu0 %v3171_v2  ;;  %v5778_v2 = vld [vmem:[#allocation18_spill] sm:$0xff] }
 0x5a5   :  { %871 = vmatpush1.bf16.msra.mxu0 %v3174_v3  ;;  %v5779_v3 = vld [vmem:[#allocation19_spill] sm:$0xff] }
 0x5a6   :  { %872 = vmatprep.subr.bf16.mxu0 %v3177_v4  ;;  %v5780_v4 = vld [vmem:[#allocation20_spill] sm:$0xff] }
 0x5a9   :  { %873 = vmatpush1.bf16.msra.mxu0 %v3180_v5  ;;  %v5781_v5 = vld [vmem:[#allocation21_spill] sm:$0xff] }
 0x5aa   :  { %874 = vmatprep.subr.bf16.mxu0 %v3183_v6  ;;  %v5782_v6 = vld [vmem:[#allocation22_spill] sm:$0xff] }
 0x5ad   :  { %875 = vmatpush1.bf16.msra.mxu0 %v3186_v7 }
 0x5ae   :  { %876 = vmatprep.subr.bf16.mxu0 %v3189_v8 }
 0x5b1   :  { %877 = vmatpush1.bf16.msra.mxu0 %v3192_v9 }
 0x5b2   :  { %878 = vmatprep.subr.bf16.mxu0 %v3195_v10 }
 0x5b5   :  { %879 = vmatpush1.bf16.msra.mxu0 %v3198_v11 }
 0x5b6   :  { %880 = vmatprep.subr.bf16.mxu0 %v3201_v12 }
 0x5b9   :  { %881 = vmatpush1.bf16.msra.mxu0 %v3207_v15 }
 0x5ba   :  { %882 = vmatprep.subr.bf16.mxu0 %v3212_v17 }
 0x5bd   :  { %883 = vmatpush1.bf16.msra.mxu0 %v3221_v21 }
 0x5be   :  { %884 = vmatprep.subr.bf16.mxu0 %v3229_v23 }
 0x5c1   :  { %885 = vmatpush1.bf16.msra.mxu0 %v3234_v25 }
 0x5c2   :  { %886 = vmatprep.subr.bf16.mxu0 %v5758_v61 }
 0x5c5   :  { %887 = vmatpush1.bf16.msra.mxu0 %v5759_v63 }
 0x5c6   :  { %888 = vmatprep.subr.bf16.mxu0 %v5760_v58 }
 0x5c9   :  { %889 = vmatpush1.bf16.msra.mxu0 %v5777_v1 }
 0x5ca   :  { %890 = vmatprep.subr.bf16.mxu0 %v5778_v2 }
 0x5cd   :  { %891 = vmatpush1.bf16.msra.mxu0 %v5779_v3 }
 0x5ce   :  { %892 = vmatprep.subr.bf16.mxu0 %v5780_v4 }
 0x5d1   :  { %893 = vmatpush1.bf16.msra.mxu0 %v5781_v5 }
 0x5d2   :  { %894 = vmatprep.subr.bf16.mxu0 %v5782_v6 }
 0x5d5   :  { %895 = vmatpush1.bf16.msra.mxu0 %v5745_v49 }
 0x5d6   :  { %896 = vmatprep.subr.bf16.mxu0 %v5746_v51 }
 0x5d9   :  { %897 = vmatpush1.bf16.msra.mxu0 %v5747_v53 }
 0x5da   :  { %898 = vmatprep.subr.bf16.mxu0 %v5748_v54 }
 0x5dd   :  { %899 = vmatpush1.bf16.msra.mxu0 %v5749_v55 }
 0x5de   :  { %970 = vmatprep.subr.bf16.mxu0 %v5750_v14  ;;  %v5791_v14 = vld [vmem:[#allocation36_spill] sm:$0xff] }
 0x673   :  { %v800_v7 = vpop.f32.mrb[12].mxu0 }
 0x674   :  { %v802_v8 = vpop.f32.mrb[13].mxu0 }
 0x675   :  { %v804_v9 = vpop.f32.mrb[14].mxu0  ;;  %v810_v12 = vmax.f32 %v802_v8, 0.0 }
 0x676   :  { %v813_v10 = vpack.c.bf16 %v804_v9, %v800_v7  ;;  %v806_v11 = vpop.f32.mrb[15].mxu0  ;;  %v860_v7 = vadd.f32 %v3636_v59, %v3449_v39  ;;  %v3728_v59 = vld [vmem:[#allocation5] ss:$8 sps:$4 sm:$0xff]  }
 0x677   :  { %v812_v15 = vmax.f32 %v806_v11, 0.0 }
 0x679   :  { %v814_v17 = vpack.c.bf16 %v812_v15, %v810_v12 }
 0x67b   :  { %847 = vmatprep.mubr.bf16.mxu1 %v814_v17  ;;  %v3731_v17 = vld [vmem:[#allocation5 + $0x14] ss:$8 sps:$4 sm:$0xff]  }
 0x67c   :  { %848 = vmatmul.mubr.bf16.vlgmr.msra.gmra.mrb[12].mxu1 %v813_v10  ;;  %v861_v10 = vadd.f32 %v3638_v27, %v3454_v41  ;;  %v3734_v27 = vld [vmem:[#allocation5 + $0x10] ss:$8 sps:$4 sm:$0xff]  }
 0x67d   :  { %918 = vmatpush1.bf16.msra.mxu1 %v3217_v19  ;;  %v5783_v19 = vld [vmem:[#allocation28_spill] sm:$0xff] }
 0x67e   :  { %919 = vmatprep.subr.bf16.mxu1 %v3219_v20  ;;  %v5784_v20 = vld [vmem:[#allocation29_spill] sm:$0xff] }
 0x681   :  { %920 = vmatpush1.bf16.msra.mxu1 %v3226_v22  ;;  %v5785_v22 = vld [vmem:[#allocation30_spill] sm:$0xff] }
 0x682   :  { %921 = vmatprep.subr.bf16.mxu1 %v3232_v24  ;;  %v5786_v24 = vld [vmem:[#allocation31_spill] sm:$0xff] }
 0x685   :  { %922 = vmatpush1.bf16.msra.mxu1 %v3238_v26  ;;  %v5787_v26 = vld [vmem:[#allocation32_spill] sm:$0xff] }
 0x686   :  { %923 = vmatprep.subr.bf16.mxu1 %v3244_v28  ;;  %v5788_v28 = vld [vmem:[#allocation33_spill] sm:$0xff] }
 0x689   :  { %924 = vmatpush1.bf16.msra.mxu1 %v3250_v30 }
 0x68a   :  { %925 = vmatprep.subr.bf16.mxu1 %v3256_v32 }
 0x68d   :  { %926 = vmatpush1.bf16.msra.mxu1 %v3262_v34 }
 0x68e   :  { %927 = vmatprep.subr.bf16.mxu1 %v3268_v36 }
 0x691   :  { %928 = vmatpush1.bf16.msra.mxu1 %v3274_v38 }
 0x692   :  { %929 = vmatprep.subr.bf16.mxu1 %v3280_v40 }
 0x695   :  { %930 = vmatpush1.bf16.msra.mxu1 %v3286_v42 }
 0x696   :  { %931 = vmatprep.subr.bf16.mxu1 %v3292_v44 }
 0x699   :  { %932 = vmatpush1.bf16.msra.mxu1 %v3298_v46 }
 0x69a   :  { %933 = vmatprep.subr.bf16.mxu1 %v3304_v48 }
 0x69d   :  { %934 = vmatpush1.bf16.msra.mxu1 %v3310_v50 }
 0x69e   :  { %935 = vmatprep.subr.bf16.mxu1 %v3316_v52 }
 0x6a1   :  { %936 = vmatpush1.bf16.msra.mxu1 %v3326_v56 }
 0x6a2   :  { %937 = vmatprep.subr.bf16.mxu1 %v5783_v19 }
 0x6a5   :  { %938 = vmatpush1.bf16.msra.mxu1 %v5784_v20 }
 0x6a6   :  { %939 = vmatprep.subr.bf16.mxu1 %v5785_v22 }
 0x6a9   :  { %940 = vmatpush1.bf16.msra.mxu1 %v5786_v24 }
 0x6aa   :  { %941 = vmatprep.subr.bf16.mxu1 %v5787_v26 }
 0x6ad   :  { %942 = vmatpush1.bf16.msra.mxu1 %v5788_v28 }
 0x6ae   :  { %943 = vmatprep.subr.bf16.mxu1 %v5789_v57 }
 0x6b1   :  { %944 = vmatpush1.bf16.msra.mxu1 %v5790_v60 }
 0x6b2   :  { %945 = vmatprep.subr.bf16.mxu1 %v5791_v14 }
 0x6b5   :  { %946 = vmatpush1.bf16.msra.mxu1 %v5792_v16 }
 0x6b6   :  { %947 = vmatprep.subr.bf16.mxu1 %v5793_v35 }
 0x6b9   :  { %948 = vmatpush1.bf16.msra.mxu1 %v5794_v29 }
 0x6ba   :  { %1019 = vmatprep.subr.bf16.mxu1 %v5795_v31  ;;  %v3737_v31 = vld [vmem:[#allocation5 + $0x24] ss:$8 sps:$4 sm:$0xff]  }
 0x74f   :  { %v849_v47 = vpop.f32.mrb[12].mxu1 }
 0x750   :  { %v3712_v18 = vsub.f32 %v858_v45, %v849_v47  ;;  %v851_v13 = vpop.f32.mrb[13].mxu1  ;;  %v3740_v45 = vld [vmem:[#allocation5 + $0x20] ss:$8 sps:$4 sm:$0xff]   ;;  %v3743_v47 = vld [vmem:[#allocation5 + $0x34] ss:$8 sps:$4 sm:$0xff]  }
 0x751   :  { %v3716_v8 = vsub.f32 %v859_v62, %v851_v13  ;;  %v853_v9 = vpop.f32.mrb[14].mxu1  ;;  %v3746_v62 = vld [vmem:[#allocation5 + $0x30] ss:$8 sps:$4 sm:$0xff]   ;;  %v3749_v13 = vld [vmem:[#allocation5 + $0x44] ss:$8 sps:$4 sm:$0xff]  }
 0x752   :  { %v3720_v11 = vsub.f32 %v860_v7, %v853_v9  ;;  %v855_v12 = vpop.f32.mrb[15].mxu1  ;;  %v3752_v7 = vld [vmem:[#allocation5 + $0x40] ss:$8 sps:$4 sm:$0xff]   ;;  %v3755_v9 = vld [vmem:[#allocation5 + $0x54] ss:$8 sps:$4 sm:$0xff]  }
 0x753   :  { %v3722_v37 = vsub.f32 %v861_v10, %v855_v12  ;;  %v3758_v10 = vld [vmem:[#allocation5 + $0x50] ss:$8 sps:$4 sm:$0xff]   ;;  %v3761_v12 = vld [vmem:[#allocation5 + $0x64] ss:$8 sps:$4 sm:$0xff]  }
 0x754   :  { %v866_v43 = vpack.c.bf16 %v3720_v11, %v3712_v18 }
 0x755   :  { %v867_v15 = vpack.c.bf16 %v3722_v37, %v3716_v8 }
 0x757   :  { %900 = vmatprep.mubr.bf16.mxu0 %v867_v15  ;;  %v3767_v15 = vld [vmem:[#allocation5 + $0x74] ss:$8 sps:$4 sm:$0xff]  }
 0x758   :  { %901 = vmatmul.mubr.bf16.vlgmr.msra.gmra.mrb[16].mxu0 %v866_v43  ;;  %v3764_v43 = vld [vmem:[#allocation5 + $0x60] ss:$8 sps:$4 sm:$0xff]  }
 0x759   :  { %971 = vmatpush1.bf16.msra.mxu0 %v3728_v59 }
 0x75a   :  { %972 = vmatprep.subr.bf16.mxu0 %v3731_v17 }
 0x75d   :  { %973 = vmatpush1.bf16.msra.mxu0 %v3734_v27 }
 0x75e   :  { %974 = vmatprep.subr.bf16.mxu0 %v3737_v31 }
 0x761   :  { %975 = vmatpush1.bf16.msra.mxu0 %v3740_v45 }
 0x762   :  { %976 = vmatprep.subr.bf16.mxu0 %v3743_v47 }
 0x765   :  { %977 = vmatpush1.bf16.msra.mxu0 %v3746_v62 }
 0x766   :  { %978 = vmatprep.subr.bf16.mxu0 %v3749_v13 }
 0x769   :  { %979 = vmatpush1.bf16.msra.mxu0 %v3752_v7 }
 0x76a   :  { %980 = vmatprep.subr.bf16.mxu0 %v3755_v9 }
 0x76d   :  { %981 = vmatpush1.bf16.msra.mxu0 %v3758_v10 }
 0x76e   :  { %982 = vmatprep.subr.bf16.mxu0 %v3761_v12 }
 0x771   :  { %983 = vmatpush1.bf16.msra.mxu0 %v3764_v43 }
 0x772   :  { %984 = vmatprep.subr.bf16.mxu0 %v3767_v15 }
 0x775   :  { %985 = vmatpush1.bf16.msra.mxu0 %v3221_v21  ;;  %v3787_v21 = vld [vmem:[#allocation5 + $0x4] ss:$8 sps:$4 sm:$0xff]  }
 0x776   :  { %986 = vmatprep.subr.bf16.mxu0 %v3229_v23 }
 0x779   :  { %987 = vmatpush1.bf16.msra.mxu0 %v3234_v25 }
 0x77a   :  { %988 = vmatprep.subr.bf16.mxu0 %v5758_v61 }
 0x77d   :  { %989 = vmatpush1.bf16.msra.mxu0 %v5759_v63 }
 0x77e   :  { %990 = vmatprep.subr.bf16.mxu0 %v5760_v58 }
 0x781   :  { %991 = vmatpush1.bf16.msra.mxu0 %v5777_v1 }
 0x782   :  { %992 = vmatprep.subr.bf16.mxu0 %v5778_v2 }
 0x785   :  { %993 = vmatpush1.bf16.msra.mxu0 %v5779_v3  ;;  %v3802_v3 = vld [vmem:[#allocation7 + $0x20] ss:$8 sps:$4 sm:$0xff]  }
 0x786   :  { %994 = vmatprep.subr.bf16.mxu0 %v5780_v4  ;;  %v3805_v4 = vld [vmem:[#allocation7 + $0x34] ss:$8 sps:$4 sm:$0xff]  }
 0x789   :  { %995 = vmatpush1.bf16.msra.mxu0 %v5781_v5 }
 0x78a   :  { %996 = vmatprep.subr.bf16.mxu0 %v5782_v6 }
 0x78d   :  { %997 = vmatpush1.bf16.msra.mxu0 %v5745_v49 }
 0x78e   :  { %998 = vmatprep.subr.bf16.mxu0 %v5746_v51  ;;  %v3790_v51 = vld [vmem:[#allocation7] ss:$8 sps:$4 sm:$0xff]  }
 0x791   :  { %999 = vmatpush1.bf16.msra.mxu0 %v5747_v53  ;;  %v3793_v53 = vld [vmem:[#allocation7 + $0x14] ss:$8 sps:$4 sm:$0xff]  }
 0x792   :  { %1000 = vmatprep.subr.bf16.mxu0 %v5748_v54  ;;  %v3796_v54 = vld [vmem:[#allocation7 + $0x10] ss:$8 sps:$4 sm:$0xff]  }
 0x795   :  { %1001 = vmatpush1.bf16.msra.mxu0 %v5749_v55  ;;  %v3799_v55 = vld [vmem:[#allocation7 + $0x24] ss:$8 sps:$4 sm:$0xff]  }
 0x796   :  { %1072 = vmatprep.subr.bf16.mxu0 %v3787_v21 }
 0x82b   :  { %v902_v23 = vpop.f32.mrb[16].mxu0 }
 0x82c   :  { %v904_v25 = vpop.f32.mrb[17].mxu0 }
 0x82d   :  { %v906_v61 = vpop.f32.mrb[18].mxu0  ;;  %v912_v1 = vmax.f32 %v904_v25, 0.0  ;;  %v3909_v25 = vld [vmem:[#allocation5 + $0xe4] ss:$8 sps:$4 sm:$0xff]  }
 0x82e   :  { %v915_v63 = vpack.c.bf16 %v906_v61, %v902_v23  ;;  %v908_v58 = vpop.f32.mrb[19].mxu0  ;;  %v3906_v23 = vld [vmem:[#allocation5 + $0xd0] ss:$8 sps:$4 sm:$0xff]   ;;  %v3912_v61 = vld [vmem:[#allocation5 + $0xe0] ss:$8 sps:$4 sm:$0xff]  }
 0x82f   :  { %v914_v2 = vmax.f32 %v908_v58, 0.0  ;;  %v3918_v58 = vld [vmem:[#allocation5 + $0xf0] ss:$8 sps:$4 sm:$0xff]  }
 0x831   :  { %v916_v49 = vpack.c.bf16 %v914_v2, %v912_v1 }
 0x833   :  { %949 = vmatprep.mubr.bf16.mxu1 %v916_v49 }
 0x834   :  { %950 = vmatmul.mubr.bf16.vlgmr.msra.gmra.mrb[16].mxu1 %v915_v63  ;;  %v3915_v63 = vld [vmem:[#allocation5 + $0xf4] ss:$8 sps:$4 sm:$0xff]  }
 0x835   :  { %1020 = vmatpush1.bf16.msra.mxu1 %v3790_v51 }
 0x836   :  { %1021 = vmatprep.subr.bf16.mxu1 %v3793_v53 }
 0x839   :  { %1022 = vmatpush1.bf16.msra.mxu1 %v3796_v54 }
 0x83a   :  { %1023 = vmatprep.subr.bf16.mxu1 %v3799_v55 }
 0x83d   :  { %1024 = vmatpush1.bf16.msra.mxu1 %v3802_v3 }
 0x83e   :  { %1025 = vmatprep.subr.bf16.mxu1 %v3805_v4 }
 0x841   :  { %1026 = vmatpush1.bf16.msra.mxu1 %v3250_v30  ;;  %v3833_v30 = vld [vmem:[#allocation7 + $0x4] ss:$8 sps:$4 sm:$0xff]  }
 0x842   :  { %1027 = vmatprep.subr.bf16.mxu1 %v3256_v32  ;;  %5796 = vst [vmem:[#allocation23_spill] sm:$0xff] %v3833_v30  ;;  %v960_v32 = vadd.f32 %v3712_v18, %v3444_v33  ;;  %v3894_v18 = vld [vmem:[#allocation5 + $0xb0] ss:$8 sps:$4 sm:$0xff]  }
 0x845   :  { %1028 = vmatpush1.bf16.msra.mxu1 %v3262_v34 }
 0x846   :  { %1029 = vmatprep.subr.bf16.mxu1 %v3268_v36  ;;  %v961_v36 = vadd.f32 %v3716_v8, %v3439_v0  ;;  %v3897_v8 = vld [vmem:[#allocation5 + $0xc4] ss:$8 sps:$4 sm:$0xff]  }
 0x849   :  { %1030 = vmatpush1.bf16.msra.mxu1 %v3274_v38 }
 0x84a   :  { %1031 = vmatprep.subr.bf16.mxu1 %v3280_v40 }
 0x84d   :  { %1032 = vmatpush1.bf16.msra.mxu1 %v3286_v42  ;;  %v962_v42 = vadd.f32 %v3720_v11, %v3449_v39  ;;  %v3900_v11 = vld [vmem:[#allocation5 + $0xc0] ss:$8 sps:$4 sm:$0xff]  }
 0x84e   :  { %1033 = vmatprep.subr.bf16.mxu1 %v3292_v44 }
 0x851   :  { %1034 = vmatpush1.bf16.msra.mxu1 %v3298_v46 }
 0x852   :  { %1035 = vmatprep.subr.bf16.mxu1 %v3304_v48  ;;  %v963_v48 = vadd.f32 %v3722_v37, %v3454_v41  ;;  %v3903_v37 = vld [vmem:[#allocation5 + $0xd4] ss:$8 sps:$4 sm:$0xff]  }
 0x855   :  { %1036 = vmatpush1.bf16.msra.mxu1 %v3310_v50 }
 0x856   :  { %1037 = vmatprep.subr.bf16.mxu1 %v3316_v52 }
 0x859   :  { %1038 = vmatpush1.bf16.msra.mxu1 %v3326_v56 }
 0x85a   :  { %1039 = vmatprep.subr.bf16.mxu1 %v5783_v19  ;;  %v3870_v19 = vld [vmem:[#allocation5 + $0x70] ss:$8 sps:$4 sm:$0xff]  }
 0x85d   :  { %1040 = vmatpush1.bf16.msra.mxu1 %v5784_v20  ;;  %v3873_v20 = vld [vmem:[#allocation5 + $0x84] ss:$8 sps:$4 sm:$0xff]  }
 0x85e   :  { %1041 = vmatprep.subr.bf16.mxu1 %v5785_v22  ;;  %v3876_v22 = vld [vmem:[#allocation5 + $0x80] ss:$8 sps:$4 sm:$0xff]  }
 0x861   :  { %1042 = vmatpush1.bf16.msra.mxu1 %v5786_v24  ;;  %v3879_v24 = vld [vmem:[#allocation5 + $0x94] ss:$8 sps:$4 sm:$0xff]  }
 0x862   :  { %1043 = vmatprep.subr.bf16.mxu1 %v5787_v26  ;;  %v3882_v26 = vld [vmem:[#allocation5 + $0x90] ss:$8 sps:$4 sm:$0xff]  }
 0x865   :  { %1044 = vmatpush1.bf16.msra.mxu1 %v5788_v28  ;;  %v3885_v28 = vld [vmem:[#allocation5 + $0xa4] ss:$8 sps:$4 sm:$0xff]  }
 0x866   :  { %1045 = vmatprep.subr.bf16.mxu1 %v5789_v57  ;;  %v3888_v57 = vld [vmem:[#allocation5 + $0xa0] ss:$8 sps:$4 sm:$0xff]  }
 0x869   :  { %1046 = vmatpush1.bf16.msra.mxu1 %v5790_v60  ;;  %v3891_v60 = vld [vmem:[#allocation5 + $0xb4] ss:$8 sps:$4 sm:$0xff]  }
 0x86a   :  { %1047 = vmatprep.subr.bf16.mxu1 %v5791_v14 }
 0x86d   :  { %1048 = vmatpush1.bf16.msra.mxu1 %v5792_v16 }
 0x86e   :  { %1049 = vmatprep.subr.bf16.mxu1 %v5793_v35 }
 0x871   :  { %1050 = vmatpush1.bf16.msra.mxu1 %v5794_v29 }
 0x872   :  { %1121 = vmatprep.subr.bf16.mxu1 %v3833_v30 }
 0x907   :  { %v951_v34 = vpop.f32.mrb[16].mxu1 }
 0x908   :  { %v3840_v38 = vsub.f32 %v960_v32, %v951_v34  ;;  %v953_v40 = vpop.f32.mrb[17].mxu1 }
 0x909   :  { %v3844_v44 = vsub.f32 %v961_v36, %v953_v40  ;;  %v955_v46 = vpop.f32.mrb[18].mxu1 }
 0x90a   :  { %v3848_v50 = vsub.f32 %v962_v42, %v955_v46  ;;  %v957_v52 = vpop.f32.mrb[19].mxu1  ;;  %v3928_v46 = vld [vmem:[#allocation7 + $0x30] ss:$8 sps:$4 sm:$0xff]  }
 0x90b   :  { %v3850_v56 = vsub.f32 %v963_v48, %v957_v52  ;;  %v3931_v48 = vld [vmem:[#allocation7 + $0x44] ss:$8 sps:$4 sm:$0xff]   ;;  %v3934_v52 = vld [vmem:[#allocation7 + $0x40] ss:$8 sps:$4 sm:$0xff]  }
 0x90c   :  { %v968_v5 = vpack.c.bf16 %v3848_v50, %v3840_v38 }
 0x90d   :  { %v969_v6 = vpack.c.bf16 %v3850_v56, %v3844_v44 }
 0x90f   :  { %1002 = vmatprep.mubr.bf16.mxu0 %v969_v6  ;;  %v3940_v6 = vld [vmem:[#allocation7 + $0x50] ss:$8 sps:$4 sm:$0xff]  }
 0x910   :  { %1003 = vmatmul.mubr.bf16.vlgmr.msra.gmra.mrb[20].mxu0 %v968_v5  ;;  %v3937_v5 = vld [vmem:[#allocation7 + $0x54] ss:$8 sps:$4 sm:$0xff]  }
 0x911   :  { %1073 = vmatpush1.bf16.msra.mxu0 %v3728_v59 }
 0x912   :  { %1074 = vmatprep.subr.bf16.mxu0 %v3731_v17 }
 0x915   :  { %1075 = vmatpush1.bf16.msra.mxu0 %v3734_v27 }
 0x916   :  { %1076 = vmatprep.subr.bf16.mxu0 %v3737_v31 }
 0x919   :  { %1077 = vmatpush1.bf16.msra.mxu0 %v3740_v45 }
 0x91a   :  { %1078 = vmatprep.subr.bf16.mxu0 %v3743_v47 }
 0x91d   :  { %1079 = vmatpush1.bf16.msra.mxu0 %v3746_v62 }
 0x91e   :  { %1080 = vmatprep.subr.bf16.mxu0 %v3749_v13 }
 0x921   :  { %1081 = vmatpush1.bf16.msra.mxu0 %v3752_v7 }
 0x922   :  { %1082 = vmatprep.subr.bf16.mxu0 %v3755_v9 }
 0x925   :  { %1083 = vmatpush1.bf16.msra.mxu0 %v3758_v10 }
 0x926   :  { %1084 = vmatprep.subr.bf16.mxu0 %v3761_v12 }
 0x929   :  { %1085 = vmatpush1.bf16.msra.mxu0 %v3764_v43 }
 0x92a   :  { %1086 = vmatprep.subr.bf16.mxu0 %v3767_v15 }
 0x92d   :  { %1087 = vmatpush1.bf16.msra.mxu0 %v3870_v19 }
 0x92e   :  { %1088 = vmatprep.subr.bf16.mxu0 %v3873_v20 }
 0x931   :  { %1089 = vmatpush1.bf16.msra.mxu0 %v3876_v22 }
 0x932   :  { %1090 = vmatprep.subr.bf16.mxu0 %v3879_v24 }
 0x935   :  { %1091 = vmatpush1.bf16.msra.mxu0 %v3882_v26 }
 0x936   :  { %1092 = vmatprep.subr.bf16.mxu0 %v3885_v28 }
 0x939   :  { %1093 = vmatpush1.bf16.msra.mxu0 %v3888_v57 }
 0x93a   :  { %1094 = vmatprep.subr.bf16.mxu0 %v3891_v60 }
 0x93d   :  { %1095 = vmatpush1.bf16.msra.mxu0 %v3894_v18 }
 0x93e   :  { %1096 = vmatprep.subr.bf16.mxu0 %v3897_v8 }
 0x941   :  { %1097 = vmatpush1.bf16.msra.mxu0 %v3900_v11 }
 0x942   :  { %1098 = vmatprep.subr.bf16.mxu0 %v3903_v37 }
 0x945   :  { %1099 = vmatpush1.bf16.msra.mxu0 %v3906_v23 }
 0x946   :  { %1100 = vmatprep.subr.bf16.mxu0 %v3909_v25 }
 0x949   :  { %1101 = vmatpush1.bf16.msra.mxu0 %v3912_v61 }
 0x94a   :  { %1102 = vmatprep.subr.bf16.mxu0 %v3915_v63 }
 0x94d   :  { %1103 = vmatpush1.bf16.msra.mxu0 %v3918_v58 }
 0x94e   :  { %1174 = vmatprep.subr.bf16.mxu0 %v3787_v21 }
 0x9e3   :  { %v1004_v1 = vpop.f32.mrb[20].mxu0 }
 0x9e4   :  { %v1006_v2 = vpop.f32.mrb[21].mxu0 }
 0x9e5   :  { %v1008_v49 = vpop.f32.mrb[22].mxu0  ;;  %v1014_v36 = vmax.f32 %v1006_v2, 0.0  ;;  %v3946_v2 = vld [vmem:[#allocation7 + $0x60] ss:$8 sps:$4 sm:$0xff]  }
 0x9e6   :  { %v1017_v32 = vpack.c.bf16 %v1008_v49, %v1004_v1  ;;  %v1010_v34 = vpop.f32.mrb[23].mxu0  ;;  %v3943_v1 = vld [vmem:[#allocation7 + $0x64] ss:$8 sps:$4 sm:$0xff]   ;;  %v3949_v49 = vld [vmem:[#allocation7 + $0x74] ss:$8 sps:$4 sm:$0xff]  }
 0x9e7   :  { %v1016_v40 = vmax.f32 %v1010_v34, 0.0  ;;  %5797 = vst [vmem:[#allocation24_spill] sm:$0xff] %v3949_v49  ;;  %v3955_v34 = vld [vmem:[#allocation7 + $0x84] ss:$8 sps:$4 sm:$0xff]  }
 0x9e8   :  { %5799 = vst [vmem:[#allocation26_spill] sm:$0xff] %v3955_v34 }
 0x9e9   :  { %v1018_v42 = vpack.c.bf16 %v1016_v40, %v1014_v36  ;;  %v3958_v36 = vld [vmem:[#allocation7 + $0x80] ss:$8 sps:$4 sm:$0xff]   ;;  %v3961_v40 = vld [vmem:[#allocation7 + $0x94] ss:$8 sps:$4 sm:$0xff]  }
 0x9ea   :  { %5800 = vst [vmem:[#allocation27_spill] sm:$0xff] %v3958_v36  ;;  %5801 = vst [vmem:[#allocation12_spill] sm:$0xff] %v3961_v40 }
 0x9eb   :  { %1051 = vmatprep.mubr.bf16.mxu1 %v1018_v42  ;;  %v3964_v42 = vld [vmem:[#allocation7 + $0x90] ss:$8 sps:$4 sm:$0xff]  }
 0x9ec   :  { %1052 = vmatmul.mubr.bf16.vlgmr.msra.gmra.mrb[20].mxu1 %v1017_v32  ;;  %v3952_v32 = vld [vmem:[#allocation7 + $0x70] ss:$8 sps:$4 sm:$0xff]   ;;  %5802 = vst [vmem:[#allocation14_spill] sm:$0xff] %v3964_v42 }
 0x9ed   :  { %1122 = vmatpush1.bf16.msra.mxu1 %v3790_v51  ;;  %5798 = vst [vmem:[#allocation25_spill] sm:$0xff] %v3952_v32 }
 0x9ee   :  { %1123 = vmatprep.subr.bf16.mxu1 %v3793_v53 }
 0x9f1   :  { %1124 = vmatpush1.bf16.msra.mxu1 %v3796_v54 }
 0x9f2   :  { %1125 = vmatprep.subr.bf16.mxu1 %v3799_v55 }
 0x9f5   :  { %1126 = vmatpush1.bf16.msra.mxu1 %v3802_v3 }
 0x9f6   :  { %1127 = vmatprep.subr.bf16.mxu1 %v3805_v4 }
 0x9f9   :  { %1128 = vmatpush1.bf16.msra.mxu1 %v3928_v46 }
 0x9fa   :  { %1129 = vmatprep.subr.bf16.mxu1 %v3931_v48 }
 0x9fd   :  { %1130 = vmatpush1.bf16.msra.mxu1 %v3934_v52 }
 0x9fe   :  { %1131 = vmatprep.subr.bf16.mxu1 %v3937_v5 }
 0xa01   :  { %1132 = vmatpush1.bf16.msra.mxu1 %v3940_v6 }
 0xa02   :  { %1133 = vmatprep.subr.bf16.mxu1 %v3943_v1 }
 0xa05   :  { %1134 = vmatpush1.bf16.msra.mxu1 %v3946_v2 }
 0xa06   :  { %1135 = vmatprep.subr.bf16.mxu1 %v3949_v49  ;;  %v3967_v49 = vld [vmem:[#allocation7 + $0xa4] ss:$8 sps:$4 sm:$0xff]  }
 0xa07   :  { %5803 = vst [vmem:[#allocation15_spill] sm:$0xff] %v3967_v49 }
 0xa09   :  { %1136 = vmatpush1.bf16.msra.mxu1 %v3952_v32  ;;  %v3970_v32 = vld [vmem:[#allocation7 + $0xa0] ss:$8 sps:$4 sm:$0xff]  }
 0xa0a   :  { %1137 = vmatprep.subr.bf16.mxu1 %v3955_v34  ;;  %5804 = vst [vmem:[#allocation16_spill] sm:$0xff] %v3970_v32  ;;  %v3973_v34 = vld [vmem:[#allocation7 + $0xb4] ss:$8 sps:$4 sm:$0xff]  }
 0xa0b   :  { %5805 = vst [vmem:[#allocation17_spill] sm:$0xff] %v3973_v34 }
 0xa0d   :  { %1138 = vmatpush1.bf16.msra.mxu1 %v3958_v36  ;;  %v3976_v36 = vld [vmem:[#allocation7 + $0xb0] ss:$8 sps:$4 sm:$0xff]  }
 0xa0e   :  { %1139 = vmatprep.subr.bf16.mxu1 %v3961_v40  ;;  %5806 = vst [vmem:[#allocation18_spill] sm:$0xff] %v3976_v36  ;;  %v3979_v40 = vld [vmem:[#allocation7 + $0xc4] ss:$8 sps:$4 sm:$0xff]  }
 0xa0f   :  { %5807 = vst [vmem:[#allocation19_spill] sm:$0xff] %v3979_v40 }
 0xa11   :  { %1140 = vmatpush1.bf16.msra.mxu1 %v3964_v42  ;;  %v3982_v42 = vld [vmem:[#allocation7 + $0xc0] ss:$8 sps:$4 sm:$0xff]  }
 0xa12   :  { %1141 = vmatprep.subr.bf16.mxu1 %v3967_v49  ;;  %5808 = vst [vmem:[#allocation20_spill] sm:$0xff] %v3982_v42  ;;  %v3985_v49 = vld [vmem:[#allocation7 + $0xd4] ss:$8 sps:$4 sm:$0xff]  }
 0xa13   :  { %5809 = vst [vmem:[#allocation21_spill] sm:$0xff] %v3985_v49 }
 0xa15   :  { %1142 = vmatpush1.bf16.msra.mxu1 %v3970_v32  ;;  %v3988_v32 = vld [vmem:[#allocation7 + $0xd0] ss:$8 sps:$4 sm:$0xff]  }
 0xa16   :  { %1143 = vmatprep.subr.bf16.mxu1 %v3973_v34  ;;  %5810 = vst [vmem:[#allocation22_spill] sm:$0xff] %v3988_v32 }
 0xa19   :  { %1144 = vmatpush1.bf16.msra.mxu1 %v3976_v36 }
 0xa1a   :  { %1145 = vmatprep.subr.bf16.mxu1 %v3979_v40 }
 0xa1d   :  { %1146 = vmatpush1.bf16.msra.mxu1 %v3982_v42  ;;  %v1062_v42 = vadd.f32 %v3840_v38, %v3444_v33 }
 0xa1e   :  { %1147 = vmatprep.subr.bf16.mxu1 %v3985_v49  ;;  %v1063_v49 = vadd.f32 %v3844_v44, %v3439_v0 }
 0xa21   :  { %1148 = vmatpush1.bf16.msra.mxu1 %v3988_v32 }
 0xa22   :  { %1149 = vmatprep.subr.bf16.mxu1 %v5791_v14  ;;  %v1064_v14 = vadd.f32 %v3848_v50, %v3449_v39 }
 0xa25   :  { %1150 = vmatpush1.bf16.msra.mxu1 %v5792_v16 }
 0xa26   :  { %1151 = vmatprep.subr.bf16.mxu1 %v5793_v35 }
 0xa29   :  { %1152 = vmatpush1.bf16.msra.mxu1 %v5794_v29  ;;  %v1065_v29 = vadd.f32 %v3850_v56, %v3454_v41 }
 0xa2a   :  { %1223 = vmatprep.subr.bf16.mxu1 %v3833_v30 }
 0xabf   :  { %v1053_v40 = vpop.f32.mrb[20].mxu1 }
 0xac0   :  { %v4000_v36 = vsub.f32 %v1062_v42, %v1053_v40  ;;  %v1055_v32 = vpop.f32.mrb[21].mxu1  ;;  %v5811_v40 = vld [vmem:[#allocation24_spill] sm:$0xff]  ;;  %v5812_v42 = vld [vmem:[#allocation25_spill] sm:$0xff] }
 0xac1   :  { %v4004_v16 = vsub.f32 %v1063_v49, %v1055_v32  ;;  %v1057_v35 = vpop.f32.mrb[22].mxu1 }
 0xac2   :  { %v4008_v30 = vsub.f32 %v1064_v14, %v1057_v35  ;;  %v1059_v34 = vpop.f32.mrb[23].mxu1  ;;  %v5813_v14 = vld [vmem:[#allocation26_spill] sm:$0xff]  ;;  %v5814_v35 = vld [vmem:[#allocation27_spill] sm:$0xff] }
 0xac3   :  { %v4010_v33 = vsub.f32 %v1065_v29, %v1059_v34  ;;  %v5815_v29 = vld [vmem:[#allocation12_spill] sm:$0xff] }
 0xac4   :  { %v1070_v0 = vpack.c.bf16 %v4008_v30, %v4000_v36 }
 0xac5   :  { %v1071_v38 = vpack.c.bf16 %v4010_v33, %v4004_v16 }
 0xac7   :  { %1104 = vmatprep.mubr.bf16.mxu0 %v1071_v38  ;;  %v5817_v38 = vld [vmem:[#allocation15_spill] sm:$0xff] }
 0xac8   :  { %1105 = vmatmul.mubr.bf16.vlgmr.msra.gmra.mrb[24].mxu0 %v1070_v0  ;;  %v5816_v0 = vld [vmem:[#allocation14_spill] sm:$0xff] }
 0xac9   :  { %1175 = vmatpush1.bf16.msra.mxu0 %v3728_v59 }
 0xaca   :  { %1176 = vmatprep.subr.bf16.mxu0 %v3731_v17 }
 0xacd   :  { %1177 = vmatpush1.bf16.msra.mxu0 %v3734_v27 }
 0xace   :  { %1178 = vmatprep.subr.bf16.mxu0 %v3737_v31 }
 0xad1   :  { %1179 = vmatpush1.bf16.msra.mxu0 %v3740_v45 }
 0xad2   :  { %1180 = vmatprep.subr.bf16.mxu0 %v3743_v47 }
 0xad5   :  { %1181 = vmatpush1.bf16.msra.mxu0 %v3746_v62 }
 0xad6   :  { %1182 = vmatprep.subr.bf16.mxu0 %v3749_v13 }
 0xad9   :  { %1183 = vmatpush1.bf16.msra.mxu0 %v3752_v7 }
 0xada   :  { %1184 = vmatprep.subr.bf16.mxu0 %v3755_v9 }
 0xadd   :  { %1185 = vmatpush1.bf16.msra.mxu0 %v3758_v10 }
 0xade   :  { %1186 = vmatprep.subr.bf16.mxu0 %v3761_v12 }
 0xae1   :  { %1187 = vmatpush1.bf16.msra.mxu0 %v3764_v43 }
 0xae2   :  { %1188 = vmatprep.subr.bf16.mxu0 %v3767_v15 }
 0xae5   :  { %1189 = vmatpush1.bf16.msra.mxu0 %v3870_v19 }
 0xae6   :  { %1190 = vmatprep.subr.bf16.mxu0 %v3873_v20 }
 0xae9   :  { %1191 = vmatpush1.bf16.msra.mxu0 %v3876_v22 }
 0xaea   :  { %1192 = vmatprep.subr.bf16.mxu0 %v3879_v24 }
 0xaed   :  { %1193 = vmatpush1.bf16.msra.mxu0 %v3882_v26 }
 0xaee   :  { %1194 = vmatprep.subr.bf16.mxu0 %v3885_v28 }
 0xaf1   :  { %1195 = vmatpush1.bf16.msra.mxu0 %v3888_v57 }
 0xaf2   :  { %1196 = vmatprep.subr.bf16.mxu0 %v3891_v60 }
 0xaf5   :  { %1197 = vmatpush1.bf16.msra.mxu0 %v3894_v18 }
 0xaf6   :  { %1198 = vmatprep.subr.bf16.mxu0 %v3897_v8 }
 0xaf9   :  { %1199 = vmatpush1.bf16.msra.mxu0 %v3900_v11 }
 0xafa   :  { %1200 = vmatprep.subr.bf16.mxu0 %v3903_v37 }
 0xafd   :  { %1201 = vmatpush1.bf16.msra.mxu0 %v3906_v23 }
 0xafe   :  { %1202 = vmatprep.subr.bf16.mxu0 %v3909_v25 }
 0xb01   :  { %1203 = vmatpush1.bf16.msra.mxu0 %v3912_v61 }
 0xb02   :  { %1204 = vmatprep.subr.bf16.mxu0 %v3915_v63 }
 0xb05   :  { %1205 = vmatpush1.bf16.msra.mxu0 %v3918_v58 }
 0xb06   :  { %1276 = vmatprep.subr.bf16.mxu0 %v3787_v21 }
 0xb9b   :  { %v1106_v39 = vpop.f32.mrb[24].mxu0 }
 0xb9c   :  { %v1108_v41 = vpop.f32.mrb[25].mxu0 }
 0xb9d   :  { %v1110_v44 = vpop.f32.mrb[26].mxu0  ;;  %v1116_v49 = vmax.f32 %v1108_v41, 0.0  ;;  %v5819_v41 = vld [vmem:[#allocation17_spill] sm:$0xff] }
 0xb9e   :  { %v1119_v50 = vpack.c.bf16 %v1110_v44, %v1106_v39  ;;  %v1112_v56 = vpop.f32.mrb[27].mxu0  ;;  %v5818_v39 = vld [vmem:[#allocation16_spill] sm:$0xff]  ;;  %v5820_v44 = vld [vmem:[#allocation18_spill] sm:$0xff] }
 0xb9f   :  { %v1118_v32 = vmax.f32 %v1112_v56, 0.0  ;;  %v5822_v56 = vld [vmem:[#allocation20_spill] sm:$0xff] }
 0xba1   :  { %v1120_v34 = vpack.c.bf16 %v1118_v32, %v1116_v49  ;;  %v5823_v49 = vld [vmem:[#allocation21_spill] sm:$0xff]  ;;  %v5824_v32 = vld [vmem:[#allocation22_spill] sm:$0xff] }
 0xba3   :  { %1153 = vmatprep.mubr.bf16.mxu1 %v1120_v34  ;;  %v4075_v34 = vld [vmem:[#allocation7 + $0xe4] ss:$8 sps:$4 sm:$0xff]  }
 0xba4   :  { %1154 = vmatmul.mubr.bf16.vlgmr.msra.gmra.mrb[24].mxu1 %v1119_v50  ;;  %v5821_v50 = vld [vmem:[#allocation19_spill] sm:$0xff]  ;;  %5825 = vst [vmem:[#allocation28_spill] sm:$0xff] %v4075_v34 }
 0xba5   :  { %1224 = vmatpush1.bf16.msra.mxu1 %v3790_v51 }
 0xba6   :  { %1225 = vmatprep.subr.bf16.mxu1 %v3793_v53 }
 0xba9   :  { %1226 = vmatpush1.bf16.msra.mxu1 %v3796_v54 }
 0xbaa   :  { %1227 = vmatprep.subr.bf16.mxu1 %v3799_v55 }
 0xbad   :  { %1228 = vmatpush1.bf16.msra.mxu1 %v3802_v3 }
 0xbae   :  { %1229 = vmatprep.subr.bf16.mxu1 %v3805_v4 }
 0xbb1   :  { %1230 = vmatpush1.bf16.msra.mxu1 %v3928_v46 }
 0xbb2   :  { %1231 = vmatprep.subr.bf16.mxu1 %v3931_v48 }
 0xbb5   :  { %1232 = vmatpush1.bf16.msra.mxu1 %v3934_v52 }
 0xbb6   :  { %1233 = vmatprep.subr.bf16.mxu1 %v3937_v5 }
 0xbb9   :  { %1234 = vmatpush1.bf16.msra.mxu1 %v3940_v6 }
 0xbba   :  { %1235 = vmatprep.subr.bf16.mxu1 %v3943_v1 }
 0xbbd   :  { %1236 = vmatpush1.bf16.msra.mxu1 %v3946_v2 }
 0xbbe   :  { %1237 = vmatprep.subr.bf16.mxu1 %v5811_v40 }
 0xbc1   :  { %1238 = vmatpush1.bf16.msra.mxu1 %v5812_v42 }
 0xbc2   :  { %1239 = vmatprep.subr.bf16.mxu1 %v5813_v14 }
 0xbc5   :  { %1240 = vmatpush1.bf16.msra.mxu1 %v5814_v35 }
 0xbc6   :  { %1241 = vmatprep.subr.bf16.mxu1 %v5815_v29 }
 0xbc9   :  { %1242 = vmatpush1.bf16.msra.mxu1 %v5816_v0  ;;  %v4078_v0 = vld [vmem:[#allocation7 + $0xe0] ss:$8 sps:$4 sm:$0xff]  }
 0xbca   :  { %1243 = vmatprep.subr.bf16.mxu1 %v5817_v38  ;;  %5826 = vst [vmem:[#allocation29_spill] sm:$0xff] %v4078_v0  ;;  %v4116_v38 = vld [vmem:[%s5522_s1 + $0x18] sm:$0xff] }
 0xbcd   :  { %1244 = vmatpush1.bf16.msra.mxu1 %v5818_v39  ;;  %v4081_v39 = vld [vmem:[#allocation7 + $0xf4] ss:$8 sps:$4 sm:$0xff]  }
 0xbce   :  { %1245 = vmatprep.subr.bf16.mxu1 %v5819_v41  ;;  %5827 = vst [vmem:[#allocation30_spill] sm:$0xff] %v4081_v39 }
 0xbd1   :  { %1246 = vmatpush1.bf16.msra.mxu1 %v5820_v44  ;;  %v4084_v44 = vld [vmem:[#allocation7 + $0xf0] ss:$8 sps:$4 sm:$0xff]  }
 0xbd2   :  { %1247 = vmatprep.subr.bf16.mxu1 %v5821_v50  ;;  %5828 = vst [vmem:[#allocation31_spill] sm:$0xff] %v4084_v44  ;;  %v4107_v50 = vld [vmem:[%s5522_s1 + $0x10] sm:$0xff] }
 0xbd5   :  { %1248 = vmatpush1.bf16.msra.mxu1 %v5822_v56  ;;  %v5829_v56 = vld [vmem:[#allocation23_spill] sm:$0xff] }
 0xbd6   :  { %1249 = vmatprep.subr.bf16.mxu1 %v5823_v49 }
 0xbd9   :  { %1250 = vmatpush1.bf16.msra.mxu1 %v5824_v32  ;;  %v4091_v32 = vld [vmem:[%s5522_s1] sm:$0xff] }
 0xbda   :  { %1251 = vmatprep.subr.bf16.mxu1 %v4075_v34  ;;  %5830 = vst [vmem:[#allocation32_spill] sm:$0xff] %v4091_v32  ;;  %v1164_v34 = vadd.f32 %v4091_v32, %v4000_v36  ;;  %v1166_v36 = vadd.f32 %v4107_v50, %v4008_v30 }
 0xbdd   :  { %1252 = vmatpush1.bf16.msra.mxu1 %v4078_v0  ;;  %v4098_v0 = vld [vmem:[%s5522_s1 + $0x8] sm:$0xff] }
 0xbde   :  { %1253 = vmatprep.subr.bf16.mxu1 %v4081_v39  ;;  %5831 = vst [vmem:[#allocation33_spill] sm:$0xff] %v4098_v0  ;;  %v1165_v39 = vadd.f32 %v4098_v0, %v4004_v16  ;;  %v1167_v16 = vadd.f32 %v4116_v38, %v4010_v33 }
 0xbe1   :  { %1254 = vmatpush1.bf16.msra.mxu1 %v4084_v44 }
 0xbe2   :  { %1325 = vmatprep.subr.bf16.mxu1 %v5829_v56 }
 0xc77   :  { %v1155_v49 = vpop.f32.mrb[24].mxu1 }
 0xc78   :  { %v4102_v44 = vsub.f32 %v1164_v34, %v1155_v49  ;;  %v1157_v56 = vpop.f32.mrb[25].mxu1 }
 0xc79   :  { %v4111_v32 = vsub.f32 %v1165_v39, %v1157_v56  ;;  %v1159_v41 = vpop.f32.mrb[26].mxu1 }
 0xc7a   :  { %v4120_v49 = vsub.f32 %v1166_v36, %v1159_v41  ;;  %v1161_v34 = vpop.f32.mrb[27].mxu1 }
 0xc7b   :  { %v4122_v0 = vsub.f32 %v1167_v16, %v1161_v34 }
 0xc7c   :  { %v1172_v29 = vpack.c.bf16 %v4120_v49, %v4102_v44 }
 0xc7d   :  { %v1173_v30 = vpack.c.bf16 %v4122_v0, %v4111_v32 }
 0xc7f   :  { %1206 = vmatprep.mubr.bf16.mxu0 %v1173_v30  ;;  %v5832_v30 = vld [vmem:[#allocation12_spill] sm:$0xff] }
 0xc80   :  { %1207 = vmatmul.mubr.bf16.vlgmr.msra.gmra.mrb[28].mxu0 %v1172_v29 }
 0xc81   :  { %1277 = vmatpush1.bf16.msra.mxu0 %v3728_v59 }
 0xc82   :  { %1278 = vmatprep.subr.bf16.mxu0 %v3731_v17 }
 0xc85   :  { %1279 = vmatpush1.bf16.msra.mxu0 %v3734_v27 }
 0xc86   :  { %1280 = vmatprep.subr.bf16.mxu0 %v3737_v31 }
 0xc89   :  { %1281 = vmatpush1.bf16.msra.mxu0 %v3740_v45 }
 0xc8a   :  { %1282 = vmatprep.subr.bf16.mxu0 %v3743_v47 }
 0xc8d   :  { %1283 = vmatpush1.bf16.msra.mxu0 %v3746_v62 }
 0xc8e   :  { %1284 = vmatprep.subr.bf16.mxu0 %v3749_v13 }
 0xc91   :  { %1285 = vmatpush1.bf16.msra.mxu0 %v3752_v7 }
 0xc92   :  { %1286 = vmatprep.subr.bf16.mxu0 %v3755_v9 }
 0xc95   :  { %1287 = vmatpush1.bf16.msra.mxu0 %v3758_v10 }
 0xc96   :  { %1288 = vmatprep.subr.bf16.mxu0 %v3761_v12 }
 0xc99   :  { %1289 = vmatpush1.bf16.msra.mxu0 %v3764_v43 }
 0xc9a   :  { %1290 = vmatprep.subr.bf16.mxu0 %v3767_v15 }
 0xc9d   :  { %1291 = vmatpush1.bf16.msra.mxu0 %v3870_v19 }
 0xc9e   :  { %1292 = vmatprep.subr.bf16.mxu0 %v3873_v20 }
 0xca1   :  { %1293 = vmatpush1.bf16.msra.mxu0 %v3876_v22 }
 0xca2   :  { %1294 = vmatprep.subr.bf16.mxu0 %v3879_v24 }
 0xca5   :  { %1295 = vmatpush1.bf16.msra.mxu0 %v3882_v26 }
 0xca6   :  { %1296 = vmatprep.subr.bf16.mxu0 %v3885_v28 }
 0xca9   :  { %1297 = vmatpush1.bf16.msra.mxu0 %v3888_v57 }
 0xcaa   :  { %1298 = vmatprep.subr.bf16.mxu0 %v3891_v60 }
 0xcad   :  { %1299 = vmatpush1.bf16.msra.mxu0 %v3894_v18 }
 0xcae   :  { %1300 = vmatprep.subr.bf16.mxu0 %v3897_v8 }
 0xcb1   :  { %1301 = vmatpush1.bf16.msra.mxu0 %v3900_v11 }
 0xcb2   :  { %1302 = vmatprep.subr.bf16.mxu0 %v3903_v37 }
 0xcb5   :  { %1303 = vmatpush1.bf16.msra.mxu0 %v3906_v23 }
 0xcb6   :  { %1304 = vmatprep.subr.bf16.mxu0 %v3909_v25 }
 0xcb9   :  { %1305 = vmatpush1.bf16.msra.mxu0 %v3912_v61 }
 0xcba   :  { %1306 = vmatprep.subr.bf16.mxu0 %v3915_v63 }
 0xcbd   :  { %1307 = vmatpush1.bf16.msra.mxu0 %v3918_v58 }
 0xcbe   :  { %1378 = vmatprep.subr.bf16.mxu0 %v3787_v21 }
 0xd53   :  { %v1208_v33 = vpop.f32.mrb[28].mxu0 }
 0xd54   :  { %v1210_v29 = vpop.f32.mrb[29].mxu0 }
 0xd55   :  { %v1212_v39 = vpop.f32.mrb[30].mxu0  ;;  %v1218_v36 = vmax.f32 %v1210_v29, 0.0  ;;  %v5834_v29 = vld [vmem:[#allocation15_spill] sm:$0xff] }
 0xd56   :  { %v1221_v41 = vpack.c.bf16 %v1212_v39, %v1208_v33  ;;  %v1214_v56 = vpop.f32.mrb[31].mxu0  ;;  %v5833_v33 = vld [vmem:[#allocation14_spill] sm:$0xff]  ;;  %v5835_v39 = vld [vmem:[#allocation16_spill] sm:$0xff] }
 0xd57   :  { %v1220_v16 = vmax.f32 %v1214_v56, 0.0  ;;  %v5837_v56 = vld [vmem:[#allocation18_spill] sm:$0xff] }
 0xd59   :  { %v1222_v34 = vpack.c.bf16 %v1220_v16, %v1218_v36  ;;  %v5838_v36 = vld [vmem:[#allocation19_spill] sm:$0xff]  ;;  %v5839_v16 = vld [vmem:[#allocation20_spill] sm:$0xff] }
 0xd5b   :  { %1255 = vmatprep.mubr.bf16.mxu1 %v1222_v34  ;;  %v5840_v34 = vld [vmem:[#allocation21_spill] sm:$0xff] }
 0xd5c   :  { %1256 = vmatmul.mubr.bf16.vlgmr.msra.gmra.mrb[28].mxu1 %v1221_v41  ;;  %v5836_v41 = vld [vmem:[#allocation17_spill] sm:$0xff] }
 0xd5d   :  { %1326 = vmatpush1.bf16.msra.mxu1 %v3790_v51 }
 0xd5e   :  { %1327 = vmatprep.subr.bf16.mxu1 %v3793_v53 }
 0xd61   :  { %1328 = vmatpush1.bf16.msra.mxu1 %v3796_v54 }
 0xd62   :  { %1329 = vmatprep.subr.bf16.mxu1 %v3799_v55 }
 0xd65   :  { %1330 = vmatpush1.bf16.msra.mxu1 %v3802_v3 }
 0xd66   :  { %1331 = vmatprep.subr.bf16.mxu1 %v3805_v4 }
 0xd69   :  { %1332 = vmatpush1.bf16.msra.mxu1 %v3928_v46 }
 0xd6a   :  { %1333 = vmatprep.subr.bf16.mxu1 %v3931_v48 }
 0xd6d   :  { %1334 = vmatpush1.bf16.msra.mxu1 %v3934_v52 }
 0xd6e   :  { %1335 = vmatprep.subr.bf16.mxu1 %v3937_v5 }
 0xd71   :  { %1336 = vmatpush1.bf16.msra.mxu1 %v3940_v6 }
 0xd72   :  { %1337 = vmatprep.subr.bf16.mxu1 %v3943_v1 }
 0xd75   :  { %1338 = vmatpush1.bf16.msra.mxu1 %v3946_v2 }
 0xd76   :  { %1339 = vmatprep.subr.bf16.mxu1 %v5811_v40 }
 0xd79   :  { %1340 = vmatpush1.bf16.msra.mxu1 %v5812_v42 }
 0xd7a   :  { %1341 = vmatprep.subr.bf16.mxu1 %v5813_v14  ;;  %v5841_v14 = vld [vmem:[#allocation22_spill] sm:$0xff] }
 0xd7d   :  { %1342 = vmatpush1.bf16.msra.mxu1 %v5814_v35  ;;  %v5842_v35 = vld [vmem:[#allocation28_spill] sm:$0xff] }
 0xd7e   :  { %1343 = vmatprep.subr.bf16.mxu1 %v5832_v30  ;;  %v5843_v30 = vld [vmem:[#allocation29_spill] sm:$0xff] }
 0xd81   :  { %1344 = vmatpush1.bf16.msra.mxu1 %v5833_v33  ;;  %v5844_v33 = vld [vmem:[#allocation30_spill] sm:$0xff] }
 0xd82   :  { %1345 = vmatprep.subr.bf16.mxu1 %v5834_v29  ;;  %v5845_v29 = vld [vmem:[#allocation31_spill] sm:$0xff] }
 0xd85   :  { %1346 = vmatpush1.bf16.msra.mxu1 %v5835_v39  ;;  %v5846_v39 = vld [vmem:[#allocation23_spill] sm:$0xff] }
 0xd86   :  { %1347 = vmatprep.subr.bf16.mxu1 %v5836_v41 }
 0xd89   :  { %1348 = vmatpush1.bf16.msra.mxu1 %v5837_v56  ;;  %v5847_v56 = vld [vmem:[#allocation32_spill] sm:$0xff] }
 0xd8a   :  { %1349 = vmatprep.subr.bf16.mxu1 %v5838_v36  ;;  %v1266_v41 = vadd.f32 %v5847_v56, %v4102_v44 }
 0xd8d   :  { %1350 = vmatpush1.bf16.msra.mxu1 %v5839_v16  ;;  %v5848_v16 = vld [vmem:[#allocation33_spill] sm:$0xff] }
 0xd8e   :  { %1351 = vmatprep.subr.bf16.mxu1 %v5840_v34  ;;  %v1267_v42 = vadd.f32 %v5848_v16, %v4111_v32 }
 0xd91   :  { %1352 = vmatpush1.bf16.msra.mxu1 %v5841_v14 }
 0xd92   :  { %1353 = vmatprep.subr.bf16.mxu1 %v5842_v35  ;;  %v1268_v35 = vadd.f32 %v4107_v50, %v4120_v49 }
 0xd95   :  { %1354 = vmatpush1.bf16.msra.mxu1 %v5843_v30 }
 0xd96   :  { %1355 = vmatprep.subr.bf16.mxu1 %v5844_v33 }
 0xd99   :  { %1356 = vmatpush1.bf16.msra.mxu1 %v5845_v29  ;;  %v1269_v29 = vadd.f32 %v4116_v38, %v4122_v0 }
 0xd9a   :  { %1427 = vmatprep.subr.bf16.mxu1 %v5846_v39 }
 0xe2f   :  { %v1257_v36 = vpop.f32.mrb[28].mxu1 }
 0xe30   :  { %v4196_v34 = vsub.f32 %v1266_v41, %v1257_v36  ;;  %v1259_v14 = vpop.f32.mrb[29].mxu1  ;;  %v5849_v36 = vld [vmem:[#allocation24_spill] sm:$0xff] }
 0xe31   :  { %v4200_v30 = vsub.f32 %v1267_v42, %v1259_v14  ;;  %v1261_v33 = vpop.f32.mrb[30].mxu1 }
 0xe32   :  { %v4204_v39 = vsub.f32 %v1268_v35, %v1261_v33  ;;  %v1263_v40 = vpop.f32.mrb[31].mxu1 }
 0xe33   :  { %v4206_v44 = vsub.f32 %v1269_v29, %v1263_v40 }
 0xe34   :  { %v1274_v32 = vpack.c.bf16 %v4204_v39, %v4196_v34 }
 0xe35   :  { %v1275_v41 = vpack.c.bf16 %v4206_v44, %v4200_v30 }
 0xe37   :  { %1308 = vmatprep.mubr.bf16.mxu0 %v1275_v41  ;;  %v5851_v41 = vld [vmem:[#allocation26_spill] sm:$0xff] }
 0xe38   :  { %1309 = vmatmul.mubr.bf16.vlgmr.msra.gmra.mrb[32].mxu0 %v1274_v32  ;;  %v5850_v32 = vld [vmem:[#allocation25_spill] sm:$0xff] }
 0xe39   :  { %1379 = vmatpush1.bf16.msra.mxu0 %v3728_v59 }
 0xe3a   :  { %1380 = vmatprep.subr.bf16.mxu0 %v3731_v17 }
 0xe3d   :  { %1381 = vmatpush1.bf16.msra.mxu0 %v3734_v27 }
 0xe3e   :  { %1382 = vmatprep.subr.bf16.mxu0 %v3737_v31 }
 0xe41   :  { %1383 = vmatpush1.bf16.msra.mxu0 %v3740_v45 }
 0xe42   :  { %1384 = vmatprep.subr.bf16.mxu0 %v3743_v47 }
 0xe45   :  { %1385 = vmatpush1.bf16.msra.mxu0 %v3746_v62 }
 0xe46   :  { %1386 = vmatprep.subr.bf16.mxu0 %v3749_v13 }
 0xe49   :  { %1387 = vmatpush1.bf16.msra.mxu0 %v3752_v7 }
 0xe4a   :  { %1388 = vmatprep.subr.bf16.mxu0 %v3755_v9 }
 0xe4d   :  { %1389 = vmatpush1.bf16.msra.mxu0 %v3758_v10 }
 0xe4e   :  { %1390 = vmatprep.subr.bf16.mxu0 %v3761_v12 }
 0xe51   :  { %1391 = vmatpush1.bf16.msra.mxu0 %v3764_v43 }
 0xe52   :  { %1392 = vmatprep.subr.bf16.mxu0 %v3767_v15 }
 0xe55   :  { %1393 = vmatpush1.bf16.msra.mxu0 %v3870_v19 }
 0xe56   :  { %1394 = vmatprep.subr.bf16.mxu0 %v3873_v20 }
 0xe59   :  { %1395 = vmatpush1.bf16.msra.mxu0 %v3876_v22 }
 0xe5a   :  { %1396 = vmatprep.subr.bf16.mxu0 %v3879_v24 }
 0xe5d   :  { %1397 = vmatpush1.bf16.msra.mxu0 %v3882_v26 }
 0xe5e   :  { %1398 = vmatprep.subr.bf16.mxu0 %v3885_v28 }
 0xe61   :  { %1399 = vmatpush1.bf16.msra.mxu0 %v3888_v57 }
 0xe62   :  { %1400 = vmatprep.subr.bf16.mxu0 %v3891_v60 }
 0xe65   :  { %1401 = vmatpush1.bf16.msra.mxu0 %v3894_v18 }
 0xe66   :  { %1402 = vmatprep.subr.bf16.mxu0 %v3897_v8 }
 0xe69   :  { %1403 = vmatpush1.bf16.msra.mxu0 %v3900_v11 }
 0xe6a   :  { %1404 = vmatprep.subr.bf16.mxu0 %v3903_v37 }
 0xe6d   :  { %1405 = vmatpush1.bf16.msra.mxu0 %v3906_v23 }
 0xe6e   :  { %1406 = vmatprep.subr.bf16.mxu0 %v3909_v25 }
 0xe71   :  { %1407 = vmatpush1.bf16.msra.mxu0 %v3912_v61 }
 0xe72   :  { %1408 = vmatprep.subr.bf16.mxu0 %v3915_v63 }
 0xe75   :  { %1409 = vmatpush1.bf16.msra.mxu0 %v3918_v58 }
 0xe76   :  { %1480 = vmatprep.subr.bf16.mxu0 %v3787_v21 }
 0xf0b   :  { %v1310_v40 = vpop.f32.mrb[32].mxu0 }
 0xf0c   :  { %v1312_v42 = vpop.f32.mrb[33].mxu0 }
 0xf0d   :  { %v1314_v14 = vpop.f32.mrb[34].mxu0  ;;  %v1320_v49 = vmax.f32 %v1312_v42, 0.0  ;;  %v5853_v42 = vld [vmem:[#allocation12_spill] sm:$0xff] }
 0xf0e   :  { %v1323_v35 = vpack.c.bf16 %v1314_v14, %v1310_v40  ;;  %v1316_v0 = vpop.f32.mrb[35].mxu0  ;;  %v5852_v40 = vld [vmem:[#allocation27_spill] sm:$0xff]  ;;  %v5854_v14 = vld [vmem:[#allocation14_spill] sm:$0xff] }
 0xf0f   :  { %v1322_v33 = vmax.f32 %v1316_v0, 0.0  ;;  %v5856_v0 = vld [vmem:[#allocation16_spill] sm:$0xff] }
 0xf11   :  { %v1324_v29 = vpack.c.bf16 %v1322_v33, %v1320_v49  ;;  %v5857_v49 = vld [vmem:[#allocation17_spill] sm:$0xff]  ;;  %v5858_v33 = vld [vmem:[#allocation18_spill] sm:$0xff] }
 0xf13   :  { %1357 = vmatprep.mubr.bf16.mxu1 %v1324_v29  ;;  %v5859_v29 = vld [vmem:[#allocation19_spill] sm:$0xff] }
 0xf14   :  { %1358 = vmatmul.mubr.bf16.vlgmr.msra.gmra.mrb[32].mxu1 %v1323_v35  ;;  %v5855_v35 = vld [vmem:[#allocation15_spill] sm:$0xff] }
 0xf15   :  { %1428 = vmatpush1.bf16.msra.mxu1 %v3790_v51 }
 0xf16   :  { %1429 = vmatprep.subr.bf16.mxu1 %v3793_v53 }
 0xf19   :  { %1430 = vmatpush1.bf16.msra.mxu1 %v3796_v54 }
 0xf1a   :  { %1431 = vmatprep.subr.bf16.mxu1 %v3799_v55 }
 0xf1d   :  { %1432 = vmatpush1.bf16.msra.mxu1 %v3802_v3 }
 0xf1e   :  { %1433 = vmatprep.subr.bf16.mxu1 %v3805_v4 }
 0xf21   :  { %1434 = vmatpush1.bf16.msra.mxu1 %v3928_v46 }
 0xf22   :  { %1435 = vmatprep.subr.bf16.mxu1 %v3931_v48 }
 0xf25   :  { %1436 = vmatpush1.bf16.msra.mxu1 %v3934_v52 }
 0xf26   :  { %1437 = vmatprep.subr.bf16.mxu1 %v3937_v5 }
 0xf29   :  { %1438 = vmatpush1.bf16.msra.mxu1 %v3940_v6 }
 0xf2a   :  { %1439 = vmatprep.subr.bf16.mxu1 %v3943_v1 }
 0xf2d   :  { %1440 = vmatpush1.bf16.msra.mxu1 %v3946_v2 }
 0xf2e   :  { %1441 = vmatprep.subr.bf16.mxu1 %v5849_v36  ;;  %v5860_v36 = vld [vmem:[#allocation20_spill] sm:$0xff] }
 0xf31   :  { %1442 = vmatpush1.bf16.msra.mxu1 %v5850_v32  ;;  %v5861_v32 = vld [vmem:[#allocation21_spill] sm:$0xff] }
 0xf32   :  { %1443 = vmatprep.subr.bf16.mxu1 %v5851_v41  ;;  %v5862_v41 = vld [vmem:[#allocation22_spill] sm:$0xff] }
 0xf35   :  { %1444 = vmatpush1.bf16.msra.mxu1 %v5852_v40  ;;  %v5863_v40 = vld [vmem:[#allocation28_spill] sm:$0xff] }
 0xf36   :  { %1445 = vmatprep.subr.bf16.mxu1 %v5853_v42  ;;  %v5864_v42 = vld [vmem:[#allocation29_spill] sm:$0xff] }
 0xf39   :  { %1446 = vmatpush1.bf16.msra.mxu1 %v5854_v14  ;;  %v5865_v14 = vld [vmem:[#allocation30_spill] sm:$0xff] }
 0xf3a   :  { %1447 = vmatprep.subr.bf16.mxu1 %v5855_v35  ;;  %v5866_v35 = vld [vmem:[#allocation31_spill] sm:$0xff] }
 0xf3d   :  { %1448 = vmatpush1.bf16.msra.mxu1 %v5856_v0  ;;  %v5867_v0 = vld [vmem:[#allocation23_spill] sm:$0xff] }
 0xf3e   :  { %1449 = vmatprep.subr.bf16.mxu1 %v5857_v49 }
 0xf41   :  { %1450 = vmatpush1.bf16.msra.mxu1 %v5858_v33  ;;  %v1368_v33 = vadd.f32 %v5847_v56, %v4196_v34 }
 0xf42   :  { %1451 = vmatprep.subr.bf16.mxu1 %v5859_v29 }
 0xf45   :  { %1452 = vmatpush1.bf16.msra.mxu1 %v5860_v36  ;;  %v1369_v36 = vadd.f32 %v5848_v16, %v4200_v30 }
 0xf46   :  { %1453 = vmatprep.subr.bf16.mxu1 %v5861_v32 }
 0xf49   :  { %1454 = vmatpush1.bf16.msra.mxu1 %v5862_v41 }
 0xf4a   :  { %1455 = vmatprep.subr.bf16.mxu1 %v5863_v40  ;;  %v1370_v40 = vadd.f32 %v4107_v50, %v4204_v39  ;;  %v5881_v39 = vld [vmem:[#allocation22_spill] sm:$0xff] }
 0xf4d   :  { %1456 = vmatpush1.bf16.msra.mxu1 %v5864_v42 }
 0xf4e   :  { %1457 = vmatprep.subr.bf16.mxu1 %v5865_v14 }
 0xf51   :  { %1458 = vmatpush1.bf16.msra.mxu1 %v5866_v35  ;;  %v1371_v35 = vadd.f32 %v4116_v38, %v4206_v44  ;;  %v5882_v44 = vld [vmem:[#allocation28_spill] sm:$0xff] }
 0xf52   :  { %1529 = vmatprep.subr.bf16.mxu1 %v5867_v0 }
 0xfe7   :  { %v1359_v29 = vpop.f32.mrb[32].mxu1 }
 0xfe8   :  { %v4280_v32 = vsub.f32 %v1368_v33, %v1359_v29  ;;  %v1361_v41 = vpop.f32.mrb[33].mxu1 }
 0xfe9   :  { %v4284_v42 = vsub.f32 %v1369_v36, %v1361_v41  ;;  %v1363_v14 = vpop.f32.mrb[34].mxu1  ;;  %v5883_v36 = vld [vmem:[#allocation29_spill] sm:$0xff]  ;;  %v5884_v41 = vld [vmem:[#allocation30_spill] sm:$0xff] }
 0xfea   :  { %v4288_v0 = vsub.f32 %v1370_v40, %v1363_v14  ;;  %v1365_v49 = vpop.f32.mrb[35].mxu1  ;;  %v5885_v40 = vld [vmem:[#allocation31_spill] sm:$0xff] }
 0xfeb   :  { %v4290_v34 = vsub.f32 %v1371_v35, %v1365_v49  ;;  %v5886_v14 = vld [vmem:[#allocation23_spill] sm:$0xff]  ;;  %v1470_v35 = vadd.f32 %v5847_v56, %v4280_v32  ;;  %v1471_v29 = vadd.f32 %v5848_v16, %v4284_v42 }
 0xfec   :  { %v1376_v30 = vpack.c.bf16 %v4288_v0, %v4280_v32 }
 0xfed   :  { %v1377_v33 = vpack.c.bf16 %v4290_v34, %v4284_v42 }
 0xfef   :  { %1410 = vmatprep.mubr.bf16.mxu0 %v1377_v33 }
 0xff0   :  { %1411 = vmatmul.mubr.bf16.vlgmr.msra.gmra.mrb[36].mxu0 %v1376_v30 }
 0xff1   :  { %1481 = vmatpush1.bf16.msra.mxu0 %v3728_v59 }
 0xff2   :  { %1482 = vmatprep.subr.bf16.mxu0 %v3731_v17 }
 0xff5   :  { %1483 = vmatpush1.bf16.msra.mxu0 %v3734_v27 }
 0xff6   :  { %1484 = vmatprep.subr.bf16.mxu0 %v3737_v31 }
 0xff9   :  { %1485 = vmatpush1.bf16.msra.mxu0 %v3740_v45 }
 0xffa   :  { %1486 = vmatprep.subr.bf16.mxu0 %v3743_v47 }
 0xffd   :  { %1487 = vmatpush1.bf16.msra.mxu0 %v3746_v62 }
 0xffe   :  { %1488 = vmatprep.subr.bf16.mxu0 %v3749_v13 }
0x1001   :  { %1489 = vmatpush1.bf16.msra.mxu0 %v3752_v7  ;;  %v5868_v7 = vld [vmem:[#allocation24_spill] sm:$0xff] }
0x1002   :  { %1490 = vmatprep.subr.bf16.mxu0 %v3755_v9  ;;  %v5869_v9 = vld [vmem:[#allocation25_spill] sm:$0xff] }
0x1005   :  { %1491 = vmatpush1.bf16.msra.mxu0 %v3758_v10  ;;  %v5870_v10 = vld [vmem:[#allocation26_spill] sm:$0xff] }
0x1006   :  { %1492 = vmatprep.subr.bf16.mxu0 %v3761_v12  ;;  %v5871_v12 = vld [vmem:[#allocation27_spill] sm:$0xff] }
0x1009   :  { %1493 = vmatpush1.bf16.msra.mxu0 %v3764_v43  ;;  %v5872_v43 = vld [vmem:[#allocation12_spill] sm:$0xff] }
0x100a   :  { %1494 = vmatprep.subr.bf16.mxu0 %v3767_v15  ;;  %v5873_v15 = vld [vmem:[#allocation14_spill] sm:$0xff] }
0x100d   :  { %1495 = vmatpush1.bf16.msra.mxu0 %v3870_v19 }
0x100e   :  { %1496 = vmatprep.subr.bf16.mxu0 %v3873_v20 }
0x1011   :  { %1497 = vmatpush1.bf16.msra.mxu0 %v3876_v22 }
0x1012   :  { %1498 = vmatprep.subr.bf16.mxu0 %v3879_v24 }
0x1015   :  { %1499 = vmatpush1.bf16.msra.mxu0 %v3882_v26 }
0x1016   :  { %1500 = vmatprep.subr.bf16.mxu0 %v3885_v28 }
0x1019   :  { %1501 = vmatpush1.bf16.msra.mxu0 %v3888_v57 }
0x101a   :  { %1502 = vmatprep.subr.bf16.mxu0 %v3891_v60 }
0x101d   :  { %1503 = vmatpush1.bf16.msra.mxu0 %v3894_v18 }
0x101e   :  { %1504 = vmatprep.subr.bf16.mxu0 %v3897_v8 }
0x1021   :  { %1505 = vmatpush1.bf16.msra.mxu0 %v3900_v11 }
0x1022   :  { %1506 = vmatprep.subr.bf16.mxu0 %v3903_v37 }
0x1025   :  { %1507 = vmatpush1.bf16.msra.mxu0 %v3906_v23 }
0x1026   :  { %1508 = vmatprep.subr.bf16.mxu0 %v3909_v25 }
0x1029   :  { %1509 = vmatpush1.bf16.msra.mxu0 %v3912_v61 }
0x102a   :  { %1510 = vmatprep.subr.bf16.mxu0 %v3915_v63 }
0x102d   :  { %1511 = vmatpush1.bf16.msra.mxu0 %v3918_v58 }
0x102e   :  { %1582 = vmatprep.subr.bf16.mxu0 %v3787_v21  ;;  %v5874_v21 = vld [vmem:[#allocation15_spill] sm:$0xff] }
0x10c3   :  { %v1412_v59 = vpop.f32.mrb[36].mxu0 }
0x10c4   :  { %v1414_v17 = vpop.f32.mrb[37].mxu0 }
0x10c5   :  { %v1416_v27 = vpop.f32.mrb[38].mxu0  ;;  %v1422_v47 = vmax.f32 %v1414_v17, 0.0 }
0x10c6   :  { %v1425_v31 = vpack.c.bf16 %v1416_v27, %v1412_v59  ;;  %v1418_v45 = vpop.f32.mrb[39].mxu0  ;;  %v1472_v59 = vadd.f32 %v4107_v50, %v4288_v0  ;;  %v4380_v0 = vld [vmem:[#allocation5] ss:$8 sps:$4 sm:$0xff]  }
0x10c7   :  { %v1424_v62 = vmax.f32 %v1418_v45, 0.0 }
0x10c9   :  { %v1426_v13 = vpack.c.bf16 %v1424_v62, %v1422_v47 }
0x10cb   :  { %1459 = vmatprep.mubr.bf16.mxu1 %v1426_v13  ;;  %v4383_v13 = vld [vmem:[#allocation5 + $0x14] ss:$8 sps:$4 sm:$0xff]  }
0x10cc   :  { %1460 = vmatmul.mubr.bf16.vlgmr.msra.gmra.mrb[36].mxu1 %v1425_v31  ;;  %v1473_v31 = vadd.f32 %v4116_v38, %v4290_v34  ;;  %v4386_v34 = vld [vmem:[#allocation5 + $0x10] ss:$8 sps:$4 sm:$0xff]  }
0x10cd   :  { %1530 = vmatpush1.bf16.msra.mxu1 %v3790_v51  ;;  %v5875_v51 = vld [vmem:[#allocation16_spill] sm:$0xff] }
0x10ce   :  { %1531 = vmatprep.subr.bf16.mxu1 %v3793_v53  ;;  %v5876_v53 = vld [vmem:[#allocation17_spill] sm:$0xff] }
0x10d1   :  { %1532 = vmatpush1.bf16.msra.mxu1 %v3796_v54  ;;  %v5877_v54 = vld [vmem:[#allocation18_spill] sm:$0xff] }
0x10d2   :  { %1533 = vmatprep.subr.bf16.mxu1 %v3799_v55  ;;  %v5878_v55 = vld [vmem:[#allocation19_spill] sm:$0xff] }
0x10d5   :  { %1534 = vmatpush1.bf16.msra.mxu1 %v3802_v3  ;;  %v5879_v3 = vld [vmem:[#allocation20_spill] sm:$0xff] }
0x10d6   :  { %1535 = vmatprep.subr.bf16.mxu1 %v3805_v4  ;;  %v5880_v4 = vld [vmem:[#allocation21_spill] sm:$0xff] }
0x10d9   :  { %1536 = vmatpush1.bf16.msra.mxu1 %v3928_v46 }
0x10da   :  { %1537 = vmatprep.subr.bf16.mxu1 %v3931_v48 }
0x10dd   :  { %1538 = vmatpush1.bf16.msra.mxu1 %v3934_v52 }
0x10de   :  { %1539 = vmatprep.subr.bf16.mxu1 %v3937_v5 }
0x10e1   :  { %1540 = vmatpush1.bf16.msra.mxu1 %v3940_v6 }
0x10e2   :  { %1541 = vmatprep.subr.bf16.mxu1 %v3943_v1 }
0x10e5   :  { %1542 = vmatpush1.bf16.msra.mxu1 %v3946_v2 }
0x10e6   :  { %1543 = vmatprep.subr.bf16.mxu1 %v5868_v7 }
0x10e9   :  { %1544 = vmatpush1.bf16.msra.mxu1 %v5869_v9 }
0x10ea   :  { %1545 = vmatprep.subr.bf16.mxu1 %v5870_v10 }
0x10ed   :  { %1546 = vmatpush1.bf16.msra.mxu1 %v5871_v12 }
0x10ee   :  { %1547 = vmatprep.subr.bf16.mxu1 %v5872_v43 }
0x10f1   :  { %1548 = vmatpush1.bf16.msra.mxu1 %v5873_v15 }
0x10f2   :  { %1549 = vmatprep.subr.bf16.mxu1 %v5874_v21 }
0x10f5   :  { %1550 = vmatpush1.bf16.msra.mxu1 %v5875_v51 }
0x10f6   :  { %1551 = vmatprep.subr.bf16.mxu1 %v5876_v53 }
0x10f9   :  { %1552 = vmatpush1.bf16.msra.mxu1 %v5877_v54 }
0x10fa   :  { %1553 = vmatprep.subr.bf16.mxu1 %v5878_v55 }
0x10fd   :  { %1554 = vmatpush1.bf16.msra.mxu1 %v5879_v3 }
0x10fe   :  { %1555 = vmatprep.subr.bf16.mxu1 %v5880_v4 }
0x1101   :  { %1556 = vmatpush1.bf16.msra.mxu1 %v5881_v39 }
0x1102   :  { %1557 = vmatprep.subr.bf16.mxu1 %v5882_v44 }
0x1105   :  { %1558 = vmatpush1.bf16.msra.mxu1 %v5883_v36 }
0x1106   :  { %1559 = vmatprep.subr.bf16.mxu1 %v5884_v41 }
0x1109   :  { %1560 = vmatpush1.bf16.msra.mxu1 %v5885_v40 }
0x110a   :  { %1631 = vmatprep.subr.bf16.mxu1 %v5886_v14  ;;  %v4389_v14 = vld [vmem:[#allocation5 + $0x24] ss:$8 sps:$4 sm:$0xff]  }
0x119f   :  { %v1461_v49 = vpop.f32.mrb[36].mxu1 }
0x11a0   :  { %v4364_v30 = vsub.f32 %v1470_v35, %v1461_v49  ;;  %v1463_v33 = vpop.f32.mrb[37].mxu1  ;;  %v4392_v35 = vld [vmem:[#allocation5 + $0x20] ss:$8 sps:$4 sm:$0xff]   ;;  %v4395_v49 = vld [vmem:[#allocation5 + $0x34] ss:$8 sps:$4 sm:$0xff]  }
0x11a1   :  { %v4368_v17 = vsub.f32 %v1471_v29, %v1463_v33  ;;  %v1465_v27 = vpop.f32.mrb[38].mxu1  ;;  %v4398_v29 = vld [vmem:[#allocation5 + $0x30] ss:$8 sps:$4 sm:$0xff]   ;;  %v4401_v33 = vld [vmem:[#allocation5 + $0x44] ss:$8 sps:$4 sm:$0xff]  }
0x11a2   :  { %v4372_v45 = vsub.f32 %v1472_v59, %v1465_v27  ;;  %v1467_v47 = vpop.f32.mrb[39].mxu1  ;;  %v4404_v59 = vld [vmem:[#allocation5 + $0x40] ss:$8 sps:$4 sm:$0xff]   ;;  %v4407_v27 = vld [vmem:[#allocation5 + $0x54] ss:$8 sps:$4 sm:$0xff]  }
0x11a3   :  { %v4374_v32 = vsub.f32 %v1473_v31, %v1467_v47  ;;  %v4410_v31 = vld [vmem:[#allocation5 + $0x50] ss:$8 sps:$4 sm:$0xff]   ;;  %v4413_v47 = vld [vmem:[#allocation5 + $0x64] ss:$8 sps:$4 sm:$0xff]  }
0x11a4   :  { %v1478_v42 = vpack.c.bf16 %v4372_v45, %v4364_v30 }
0x11a5   :  { %v1479_v62 = vpack.c.bf16 %v4374_v32, %v4368_v17 }
0x11a7   :  { %1512 = vmatprep.mubr.bf16.mxu0 %v1479_v62  ;;  %v4419_v62 = vld [vmem:[#allocation5 + $0x74] ss:$8 sps:$4 sm:$0xff]  }
0x11a8   :  { %1513 = vmatmul.mubr.bf16.vlgmr.msra.gmra.mrb[40].mxu0 %v1478_v42  ;;  %v4416_v42 = vld [vmem:[#allocation5 + $0x60] ss:$8 sps:$4 sm:$0xff]  }
0x11a9   :  { %1583 = vmatpush1.bf16.msra.mxu0 %v4380_v0 }
0x11aa   :  { %1584 = vmatprep.subr.bf16.mxu0 %v4383_v13 }
0x11ad   :  { %1585 = vmatpush1.bf16.msra.mxu0 %v4386_v34 }
0x11ae   :  { %1586 = vmatprep.subr.bf16.mxu0 %v4389_v14 }
0x11b1   :  { %1587 = vmatpush1.bf16.msra.mxu0 %v4392_v35 }
0x11b2   :  { %1588 = vmatprep.subr.bf16.mxu0 %v4395_v49 }
0x11b5   :  { %1589 = vmatpush1.bf16.msra.mxu0 %v4398_v29 }
0x11b6   :  { %1590 = vmatprep.subr.bf16.mxu0 %v4401_v33 }
0x11b9   :  { %1591 = vmatpush1.bf16.msra.mxu0 %v4404_v59 }
0x11ba   :  { %1592 = vmatprep.subr.bf16.mxu0 %v4407_v27 }
0x11bd   :  { %1593 = vmatpush1.bf16.msra.mxu0 %v4410_v31 }
0x11be   :  { %1594 = vmatprep.subr.bf16.mxu0 %v4413_v47 }
0x11c1   :  { %1595 = vmatpush1.bf16.msra.mxu0 %v4416_v42 }
0x11c2   :  { %1596 = vmatprep.subr.bf16.mxu0 %v4419_v62 }
0x11c5   :  { %1597 = vmatpush1.bf16.msra.mxu0 %v3870_v19  ;;  %v4439_v19 = vld [vmem:[#allocation5 + $0x4] ss:$8 sps:$4 sm:$0xff]  }
0x11c6   :  { %1598 = vmatprep.subr.bf16.mxu0 %v3873_v20 }
0x11c9   :  { %1599 = vmatpush1.bf16.msra.mxu0 %v3876_v22 }
0x11ca   :  { %1600 = vmatprep.subr.bf16.mxu0 %v3879_v24 }
0x11cd   :  { %1601 = vmatpush1.bf16.msra.mxu0 %v3882_v26 }
0x11ce   :  { %1602 = vmatprep.subr.bf16.mxu0 %v3885_v28 }
0x11d1   :  { %1603 = vmatpush1.bf16.msra.mxu0 %v3888_v57 }
0x11d2   :  { %1604 = vmatprep.subr.bf16.mxu0 %v3891_v60 }
0x11d5   :  { %1605 = vmatpush1.bf16.msra.mxu0 %v3894_v18 }
0x11d6   :  { %1606 = vmatprep.subr.bf16.mxu0 %v3897_v8  ;;  %v4442_v8 = vld [vmem:[#allocation7] ss:$8 sps:$4 sm:$0xff]  }
0x11d9   :  { %1607 = vmatpush1.bf16.msra.mxu0 %v3900_v11  ;;  %v4445_v11 = vld [vmem:[#allocation7 + $0x14] ss:$8 sps:$4 sm:$0xff]  }
0x11da   :  { %1608 = vmatprep.subr.bf16.mxu0 %v3903_v37  ;;  %v4448_v37 = vld [vmem:[#allocation7 + $0x10] ss:$8 sps:$4 sm:$0xff]  }
0x11dd   :  { %1609 = vmatpush1.bf16.msra.mxu0 %v3906_v23  ;;  %v4451_v23 = vld [vmem:[#allocation7 + $0x24] ss:$8 sps:$4 sm:$0xff]  }
0x11de   :  { %1610 = vmatprep.subr.bf16.mxu0 %v3909_v25  ;;  %v4454_v25 = vld [vmem:[#allocation7 + $0x20] ss:$8 sps:$4 sm:$0xff]  }
0x11e1   :  { %1611 = vmatpush1.bf16.msra.mxu0 %v3912_v61  ;;  %v4457_v61 = vld [vmem:[#allocation7 + $0x34] ss:$8 sps:$4 sm:$0xff]  }
0x11e2   :  { %1612 = vmatprep.subr.bf16.mxu0 %v3915_v63  ;;  %v4485_v63 = vld [vmem:[#allocation7 + $0x4] ss:$8 sps:$4 sm:$0xff]  }
0x11e3   :  { %5887 = vst [vmem:[#allocation34_spill] sm:$0xff] %v4485_v63 }
0x11e5   :  { %1613 = vmatpush1.bf16.msra.mxu0 %v3918_v58  ;;  %v1572_v58 = vadd.f32 %v5847_v56, %v4364_v30  ;;  %v4546_v30 = vld [vmem:[#allocation5 + $0xb0] ss:$8 sps:$4 sm:$0xff]  }
0x11e6   :  { %1684 = vmatprep.subr.bf16.mxu0 %v4439_v19 }
0x127b   :  { %v1514_v20 = vpop.f32.mrb[40].mxu0 }
0x127c   :  { %v1516_v22 = vpop.f32.mrb[41].mxu0 }
0x127d   :  { %v1518_v24 = vpop.f32.mrb[42].mxu0  ;;  %v1524_v57 = vmax.f32 %v1516_v22, 0.0  ;;  %v4561_v22 = vld [vmem:[#allocation5 + $0xe4] ss:$8 sps:$4 sm:$0xff]  }
0x127e   :  { %v1527_v26 = vpack.c.bf16 %v1518_v24, %v1514_v20  ;;  %v1520_v28 = vpop.f32.mrb[43].mxu0  ;;  %v4558_v20 = vld [vmem:[#allocation5 + $0xd0] ss:$8 sps:$4 sm:$0xff]   ;;  %v4564_v24 = vld [vmem:[#allocation5 + $0xe0] ss:$8 sps:$4 sm:$0xff]  }
0x127f   :  { %v1526_v60 = vmax.f32 %v1520_v28, 0.0  ;;  %v4570_v28 = vld [vmem:[#allocation5 + $0xf0] ss:$8 sps:$4 sm:$0xff]  }
0x1281   :  { %v1528_v18 = vpack.c.bf16 %v1526_v60, %v1524_v57 }
0x1283   :  { %1561 = vmatprep.mubr.bf16.mxu1 %v1528_v18 }
0x1284   :  { %1562 = vmatmul.mubr.bf16.vlgmr.msra.gmra.mrb[40].mxu1 %v1527_v26  ;;  %v4567_v26 = vld [vmem:[#allocation5 + $0xf4] ss:$8 sps:$4 sm:$0xff]  }
0x1285   :  { %1632 = vmatpush1.bf16.msra.mxu1 %v4442_v8 }
0x1286   :  { %1633 = vmatprep.subr.bf16.mxu1 %v4445_v11 }
0x1289   :  { %1634 = vmatpush1.bf16.msra.mxu1 %v4448_v37 }
0x128a   :  { %1635 = vmatprep.subr.bf16.mxu1 %v4451_v23 }
0x128d   :  { %1636 = vmatpush1.bf16.msra.mxu1 %v4454_v25 }
0x128e   :  { %1637 = vmatprep.subr.bf16.mxu1 %v4457_v61 }
0x1291   :  { %1638 = vmatpush1.bf16.msra.mxu1 %v3928_v46 }
0x1292   :  { %1639 = vmatprep.subr.bf16.mxu1 %v3931_v48  ;;  %v1573_v48 = vadd.f32 %v5848_v16, %v4368_v17  ;;  %v4549_v17 = vld [vmem:[#allocation5 + $0xc4] ss:$8 sps:$4 sm:$0xff]  }
0x1295   :  { %1640 = vmatpush1.bf16.msra.mxu1 %v3934_v52 }
0x1296   :  { %1641 = vmatprep.subr.bf16.mxu1 %v3937_v5 }
0x1299   :  { %1642 = vmatpush1.bf16.msra.mxu1 %v3940_v6  ;;  %v1574_v6 = vadd.f32 %v4107_v50, %v4372_v45  ;;  %v4552_v45 = vld [vmem:[#allocation5 + $0xc0] ss:$8 sps:$4 sm:$0xff]  }
0x129a   :  { %1643 = vmatprep.subr.bf16.mxu1 %v3943_v1 }
0x129d   :  { %1644 = vmatpush1.bf16.msra.mxu1 %v3946_v2 }
0x129e   :  { %1645 = vmatprep.subr.bf16.mxu1 %v5868_v7  ;;  %v1575_v7 = vadd.f32 %v4116_v38, %v4374_v32  ;;  %v4555_v32 = vld [vmem:[#allocation5 + $0xd4] ss:$8 sps:$4 sm:$0xff]  }
0x12a1   :  { %1646 = vmatpush1.bf16.msra.mxu1 %v5869_v9 }
0x12a2   :  { %1647 = vmatprep.subr.bf16.mxu1 %v5870_v10 }
0x12a5   :  { %1648 = vmatpush1.bf16.msra.mxu1 %v5871_v12 }
0x12a6   :  { %1649 = vmatprep.subr.bf16.mxu1 %v5872_v43 }
0x12a9   :  { %1650 = vmatpush1.bf16.msra.mxu1 %v5873_v15 }
0x12aa   :  { %1651 = vmatprep.subr.bf16.mxu1 %v5874_v21  ;;  %v4522_v21 = vld [vmem:[#allocation5 + $0x70] ss:$8 sps:$4 sm:$0xff]  }
0x12ad   :  { %1652 = vmatpush1.bf16.msra.mxu1 %v5875_v51  ;;  %v4525_v51 = vld [vmem:[#allocation5 + $0x84] ss:$8 sps:$4 sm:$0xff]  }
0x12ae   :  { %1653 = vmatprep.subr.bf16.mxu1 %v5876_v53  ;;  %v4528_v53 = vld [vmem:[#allocation5 + $0x80] ss:$8 sps:$4 sm:$0xff]  }
0x12b1   :  { %1654 = vmatpush1.bf16.msra.mxu1 %v5877_v54  ;;  %v4531_v54 = vld [vmem:[#allocation5 + $0x94] ss:$8 sps:$4 sm:$0xff]  }
0x12b2   :  { %1655 = vmatprep.subr.bf16.mxu1 %v5878_v55  ;;  %v4534_v55 = vld [vmem:[#allocation5 + $0x90] ss:$8 sps:$4 sm:$0xff]  }
0x12b5   :  { %1656 = vmatpush1.bf16.msra.mxu1 %v5879_v3  ;;  %v4537_v3 = vld [vmem:[#allocation5 + $0xa4] ss:$8 sps:$4 sm:$0xff]  }
0x12b6   :  { %1657 = vmatprep.subr.bf16.mxu1 %v5880_v4  ;;  %v4540_v4 = vld [vmem:[#allocation5 + $0xa0] ss:$8 sps:$4 sm:$0xff]  }
0x12b9   :  { %1658 = vmatpush1.bf16.msra.mxu1 %v5881_v39  ;;  %v4543_v39 = vld [vmem:[#allocation5 + $0xb4] ss:$8 sps:$4 sm:$0xff]  }
0x12ba   :  { %1659 = vmatprep.subr.bf16.mxu1 %v5882_v44 }
0x12bd   :  { %1660 = vmatpush1.bf16.msra.mxu1 %v5883_v36 }
0x12be   :  { %1661 = vmatprep.subr.bf16.mxu1 %v5884_v41 }
0x12c1   :  { %1662 = vmatpush1.bf16.msra.mxu1 %v5885_v40 }
0x12c2   :  { %1733 = vmatprep.subr.bf16.mxu1 %v4485_v63 }
0x1357   :  { %v1563_v46 = vpop.f32.mrb[40].mxu1 }
0x1358   :  { %v4492_v52 = vsub.f32 %v1572_v58, %v1563_v46  ;;  %v1565_v5 = vpop.f32.mrb[41].mxu1 }
0x1359   :  { %v4496_v1 = vsub.f32 %v1573_v48, %v1565_v5  ;;  %v1567_v2 = vpop.f32.mrb[42].mxu1 }
0x135a   :  { %v4500_v9 = vsub.f32 %v1574_v6, %v1567_v2  ;;  %v1569_v10 = vpop.f32.mrb[43].mxu1  ;;  %v4580_v2 = vld [vmem:[#allocation7 + $0x30] ss:$8 sps:$4 sm:$0xff]  }
0x135b   :  { %v4502_v12 = vsub.f32 %v1575_v7, %v1569_v10  ;;  %v4583_v7 = vld [vmem:[#allocation7 + $0x44] ss:$8 sps:$4 sm:$0xff]   ;;  %v4586_v10 = vld [vmem:[#allocation7 + $0x40] ss:$8 sps:$4 sm:$0xff]  }
0x135c   :  { %v1580_v43 = vpack.c.bf16 %v4500_v9, %v4492_v52 }
0x135d   :  { %v1581_v15 = vpack.c.bf16 %v4502_v12, %v4496_v1 }
0x135f   :  { %1614 = vmatprep.mubr.bf16.mxu0 %v1581_v15  ;;  %v4592_v15 = vld [vmem:[#allocation7 + $0x50] ss:$8 sps:$4 sm:$0xff]  }
0x1360   :  { %1615 = vmatmul.mubr.bf16.vlgmr.msra.gmra.mrb[44].mxu0 %v1580_v43  ;;  %v4589_v43 = vld [vmem:[#allocation7 + $0x54] ss:$8 sps:$4 sm:$0xff]  }
0x1361   :  { %1685 = vmatpush1.bf16.msra.mxu0 %v4380_v0 }
0x1362   :  { %1686 = vmatprep.subr.bf16.mxu0 %v4383_v13 }
0x1365   :  { %1687 = vmatpush1.bf16.msra.mxu0 %v4386_v34 }
0x1366   :  { %1688 = vmatprep.subr.bf16.mxu0 %v4389_v14 }
0x1369   :  { %1689 = vmatpush1.bf16.msra.mxu0 %v4392_v35 }
0x136a   :  { %1690 = vmatprep.subr.bf16.mxu0 %v4395_v49 }
0x136d   :  { %1691 = vmatpush1.bf16.msra.mxu0 %v4398_v29 }
0x136e   :  { %1692 = vmatprep.subr.bf16.mxu0 %v4401_v33 }
0x1371   :  { %1693 = vmatpush1.bf16.msra.mxu0 %v4404_v59 }
0x1372   :  { %1694 = vmatprep.subr.bf16.mxu0 %v4407_v27 }
0x1375   :  { %1695 = vmatpush1.bf16.msra.mxu0 %v4410_v31 }
0x1376   :  { %1696 = vmatprep.subr.bf16.mxu0 %v4413_v47 }
0x1379   :  { %1697 = vmatpush1.bf16.msra.mxu0 %v4416_v42 }
0x137a   :  { %1698 = vmatprep.subr.bf16.mxu0 %v4419_v62 }
0x137d   :  { %1699 = vmatpush1.bf16.msra.mxu0 %v4522_v21 }
0x137e   :  { %1700 = vmatprep.subr.bf16.mxu0 %v4525_v51 }
0x1381   :  { %1701 = vmatpush1.bf16.msra.mxu0 %v4528_v53 }
0x1382   :  { %1702 = vmatprep.subr.bf16.mxu0 %v4531_v54 }
0x1385   :  { %1703 = vmatpush1.bf16.msra.mxu0 %v4534_v55 }
0x1386   :  { %1704 = vmatprep.subr.bf16.mxu0 %v4537_v3 }
0x1389   :  { %1705 = vmatpush1.bf16.msra.mxu0 %v4540_v4 }
0x138a   :  { %1706 = vmatprep.subr.bf16.mxu0 %v4543_v39 }
0x138d   :  { %1707 = vmatpush1.bf16.msra.mxu0 %v4546_v30 }
0x138e   :  { %1708 = vmatprep.subr.bf16.mxu0 %v4549_v17 }
0x1391   :  { %1709 = vmatpush1.bf16.msra.mxu0 %v4552_v45 }
0x1392   :  { %1710 = vmatprep.subr.bf16.mxu0 %v4555_v32 }
0x1395   :  { %1711 = vmatpush1.bf16.msra.mxu0 %v4558_v20 }
0x1396   :  { %1712 = vmatprep.subr.bf16.mxu0 %v4561_v22 }
0x1399   :  { %1713 = vmatpush1.bf16.msra.mxu0 %v4564_v24 }
0x139a   :  { %1714 = vmatprep.subr.bf16.mxu0 %v4567_v26 }
0x139d   :  { %1715 = vmatpush1.bf16.msra.mxu0 %v4570_v28 }
0x139e   :  { %1786 = vmatprep.subr.bf16.mxu0 %v4439_v19 }
0x1433   :  { %v1616_v57 = vpop.f32.mrb[44].mxu0 }
0x1434   :  { %v1618_v60 = vpop.f32.mrb[45].mxu0 }
0x1435   :  { %v1620_v18 = vpop.f32.mrb[46].mxu0  ;;  %v1626_v48 = vmax.f32 %v1618_v60, 0.0  ;;  %v4598_v60 = vld [vmem:[#allocation7 + $0x60] ss:$8 sps:$4 sm:$0xff]  }
0x1436   :  { %v1629_v58 = vpack.c.bf16 %v1620_v18, %v1616_v57  ;;  %v1622_v46 = vpop.f32.mrb[47].mxu0  ;;  %v4595_v57 = vld [vmem:[#allocation7 + $0x64] ss:$8 sps:$4 sm:$0xff]   ;;  %v4601_v18 = vld [vmem:[#allocation7 + $0x74] ss:$8 sps:$4 sm:$0xff]  }
0x1437   :  { %v1628_v5 = vmax.f32 %v1622_v46, 0.0  ;;  %5888 = vst [vmem:[#allocation35_spill] sm:$0xff] %v4601_v18  ;;  %v4607_v46 = vld [vmem:[#allocation7 + $0x84] ss:$8 sps:$4 sm:$0xff]  }
0x1438   :  { %5890 = vst [vmem:[#allocation37_spill] sm:$0xff] %v4607_v46 }
0x1439   :  { %v1630_v6 = vpack.c.bf16 %v1628_v5, %v1626_v48  ;;  %v4610_v48 = vld [vmem:[#allocation7 + $0x80] ss:$8 sps:$4 sm:$0xff]   ;;  %v4613_v5 = vld [vmem:[#allocation7 + $0x94] ss:$8 sps:$4 sm:$0xff]  }
0x143a   :  { %5891 = vst [vmem:[#allocation38_spill] sm:$0xff] %v4610_v48  ;;  %5892 = vst [vmem:[#allocation39_spill] sm:$0xff] %v4613_v5 }
0x143b   :  { %1663 = vmatprep.mubr.bf16.mxu1 %v1630_v6  ;;  %v4616_v6 = vld [vmem:[#allocation7 + $0x90] ss:$8 sps:$4 sm:$0xff]  }
0x143c   :  { %1664 = vmatmul.mubr.bf16.vlgmr.msra.gmra.mrb[44].mxu1 %v1629_v58  ;;  %v4604_v58 = vld [vmem:[#allocation7 + $0x70] ss:$8 sps:$4 sm:$0xff]   ;;  %5893 = vst [vmem:[#allocation13_spill] sm:$0xff] %v4616_v6 }
0x143d   :  { %1734 = vmatpush1.bf16.msra.mxu1 %v4442_v8  ;;  %5889 = vst [vmem:[#allocation36_spill] sm:$0xff] %v4604_v58 }
0x143e   :  { %1735 = vmatprep.subr.bf16.mxu1 %v4445_v11 }
0x1441   :  { %1736 = vmatpush1.bf16.msra.mxu1 %v4448_v37 }
0x1442   :  { %1737 = vmatprep.subr.bf16.mxu1 %v4451_v23 }
0x1445   :  { %1738 = vmatpush1.bf16.msra.mxu1 %v4454_v25 }
0x1446   :  { %1739 = vmatprep.subr.bf16.mxu1 %v4457_v61 }
0x1449   :  { %1740 = vmatpush1.bf16.msra.mxu1 %v4580_v2 }
0x144a   :  { %1741 = vmatprep.subr.bf16.mxu1 %v4583_v7 }
0x144d   :  { %1742 = vmatpush1.bf16.msra.mxu1 %v4586_v10 }
0x144e   :  { %1743 = vmatprep.subr.bf16.mxu1 %v4589_v43 }
0x1451   :  { %1744 = vmatpush1.bf16.msra.mxu1 %v4592_v15 }
0x1452   :  { %1745 = vmatprep.subr.bf16.mxu1 %v4595_v57 }
0x1455   :  { %1746 = vmatpush1.bf16.msra.mxu1 %v4598_v60 }
0x1456   :  { %1747 = vmatprep.subr.bf16.mxu1 %v4601_v18  ;;  %v4619_v18 = vld [vmem:[#allocation7 + $0xa4] ss:$8 sps:$4 sm:$0xff]  }
0x1457   :  { %5894 = vst [vmem:[#allocation32_spill] sm:$0xff] %v4619_v18 }
0x1459   :  { %1748 = vmatpush1.bf16.msra.mxu1 %v4604_v58  ;;  %v4622_v58 = vld [vmem:[#allocation7 + $0xa0] ss:$8 sps:$4 sm:$0xff]  }
0x145a   :  { %1749 = vmatprep.subr.bf16.mxu1 %v4607_v46  ;;  %5895 = vst [vmem:[#allocation33_spill] sm:$0xff] %v4622_v58  ;;  %v4625_v46 = vld [vmem:[#allocation7 + $0xb4] ss:$8 sps:$4 sm:$0xff]  }
0x145b   :  { %5896 = vst [vmem:[#allocation24_spill] sm:$0xff] %v4625_v46 }
0x145d   :  { %1750 = vmatpush1.bf16.msra.mxu1 %v4610_v48  ;;  %v4628_v48 = vld [vmem:[#allocation7 + $0xb0] ss:$8 sps:$4 sm:$0xff]  }
0x145e   :  { %1751 = vmatprep.subr.bf16.mxu1 %v4613_v5  ;;  %5897 = vst [vmem:[#allocation25_spill] sm:$0xff] %v4628_v48  ;;  %v4631_v5 = vld [vmem:[#allocation7 + $0xc4] ss:$8 sps:$4 sm:$0xff]  }
0x145f   :  { %5898 = vst [vmem:[#allocation26_spill] sm:$0xff] %v4631_v5 }
0x1461   :  { %1752 = vmatpush1.bf16.msra.mxu1 %v4616_v6  ;;  %v4634_v6 = vld [vmem:[#allocation7 + $0xc0] ss:$8 sps:$4 sm:$0xff]  }
0x1462   :  { %1753 = vmatprep.subr.bf16.mxu1 %v4619_v18  ;;  %5899 = vst [vmem:[#allocation27_spill] sm:$0xff] %v4634_v6  ;;  %v4637_v18 = vld [vmem:[#allocation7 + $0xd4] ss:$8 sps:$4 sm:$0xff]  }
0x1463   :  { %5900 = vst [vmem:[#allocation12_spill] sm:$0xff] %v4637_v18 }
0x1465   :  { %1754 = vmatpush1.bf16.msra.mxu1 %v4622_v58  ;;  %v4640_v58 = vld [vmem:[#allocation7 + $0xd0] ss:$8 sps:$4 sm:$0xff]  }
0x1466   :  { %1755 = vmatprep.subr.bf16.mxu1 %v4625_v46  ;;  %5901 = vst [vmem:[#allocation14_spill] sm:$0xff] %v4640_v58 }
0x1469   :  { %1756 = vmatpush1.bf16.msra.mxu1 %v4628_v48 }
0x146a   :  { %1757 = vmatprep.subr.bf16.mxu1 %v4631_v5 }
0x146d   :  { %1758 = vmatpush1.bf16.msra.mxu1 %v4634_v6  ;;  %v1674_v6 = vadd.f32 %v5847_v56, %v4492_v52 }
0x146e   :  { %1759 = vmatprep.subr.bf16.mxu1 %v4637_v18  ;;  %v1675_v18 = vadd.f32 %v5848_v16, %v4496_v1 }
0x1471   :  { %1760 = vmatpush1.bf16.msra.mxu1 %v4640_v58 }
0x1472   :  { %1761 = vmatprep.subr.bf16.mxu1 %v5882_v44  ;;  %v1676_v44 = vadd.f32 %v4107_v50, %v4500_v9 }
0x1475   :  { %1762 = vmatpush1.bf16.msra.mxu1 %v5883_v36 }
0x1476   :  { %1763 = vmatprep.subr.bf16.mxu1 %v5884_v41 }
0x1479   :  { %1764 = vmatpush1.bf16.msra.mxu1 %v5885_v40  ;;  %v1677_v40 = vadd.f32 %v4116_v38, %v4502_v12 }
0x147a   :  { %1835 = vmatprep.subr.bf16.mxu1 %v4485_v63 }
0x150f   :  { %v1665_v5 = vpop.f32.mrb[44].mxu1 }
0x1510   :  { %v4652_v48 = vsub.f32 %v1674_v6, %v1665_v5  ;;  %v1667_v58 = vpop.f32.mrb[45].mxu1  ;;  %v5902_v5 = vld [vmem:[#allocation35_spill] sm:$0xff]  ;;  %v5903_v6 = vld [vmem:[#allocation36_spill] sm:$0xff] }
0x1511   :  { %v4656_v36 = vsub.f32 %v1675_v18, %v1667_v58  ;;  %v1669_v41 = vpop.f32.mrb[46].mxu1 }
0x1512   :  { %v4660_v63 = vsub.f32 %v1676_v44, %v1669_v41  ;;  %v1671_v46 = vpop.f32.mrb[47].mxu1  ;;  %v5904_v44 = vld [vmem:[#allocation37_spill] sm:$0xff]  ;;  %v5905_v41 = vld [vmem:[#allocation38_spill] sm:$0xff] }
0x1513   :  { %v4662_v56 = vsub.f32 %v1677_v40, %v1671_v46  ;;  %v5906_v40 = vld [vmem:[#allocation39_spill] sm:$0xff] }
0x1514   :  { %v1682_v16 = vpack.c.bf16 %v4660_v63, %v4652_v48 }
0x1515   :  { %v1683_v52 = vpack.c.bf16 %v4662_v56, %v4656_v36 }
0x1517   :  { %1716 = vmatprep.mubr.bf16.mxu0 %v1683_v52  ;;  %v5908_v52 = vld [vmem:[#allocation32_spill] sm:$0xff] }
0x1518   :  { %1717 = vmatmul.mubr.bf16.vlgmr.msra.gmra.mrb[48].mxu0 %v1682_v16  ;;  %v5907_v16 = vld [vmem:[#allocation13_spill] sm:$0xff] }
0x1519   :  { %1787 = vmatpush1.bf16.msra.mxu0 %v4380_v0 }
0x151a   :  { %1788 = vmatprep.subr.bf16.mxu0 %v4383_v13 }
0x151d   :  { %1789 = vmatpush1.bf16.msra.mxu0 %v4386_v34 }
0x151e   :  { %1790 = vmatprep.subr.bf16.mxu0 %v4389_v14 }
0x1521   :  { %1791 = vmatpush1.bf16.msra.mxu0 %v4392_v35 }
0x1522   :  { %1792 = vmatprep.subr.bf16.mxu0 %v4395_v49 }
0x1525   :  { %1793 = vmatpush1.bf16.msra.mxu0 %v4398_v29 }
0x1526   :  { %1794 = vmatprep.subr.bf16.mxu0 %v4401_v33 }
0x1529   :  { %1795 = vmatpush1.bf16.msra.mxu0 %v4404_v59 }
0x152a   :  { %1796 = vmatprep.subr.bf16.mxu0 %v4407_v27 }
0x152d   :  { %1797 = vmatpush1.bf16.msra.mxu0 %v4410_v31 }
0x152e   :  { %1798 = vmatprep.subr.bf16.mxu0 %v4413_v47 }
0x1531   :  { %1799 = vmatpush1.bf16.msra.mxu0 %v4416_v42 }
0x1532   :  { %1800 = vmatprep.subr.bf16.mxu0 %v4419_v62 }
0x1535   :  { %1801 = vmatpush1.bf16.msra.mxu0 %v4522_v21 }
0x1536   :  { %1802 = vmatprep.subr.bf16.mxu0 %v4525_v51 }
0x1539   :  { %1803 = vmatpush1.bf16.msra.mxu0 %v4528_v53 }
0x153a   :  { %1804 = vmatprep.subr.bf16.mxu0 %v4531_v54 }
0x153d   :  { %1805 = vmatpush1.bf16.msra.mxu0 %v4534_v55 }
0x153e   :  { %1806 = vmatprep.subr.bf16.mxu0 %v4537_v3 }
0x1541   :  { %1807 = vmatpush1.bf16.msra.mxu0 %v4540_v4 }
0x1542   :  { %1808 = vmatprep.subr.bf16.mxu0 %v4543_v39 }
0x1545   :  { %1809 = vmatpush1.bf16.msra.mxu0 %v4546_v30 }
0x1546   :  { %1810 = vmatprep.subr.bf16.mxu0 %v4549_v17 }
0x1549   :  { %1811 = vmatpush1.bf16.msra.mxu0 %v4552_v45 }
0x154a   :  { %1812 = vmatprep.subr.bf16.mxu0 %v4555_v32 }
0x154d   :  { %1813 = vmatpush1.bf16.msra.mxu0 %v4558_v20 }
0x154e   :  { %1814 = vmatprep.subr.bf16.mxu0 %v4561_v22 }
0x1551   :  { %1815 = vmatpush1.bf16.msra.mxu0 %v4564_v24 }
0x1552   :  { %1816 = vmatprep.subr.bf16.mxu0 %v4567_v26 }
0x1555   :  { %1817 = vmatpush1.bf16.msra.mxu0 %v4570_v28 }
0x1556   :  { %1888 = vmatprep.subr.bf16.mxu0 %v4439_v19 }
0x15eb   :  { %v1718_v38 = vpop.f32.mrb[48].mxu0 }
0x15ec   :  { %v1720_v50 = vpop.f32.mrb[49].mxu0 }
0x15ed   :  { %v1722_v1 = vpop.f32.mrb[50].mxu0  ;;  %v1728_v18 = vmax.f32 %v1720_v50, 0.0  ;;  %v5910_v50 = vld [vmem:[#allocation24_spill] sm:$0xff] }
0x15ee   :  { %v1731_v9 = vpack.c.bf16 %v1722_v1, %v1718_v38  ;;  %v1724_v12 = vpop.f32.mrb[51].mxu0  ;;  %v5909_v38 = vld [vmem:[#allocation33_spill] sm:$0xff] }
0x15ef   :  { %v1730_v58 = vmax.f32 %v1724_v12, 0.0  ;;  %v5911_v1 = vld [vmem:[#allocation25_spill] sm:$0xff]  ;;  %v5913_v12 = vld [vmem:[#allocation27_spill] sm:$0xff] }
0x15f1   :  { %v1732_v46 = vpack.c.bf16 %v1730_v58, %v1728_v18  ;;  %v5914_v18 = vld [vmem:[#allocation12_spill] sm:$0xff]  ;;  %v5915_v58 = vld [vmem:[#allocation14_spill] sm:$0xff] }
0x15f3   :  { %1765 = vmatprep.mubr.bf16.mxu1 %v1732_v46  ;;  %v4727_v46 = vld [vmem:[#allocation7 + $0xe4] ss:$8 sps:$4 sm:$0xff]  }
0x15f4   :  { %1766 = vmatmul.mubr.bf16.vlgmr.msra.gmra.mrb[48].mxu1 %v1731_v9  ;;  %v5912_v9 = vld [vmem:[#allocation26_spill] sm:$0xff]  ;;  %5916 = vst [vmem:[#allocation15_spill] sm:$0xff] %v4727_v46 }
0x15f5   :  { %1836 = vmatpush1.bf16.msra.mxu1 %v4442_v8 }
0x15f6   :  { %1837 = vmatprep.subr.bf16.mxu1 %v4445_v11 }
0x15f9   :  { %1838 = vmatpush1.bf16.msra.mxu1 %v4448_v37 }
0x15fa   :  { %1839 = vmatprep.subr.bf16.mxu1 %v4451_v23 }
0x15fd   :  { %1840 = vmatpush1.bf16.msra.mxu1 %v4454_v25 }
0x15fe   :  { %1841 = vmatprep.subr.bf16.mxu1 %v4457_v61 }
0x1601   :  { %1842 = vmatpush1.bf16.msra.mxu1 %v4580_v2 }
0x1602   :  { %1843 = vmatprep.subr.bf16.mxu1 %v4583_v7 }
0x1605   :  { %1844 = vmatpush1.bf16.msra.mxu1 %v4586_v10 }
0x1606   :  { %1845 = vmatprep.subr.bf16.mxu1 %v4589_v43 }
0x1609   :  { %1846 = vmatpush1.bf16.msra.mxu1 %v4592_v15 }
0x160a   :  { %1847 = vmatprep.subr.bf16.mxu1 %v4595_v57 }
0x160d   :  { %1848 = vmatpush1.bf16.msra.mxu1 %v4598_v60 }
0x160e   :  { %1849 = vmatprep.subr.bf16.mxu1 %v5902_v5 }
0x1611   :  { %1850 = vmatpush1.bf16.msra.mxu1 %v5903_v6 }
0x1612   :  { %1851 = vmatprep.subr.bf16.mxu1 %v5904_v44 }
0x1615   :  { %1852 = vmatpush1.bf16.msra.mxu1 %v5905_v41 }
0x1616   :  { %1853 = vmatprep.subr.bf16.mxu1 %v5906_v40 }
0x1619   :  { %1854 = vmatpush1.bf16.msra.mxu1 %v5907_v16  ;;  %v4730_v16 = vld [vmem:[#allocation7 + $0xe0] ss:$8 sps:$4 sm:$0xff]  }
0x161a   :  { %1855 = vmatprep.subr.bf16.mxu1 %v5908_v52  ;;  %5917 = vst [vmem:[#allocation16_spill] sm:$0xff] %v4730_v16  ;;  %v4768_v52 = vld [vmem:[%s5522_s1 + $0x18] sm:$0xff] }
0x161d   :  { %1856 = vmatpush1.bf16.msra.mxu1 %v5909_v38  ;;  %v4733_v38 = vld [vmem:[#allocation7 + $0xf4] ss:$8 sps:$4 sm:$0xff]  }
0x161e   :  { %1857 = vmatprep.subr.bf16.mxu1 %v5910_v50  ;;  %5918 = vst [vmem:[#allocation17_spill] sm:$0xff] %v4733_v38 }
0x1621   :  { %1858 = vmatpush1.bf16.msra.mxu1 %v5911_v1  ;;  %v4736_v1 = vld [vmem:[#allocation7 + $0xf0] ss:$8 sps:$4 sm:$0xff]  }
0x1622   :  { %1859 = vmatprep.subr.bf16.mxu1 %v5912_v9  ;;  %5919 = vst [vmem:[#allocation18_spill] sm:$0xff] %v4736_v1  ;;  %v4759_v9 = vld [vmem:[%s5522_s1 + $0x10] sm:$0xff] }
0x1625   :  { %1860 = vmatpush1.bf16.msra.mxu1 %v5913_v12  ;;  %v5920_v12 = vld [vmem:[#allocation34_spill] sm:$0xff] }
0x1626   :  { %1861 = vmatprep.subr.bf16.mxu1 %v5914_v18 }
0x1629   :  { %1862 = vmatpush1.bf16.msra.mxu1 %v5915_v58  ;;  %v4743_v58 = vld [vmem:[%s5522_s1] sm:$0xff] }
0x162a   :  { %1863 = vmatprep.subr.bf16.mxu1 %v4727_v46  ;;  %5921 = vst [vmem:[#allocation19_spill] sm:$0xff] %v4743_v58  ;;  %v1776_v46 = vadd.f32 %v4743_v58, %v4652_v48  ;;  %v1778_v48 = vadd.f32 %v4759_v9, %v4660_v63 }
0x162d   :  { %1864 = vmatpush1.bf16.msra.mxu1 %v4730_v16  ;;  %v4750_v16 = vld [vmem:[%s5522_s1 + $0x8] sm:$0xff] }
0x162e   :  { %1865 = vmatprep.subr.bf16.mxu1 %v4733_v38  ;;  %5922 = vst [vmem:[#allocation20_spill] sm:$0xff] %v4750_v16  ;;  %v1777_v38 = vadd.f32 %v4750_v16, %v4656_v36  ;;  %v1779_v36 = vadd.f32 %v4768_v52, %v4662_v56 }
0x1631   :  { %1866 = vmatpush1.bf16.msra.mxu1 %v4736_v1 }
0x1632   :  { %1937 = vmatprep.subr.bf16.mxu1 %v5920_v12 }
0x16c7   :  { %v1767_v18 = vpop.f32.mrb[48].mxu1 }
0x16c8   :  { %v4754_v1 = vsub.f32 %v1776_v46, %v1767_v18  ;;  %v1769_v12 = vpop.f32.mrb[49].mxu1 }
0x16c9   :  { %v4763_v58 = vsub.f32 %v1777_v38, %v1769_v12  ;;  %v1771_v50 = vpop.f32.mrb[50].mxu1 }
0x16ca   :  { %v4772_v18 = vsub.f32 %v1778_v48, %v1771_v50  ;;  %v1773_v46 = vpop.f32.mrb[51].mxu1 }
0x16cb   :  { %v4774_v16 = vsub.f32 %v1779_v36, %v1773_v46 }
0x16cc   :  { %v1784_v40 = vpack.c.bf16 %v4772_v18, %v4754_v1 }
0x16cd   :  { %v1785_v63 = vpack.c.bf16 %v4774_v16, %v4763_v58 }
0x16cf   :  { %1818 = vmatprep.mubr.bf16.mxu0 %v1785_v63  ;;  %v5923_v63 = vld [vmem:[#allocation39_spill] sm:$0xff] }
0x16d0   :  { %1819 = vmatmul.mubr.bf16.vlgmr.msra.gmra.mrb[52].mxu0 %v1784_v40 }
0x16d1   :  { %1889 = vmatpush1.bf16.msra.mxu0 %v4380_v0 }
0x16d2   :  { %1890 = vmatprep.subr.bf16.mxu0 %v4383_v13 }
0x16d5   :  { %1891 = vmatpush1.bf16.msra.mxu0 %v4386_v34 }
0x16d6   :  { %1892 = vmatprep.subr.bf16.mxu0 %v4389_v14 }
0x16d9   :  { %1893 = vmatpush1.bf16.msra.mxu0 %v4392_v35 }
0x16da   :  { %1894 = vmatprep.subr.bf16.mxu0 %v4395_v49 }
0x16dd   :  { %1895 = vmatpush1.bf16.msra.mxu0 %v4398_v29 }
0x16de   :  { %1896 = vmatprep.subr.bf16.mxu0 %v4401_v33 }
0x16e1   :  { %1897 = vmatpush1.bf16.msra.mxu0 %v4404_v59 }
0x16e2   :  { %1898 = vmatprep.subr.bf16.mxu0 %v4407_v27 }
0x16e5   :  { %1899 = vmatpush1.bf16.msra.mxu0 %v4410_v31 }
0x16e6   :  { %1900 = vmatprep.subr.bf16.mxu0 %v4413_v47 }
0x16e9   :  { %1901 = vmatpush1.bf16.msra.mxu0 %v4416_v42 }
0x16ea   :  { %1902 = vmatprep.subr.bf16.mxu0 %v4419_v62 }
0x16ed   :  { %1903 = vmatpush1.bf16.msra.mxu0 %v4522_v21 }
0x16ee   :  { %1904 = vmatprep.subr.bf16.mxu0 %v4525_v51 }
0x16f1   :  { %1905 = vmatpush1.bf16.msra.mxu0 %v4528_v53 }
0x16f2   :  { %1906 = vmatprep.subr.bf16.mxu0 %v4531_v54 }
0x16f5   :  { %1907 = vmatpush1.bf16.msra.mxu0 %v4534_v55 }
0x16f6   :  { %1908 = vmatprep.subr.bf16.mxu0 %v4537_v3 }
0x16f9   :  { %1909 = vmatpush1.bf16.msra.mxu0 %v4540_v4 }
0x16fa   :  { %1910 = vmatprep.subr.bf16.mxu0 %v4543_v39 }
0x16fd   :  { %1911 = vmatpush1.bf16.msra.mxu0 %v4546_v30 }
0x16fe   :  { %1912 = vmatprep.subr.bf16.mxu0 %v4549_v17 }
0x1701   :  { %1913 = vmatpush1.bf16.msra.mxu0 %v4552_v45 }
0x1702   :  { %1914 = vmatprep.subr.bf16.mxu0 %v4555_v32 }
0x1705   :  { %1915 = vmatpush1.bf16.msra.mxu0 %v4558_v20 }
0x1706   :  { %1916 = vmatprep.subr.bf16.mxu0 %v4561_v22 }
0x1709   :  { %1917 = vmatpush1.bf16.msra.mxu0 %v4564_v24 }
0x170a   :  { %1918 = vmatprep.subr.bf16.mxu0 %v4567_v26 }
0x170d   :  { %1919 = vmatpush1.bf16.msra.mxu0 %v4570_v28 }
0x170e   :  { %1990 = vmatprep.subr.bf16.mxu0 %v4439_v19 }
0x17a3   :  { %v1820_v56 = vpop.f32.mrb[52].mxu0 }
0x17a4   :  { %v1822_v40 = vpop.f32.mrb[53].mxu0 }
0x17a5   :  { %v1824_v38 = vpop.f32.mrb[54].mxu0  ;;  %v1830_v48 = vmax.f32 %v1822_v40, 0.0  ;;  %v5925_v40 = vld [vmem:[#allocation32_spill] sm:$0xff] }
0x17a6   :  { %v1833_v50 = vpack.c.bf16 %v1824_v38, %v1820_v56  ;;  %v1826_v12 = vpop.f32.mrb[55].mxu0  ;;  %v5924_v56 = vld [vmem:[#allocation13_spill] sm:$0xff] }
0x17a7   :  { %v1832_v36 = vmax.f32 %v1826_v12, 0.0  ;;  %v5926_v38 = vld [vmem:[#allocation33_spill] sm:$0xff] }
0x17a8   :  { %v5928_v12 = vld [vmem:[#allocation25_spill] sm:$0xff] }
0x17a9   :  { %v1834_v46 = vpack.c.bf16 %v1832_v36, %v1830_v48  ;;  %v5929_v48 = vld [vmem:[#allocation26_spill] sm:$0xff]  ;;  %v5930_v36 = vld [vmem:[#allocation27_spill] sm:$0xff] }
0x17ab   :  { %1867 = vmatprep.mubr.bf16.mxu1 %v1834_v46  ;;  %v5931_v46 = vld [vmem:[#allocation12_spill] sm:$0xff] }
0x17ac   :  { %1868 = vmatmul.mubr.bf16.vlgmr.msra.gmra.mrb[52].mxu1 %v1833_v50  ;;  %v5927_v50 = vld [vmem:[#allocation24_spill] sm:$0xff] }
0x17ad   :  { %1938 = vmatpush1.bf16.msra.mxu1 %v4442_v8 }
0x17ae   :  { %1939 = vmatprep.subr.bf16.mxu1 %v4445_v11 }
0x17b1   :  { %1940 = vmatpush1.bf16.msra.mxu1 %v4448_v37 }
0x17b2   :  { %1941 = vmatprep.subr.bf16.mxu1 %v4451_v23 }
0x17b5   :  { %1942 = vmatpush1.bf16.msra.mxu1 %v4454_v25 }
0x17b6   :  { %1943 = vmatprep.subr.bf16.mxu1 %v4457_v61 }
0x17b9   :  { %1944 = vmatpush1.bf16.msra.mxu1 %v4580_v2 }
0x17ba   :  { %1945 = vmatprep.subr.bf16.mxu1 %v4583_v7 }
0x17bd   :  { %1946 = vmatpush1.bf16.msra.mxu1 %v4586_v10 }
0x17be   :  { %1947 = vmatprep.subr.bf16.mxu1 %v4589_v43 }
0x17c1   :  { %1948 = vmatpush1.bf16.msra.mxu1 %v4592_v15 }
0x17c2   :  { %1949 = vmatprep.subr.bf16.mxu1 %v4595_v57 }
0x17c5   :  { %1950 = vmatpush1.bf16.msra.mxu1 %v4598_v60 }
0x17c6   :  { %1951 = vmatprep.subr.bf16.mxu1 %v5902_v5 }
0x17c9   :  { %1952 = vmatpush1.bf16.msra.mxu1 %v5903_v6 }
0x17ca   :  { %1953 = vmatprep.subr.bf16.mxu1 %v5904_v44  ;;  %v5932_v44 = vld [vmem:[#allocation14_spill] sm:$0xff] }
0x17cd   :  { %1954 = vmatpush1.bf16.msra.mxu1 %v5905_v41  ;;  %v5933_v41 = vld [vmem:[#allocation15_spill] sm:$0xff] }
0x17ce   :  { %1955 = vmatprep.subr.bf16.mxu1 %v5923_v63  ;;  %v5934_v63 = vld [vmem:[#allocation16_spill] sm:$0xff] }
0x17d1   :  { %1956 = vmatpush1.bf16.msra.mxu1 %v5924_v56  ;;  %v5935_v56 = vld [vmem:[#allocation17_spill] sm:$0xff] }
0x17d2   :  { %1957 = vmatprep.subr.bf16.mxu1 %v5925_v40  ;;  %v5936_v40 = vld [vmem:[#allocation18_spill] sm:$0xff] }
0x17d5   :  { %1958 = vmatpush1.bf16.msra.mxu1 %v5926_v38  ;;  %v5937_v38 = vld [vmem:[#allocation34_spill] sm:$0xff] }
0x17d6   :  { %1959 = vmatprep.subr.bf16.mxu1 %v5927_v50 }
0x17d9   :  { %1960 = vmatpush1.bf16.msra.mxu1 %v5928_v12  ;;  %v5938_v12 = vld [vmem:[#allocation19_spill] sm:$0xff] }
0x17da   :  { %1961 = vmatprep.subr.bf16.mxu1 %v5929_v48  ;;  %v1878_v50 = vadd.f32 %v5938_v12, %v4754_v1 }
0x17dd   :  { %1962 = vmatpush1.bf16.msra.mxu1 %v5930_v36  ;;  %v5939_v36 = vld [vmem:[#allocation20_spill] sm:$0xff] }
0x17de   :  { %1963 = vmatprep.subr.bf16.mxu1 %v5931_v46  ;;  %v1879_v6 = vadd.f32 %v5939_v36, %v4763_v58 }
0x17e1   :  { %1964 = vmatpush1.bf16.msra.mxu1 %v5932_v44 }
0x17e2   :  { %1965 = vmatprep.subr.bf16.mxu1 %v5933_v41  ;;  %v1880_v41 = vadd.f32 %v4759_v9, %v4772_v18 }
0x17e5   :  { %1966 = vmatpush1.bf16.msra.mxu1 %v5934_v63 }
0x17e6   :  { %1967 = vmatprep.subr.bf16.mxu1 %v5935_v56 }
0x17e9   :  { %1968 = vmatpush1.bf16.msra.mxu1 %v5936_v40  ;;  %v1881_v40 = vadd.f32 %v4768_v52, %v4774_v16 }
0x17ea   :  { %2039 = vmatprep.subr.bf16.mxu1 %v5937_v38 }
0x187f   :  { %v1869_v48 = vpop.f32.mrb[52].mxu1 }
0x1880   :  { %v4848_v46 = vsub.f32 %v1878_v50, %v1869_v48  ;;  %v1871_v44 = vpop.f32.mrb[53].mxu1  ;;  %v5940_v48 = vld [vmem:[#allocation35_spill] sm:$0xff] }
0x1881   :  { %v4852_v63 = vsub.f32 %v1879_v6, %v1871_v44  ;;  %v1873_v56 = vpop.f32.mrb[54].mxu1 }
0x1882   :  { %v4856_v38 = vsub.f32 %v1880_v41, %v1873_v56  ;;  %v1875_v5 = vpop.f32.mrb[55].mxu1 }
0x1883   :  { %v4858_v1 = vsub.f32 %v1881_v40, %v1875_v5 }
0x1884   :  { %v1886_v58 = vpack.c.bf16 %v4856_v38, %v4848_v46 }
0x1885   :  { %v1887_v50 = vpack.c.bf16 %v4858_v1, %v4852_v63 }
0x1887   :  { %1920 = vmatprep.mubr.bf16.mxu0 %v1887_v50  ;;  %v5942_v50 = vld [vmem:[#allocation37_spill] sm:$0xff] }
0x1888   :  { %1921 = vmatmul.mubr.bf16.vlgmr.msra.gmra.mrb[56].mxu0 %v1886_v58  ;;  %v5941_v58 = vld [vmem:[#allocation36_spill] sm:$0xff] }
0x1889   :  { %1991 = vmatpush1.bf16.msra.mxu0 %v4380_v0 }
0x188a   :  { %1992 = vmatprep.subr.bf16.mxu0 %v4383_v13 }
0x188d   :  { %1993 = vmatpush1.bf16.msra.mxu0 %v4386_v34 }
0x188e   :  { %1994 = vmatprep.subr.bf16.mxu0 %v4389_v14 }
0x1891   :  { %1995 = vmatpush1.bf16.msra.mxu0 %v4392_v35 }
0x1892   :  { %1996 = vmatprep.subr.bf16.mxu0 %v4395_v49 }
0x1895   :  { %1997 = vmatpush1.bf16.msra.mxu0 %v4398_v29 }
0x1896   :  { %1998 = vmatprep.subr.bf16.mxu0 %v4401_v33 }
0x1899   :  { %1999 = vmatpush1.bf16.msra.mxu0 %v4404_v59 }
0x189a   :  { %2000 = vmatprep.subr.bf16.mxu0 %v4407_v27 }
0x189d   :  { %2001 = vmatpush1.bf16.msra.mxu0 %v4410_v31 }
0x189e   :  { %2002 = vmatprep.subr.bf16.mxu0 %v4413_v47 }
0x18a1   :  { %2003 = vmatpush1.bf16.msra.mxu0 %v4416_v42 }
0x18a2   :  { %2004 = vmatprep.subr.bf16.mxu0 %v4419_v62 }
0x18a5   :  { %2005 = vmatpush1.bf16.msra.mxu0 %v4522_v21 }
0x18a6   :  { %2006 = vmatprep.subr.bf16.mxu0 %v4525_v51 }
0x18a9   :  { %2007 = vmatpush1.bf16.msra.mxu0 %v4528_v53 }
0x18aa   :  { %2008 = vmatprep.subr.bf16.mxu0 %v4531_v54 }
0x18ad   :  { %2009 = vmatpush1.bf16.msra.mxu0 %v4534_v55 }
0x18ae   :  { %2010 = vmatprep.subr.bf16.mxu0 %v4537_v3 }
0x18b1   :  { %2011 = vmatpush1.bf16.msra.mxu0 %v4540_v4 }
0x18b2   :  { %2012 = vmatprep.subr.bf16.mxu0 %v4543_v39 }
0x18b5   :  { %2013 = vmatpush1.bf16.msra.mxu0 %v4546_v30 }
0x18b6   :  { %2014 = vmatprep.subr.bf16.mxu0 %v4549_v17 }
0x18b9   :  { %2015 = vmatpush1.bf16.msra.mxu0 %v4552_v45 }
0x18ba   :  { %2016 = vmatprep.subr.bf16.mxu0 %v4555_v32 }
0x18bd   :  { %2017 = vmatpush1.bf16.msra.mxu0 %v4558_v20 }
0x18be   :  { %2018 = vmatprep.subr.bf16.mxu0 %v4561_v22 }
0x18c1   :  { %2019 = vmatpush1.bf16.msra.mxu0 %v4564_v24 }
0x18c2   :  { %2020 = vmatprep.subr.bf16.mxu0 %v4567_v26 }
0x18c5   :  { %2021 = vmatpush1.bf16.msra.mxu0 %v4570_v28 }
0x18c6   :  { %2092 = vmatprep.subr.bf16.mxu0 %v4439_v19 }
0x195b   :  { %v1922_v5 = vpop.f32.mrb[56].mxu0 }
0x195c   :  { %v1924_v6 = vpop.f32.mrb[57].mxu0 }
0x195d   :  { %v1926_v44 = vpop.f32.mrb[58].mxu0  ;;  %v1932_v18 = vmax.f32 %v1924_v6, 0.0  ;;  %v5944_v6 = vld [vmem:[#allocation39_spill] sm:$0xff] }
0x195e   :  { %v1935_v41 = vpack.c.bf16 %v1926_v44, %v1922_v5  ;;  %v1928_v16 = vpop.f32.mrb[59].mxu0  ;;  %v5943_v5 = vld [vmem:[#allocation38_spill] sm:$0xff]  ;;  %v5945_v44 = vld [vmem:[#allocation13_spill] sm:$0xff] }
0x195f   :  { %v1934_v56 = vmax.f32 %v1928_v16, 0.0  ;;  %v5947_v16 = vld [vmem:[#allocation33_spill] sm:$0xff] }
0x1961   :  { %v1936_v40 = vpack.c.bf16 %v1934_v56, %v1932_v18  ;;  %v5948_v18 = vld [vmem:[#allocation24_spill] sm:$0xff]  ;;  %v5949_v56 = vld [vmem:[#allocation25_spill] sm:$0xff] }
0x1963   :  { %1969 = vmatprep.mubr.bf16.mxu1 %v1936_v40  ;;  %v5950_v40 = vld [vmem:[#allocation26_spill] sm:$0xff] }
0x1964   :  { %1970 = vmatmul.mubr.bf16.vlgmr.msra.gmra.mrb[56].mxu1 %v1935_v41  ;;  %v5946_v41 = vld [vmem:[#allocation32_spill] sm:$0xff] }
0x1965   :  { %2040 = vmatpush1.bf16.msra.mxu1 %v4442_v8 }
0x1966   :  { %2041 = vmatprep.subr.bf16.mxu1 %v4445_v11 }
0x1969   :  { %2042 = vmatpush1.bf16.msra.mxu1 %v4448_v37 }
0x196a   :  { %2043 = vmatprep.subr.bf16.mxu1 %v4451_v23 }
0x196d   :  { %2044 = vmatpush1.bf16.msra.mxu1 %v4454_v25 }
0x196e   :  { %2045 = vmatprep.subr.bf16.mxu1 %v4457_v61 }
0x1971   :  { %2046 = vmatpush1.bf16.msra.mxu1 %v4580_v2 }
0x1972   :  { %2047 = vmatprep.subr.bf16.mxu1 %v4583_v7 }
0x1975   :  { %2048 = vmatpush1.bf16.msra.mxu1 %v4586_v10 }
0x1976   :  { %2049 = vmatprep.subr.bf16.mxu1 %v4589_v43 }
0x1979   :  { %2050 = vmatpush1.bf16.msra.mxu1 %v4592_v15 }
0x197a   :  { %2051 = vmatprep.subr.bf16.mxu1 %v4595_v57 }
0x197d   :  { %2052 = vmatpush1.bf16.msra.mxu1 %v4598_v60 }
0x197e   :  { %2053 = vmatprep.subr.bf16.mxu1 %v5940_v48  ;;  %v5951_v48 = vld [vmem:[#allocation27_spill] sm:$0xff] }
0x1981   :  { %2054 = vmatpush1.bf16.msra.mxu1 %v5941_v58  ;;  %v5952_v58 = vld [vmem:[#allocation12_spill] sm:$0xff] }
0x1982   :  { %2055 = vmatprep.subr.bf16.mxu1 %v5942_v50  ;;  %v5953_v50 = vld [vmem:[#allocation14_spill] sm:$0xff] }
0x1985   :  { %2056 = vmatpush1.bf16.msra.mxu1 %v5943_v5  ;;  %v5954_v5 = vld [vmem:[#allocation15_spill] sm:$0xff] }
0x1986   :  { %2057 = vmatprep.subr.bf16.mxu1 %v5944_v6  ;;  %v5955_v6 = vld [vmem:[#allocation16_spill] sm:$0xff] }
0x1989   :  { %2058 = vmatpush1.bf16.msra.mxu1 %v5945_v44  ;;  %v5956_v44 = vld [vmem:[#allocation17_spill] sm:$0xff] }
0x198a   :  { %2059 = vmatprep.subr.bf16.mxu1 %v5946_v41  ;;  %v5957_v41 = vld [vmem:[#allocation18_spill] sm:$0xff] }
0x198d   :  { %2060 = vmatpush1.bf16.msra.mxu1 %v5947_v16  ;;  %v5958_v16 = vld [vmem:[#allocation34_spill] sm:$0xff] }
0x198e   :  { %2061 = vmatprep.subr.bf16.mxu1 %v5948_v18 }
0x1991   :  { %2062 = vmatpush1.bf16.msra.mxu1 %v5949_v56  ;;  %v1980_v56 = vadd.f32 %v5938_v12, %v4848_v46 }
0x1992   :  { %2063 = vmatprep.subr.bf16.mxu1 %v5950_v40 }
0x1995   :  { %2064 = vmatpush1.bf16.msra.mxu1 %v5951_v48  ;;  %v1981_v48 = vadd.f32 %v5939_v36, %v4852_v63 }
0x1996   :  { %2065 = vmatprep.subr.bf16.mxu1 %v5952_v58 }
0x1999   :  { %2066 = vmatpush1.bf16.msra.mxu1 %v5953_v50 }
0x199a   :  { %2067 = vmatprep.subr.bf16.mxu1 %v5954_v5  ;;  %v1982_v5 = vadd.f32 %v4759_v9, %v4856_v38  ;;  %v5972_v38 = vld [vmem:[#allocation14_spill] sm:$0xff] }
0x199d   :  { %2068 = vmatpush1.bf16.msra.mxu1 %v5955_v6 }
0x199e   :  { %2069 = vmatprep.subr.bf16.mxu1 %v5956_v44 }
0x19a1   :  { %2070 = vmatpush1.bf16.msra.mxu1 %v5957_v41  ;;  %v1983_v41 = vadd.f32 %v4768_v52, %v4858_v1  ;;  %v5973_v1 = vld [vmem:[#allocation15_spill] sm:$0xff] }
0x19a2   :  { %2141 = vmatprep.subr.bf16.mxu1 %v5958_v16 }
0x1a37   :  { %v1971_v40 = vpop.f32.mrb[56].mxu1 }
0x1a38   :  { %v4932_v58 = vsub.f32 %v1980_v56, %v1971_v40  ;;  %v1973_v50 = vpop.f32.mrb[57].mxu1 }
0x1a39   :  { %v4936_v6 = vsub.f32 %v1981_v48, %v1973_v50  ;;  %v1975_v44 = vpop.f32.mrb[58].mxu1  ;;  %v5974_v48 = vld [vmem:[#allocation16_spill] sm:$0xff]  ;;  %v5975_v50 = vld [vmem:[#allocation17_spill] sm:$0xff] }
0x1a3a   :  { %v4940_v16 = vsub.f32 %v1982_v5, %v1975_v44  ;;  %v1977_v18 = vpop.f32.mrb[59].mxu1  ;;  %v5976_v5 = vld [vmem:[#allocation18_spill] sm:$0xff] }
0x1a3b   :  { %v4942_v46 = vsub.f32 %v1983_v41, %v1977_v18  ;;  %v5977_v44 = vld [vmem:[#allocation34_spill] sm:$0xff]  ;;  %v2082_v41 = vadd.f32 %v5938_v12, %v4932_v58  ;;  %v2083_v40 = vadd.f32 %v5939_v36, %v4936_v6 }
0x1a3c   :  { %v1988_v63 = vpack.c.bf16 %v4940_v16, %v4932_v58 }
0x1a3d   :  { %v1989_v56 = vpack.c.bf16 %v4942_v46, %v4936_v6 }
0x1a3f   :  { %2022 = vmatprep.mubr.bf16.mxu0 %v1989_v56 }
0x1a40   :  { %2023 = vmatmul.mubr.bf16.vlgmr.msra.gmra.mrb[60].mxu0 %v1988_v63 }
0x1a41   :  { %2093 = vmatpush1.bf16.msra.mxu0 %v4380_v0 }
0x1a42   :  { %2094 = vmatprep.subr.bf16.mxu0 %v4383_v13 }
0x1a45   :  { %2095 = vmatpush1.bf16.msra.mxu0 %v4386_v34 }
0x1a46   :  { %2096 = vmatprep.subr.bf16.mxu0 %v4389_v14 }
0x1a49   :  { %2097 = vmatpush1.bf16.msra.mxu0 %v4392_v35 }
0x1a4a   :  { %2098 = vmatprep.subr.bf16.mxu0 %v4395_v49 }
0x1a4d   :  { %2099 = vmatpush1.bf16.msra.mxu0 %v4398_v29 }
0x1a4e   :  { %2100 = vmatprep.subr.bf16.mxu0 %v4401_v33 }
0x1a51   :  { %2101 = vmatpush1.bf16.msra.mxu0 %v4404_v59  ;;  %v5959_v59 = vld [vmem:[#allocation35_spill] sm:$0xff] }
0x1a52   :  { %2102 = vmatprep.subr.bf16.mxu0 %v4407_v27  ;;  %v5960_v27 = vld [vmem:[#allocation36_spill] sm:$0xff] }
0x1a55   :  { %2103 = vmatpush1.bf16.msra.mxu0 %v4410_v31  ;;  %v5961_v31 = vld [vmem:[#allocation37_spill] sm:$0xff] }
0x1a56   :  { %2104 = vmatprep.subr.bf16.mxu0 %v4413_v47  ;;  %v5962_v47 = vld [vmem:[#allocation38_spill] sm:$0xff] }
0x1a59   :  { %2105 = vmatpush1.bf16.msra.mxu0 %v4416_v42  ;;  %v5963_v42 = vld [vmem:[#allocation39_spill] sm:$0xff] }
0x1a5a   :  { %2106 = vmatprep.subr.bf16.mxu0 %v4419_v62  ;;  %v5964_v62 = vld [vmem:[#allocation13_spill] sm:$0xff] }
0x1a5d   :  { %2107 = vmatpush1.bf16.msra.mxu0 %v4522_v21 }
0x1a5e   :  { %2108 = vmatprep.subr.bf16.mxu0 %v4525_v51 }
0x1a61   :  { %2109 = vmatpush1.bf16.msra.mxu0 %v4528_v53 }
0x1a62   :  { %2110 = vmatprep.subr.bf16.mxu0 %v4531_v54 }
0x1a65   :  { %2111 = vmatpush1.bf16.msra.mxu0 %v4534_v55 }
0x1a66   :  { %2112 = vmatprep.subr.bf16.mxu0 %v4537_v3 }
0x1a69   :  { %2113 = vmatpush1.bf16.msra.mxu0 %v4540_v4 }
0x1a6a   :  { %2114 = vmatprep.subr.bf16.mxu0 %v4543_v39 }
0x1a6d   :  { %2115 = vmatpush1.bf16.msra.mxu0 %v4546_v30 }
0x1a6e   :  { %2116 = vmatprep.subr.bf16.mxu0 %v4549_v17 }
0x1a71   :  { %2117 = vmatpush1.bf16.msra.mxu0 %v4552_v45 }
0x1a72   :  { %2118 = vmatprep.subr.bf16.mxu0 %v4555_v32 }
0x1a75   :  { %2119 = vmatpush1.bf16.msra.mxu0 %v4558_v20 }
0x1a76   :  { %2120 = vmatprep.subr.bf16.mxu0 %v4561_v22 }
0x1a79   :  { %2121 = vmatpush1.bf16.msra.mxu0 %v4564_v24 }
0x1a7a   :  { %2122 = vmatprep.subr.bf16.mxu0 %v4567_v26 }
0x1a7d   :  { %2123 = vmatpush1.bf16.msra.mxu0 %v4570_v28 }
0x1a7e   :  { %2194 = vmatprep.subr.bf16.mxu0 %v4439_v19  ;;  %v5965_v19 = vld [vmem:[#allocation32_spill] sm:$0xff] }
0x1b13   :  { %v2024_v0 = vpop.f32.mrb[60].mxu0 }
0x1b14   :  { %v2026_v13 = vpop.f32.mrb[61].mxu0 }
0x1b15   :  { %v2028_v34 = vpop.f32.mrb[62].mxu0  ;;  %v2034_v49 = vmax.f32 %v2026_v13, 0.0 }
0x1b16   :  { %v2037_v14 = vpack.c.bf16 %v2028_v34, %v2024_v0  ;;  %v2030_v35 = vpop.f32.mrb[63].mxu0  ;;  %v2084_v0 = vadd.f32 %v4759_v9, %v4940_v16  ;;  %v5032_v16 = vld [vmem:[#allocation5] ss:$8 sps:$4 sm:$0xff]  }
0x1b17   :  { %v2036_v29 = vmax.f32 %v2030_v35, 0.0 }
0x1b19   :  { %v2038_v33 = vpack.c.bf16 %v2036_v29, %v2034_v49 }
0x1b1b   :  { %2071 = vmatprep.mubr.bf16.mxu1 %v2038_v33  ;;  %v5035_v33 = vld [vmem:[#allocation5 + $0x14] ss:$8 sps:$4 sm:$0xff]  }
0x1b1c   :  { %2072 = vmatmul.mubr.bf16.vlgmr.msra.gmra.mrb[60].mxu1 %v2037_v14  ;;  %v2085_v14 = vadd.f32 %v4768_v52, %v4942_v46  ;;  %v5038_v46 = vld [vmem:[#allocation5 + $0x10] ss:$8 sps:$4 sm:$0xff]  }
0x1b1d   :  { %2142 = vmatpush1.bf16.msra.mxu1 %v4442_v8  ;;  %v5966_v8 = vld [vmem:[#allocation33_spill] sm:$0xff] }
0x1b1e   :  { %2143 = vmatprep.subr.bf16.mxu1 %v4445_v11  ;;  %v5967_v11 = vld [vmem:[#allocation24_spill] sm:$0xff] }
0x1b21   :  { %2144 = vmatpush1.bf16.msra.mxu1 %v4448_v37  ;;  %v5968_v37 = vld [vmem:[#allocation25_spill] sm:$0xff] }
0x1b22   :  { %2145 = vmatprep.subr.bf16.mxu1 %v4451_v23  ;;  %v5969_v23 = vld [vmem:[#allocation26_spill] sm:$0xff] }
0x1b25   :  { %2146 = vmatpush1.bf16.msra.mxu1 %v4454_v25  ;;  %v5970_v25 = vld [vmem:[#allocation27_spill] sm:$0xff] }
0x1b26   :  { %2147 = vmatprep.subr.bf16.mxu1 %v4457_v61  ;;  %v5971_v61 = vld [vmem:[#allocation12_spill] sm:$0xff] }
0x1b29   :  { %2148 = vmatpush1.bf16.msra.mxu1 %v4580_v2 }
0x1b2a   :  { %2149 = vmatprep.subr.bf16.mxu1 %v4583_v7 }
0x1b2d   :  { %2150 = vmatpush1.bf16.msra.mxu1 %v4586_v10 }
0x1b2e   :  { %2151 = vmatprep.subr.bf16.mxu1 %v4589_v43 }
0x1b31   :  { %2152 = vmatpush1.bf16.msra.mxu1 %v4592_v15 }
0x1b32   :  { %2153 = vmatprep.subr.bf16.mxu1 %v4595_v57 }
0x1b35   :  { %2154 = vmatpush1.bf16.msra.mxu1 %v4598_v60 }
0x1b36   :  { %2155 = vmatprep.subr.bf16.mxu1 %v5959_v59 }
0x1b39   :  { %2156 = vmatpush1.bf16.msra.mxu1 %v5960_v27 }
0x1b3a   :  { %2157 = vmatprep.subr.bf16.mxu1 %v5961_v31 }
0x1b3d   :  { %2158 = vmatpush1.bf16.msra.mxu1 %v5962_v47 }
0x1b3e   :  { %2159 = vmatprep.subr.bf16.mxu1 %v5963_v42 }
0x1b41   :  { %2160 = vmatpush1.bf16.msra.mxu1 %v5964_v62 }
0x1b42   :  { %2161 = vmatprep.subr.bf16.mxu1 %v5965_v19 }
0x1b45   :  { %2162 = vmatpush1.bf16.msra.mxu1 %v5966_v8 }
0x1b46   :  { %2163 = vmatprep.subr.bf16.mxu1 %v5967_v11 }
0x1b49   :  { %2164 = vmatpush1.bf16.msra.mxu1 %v5968_v37 }
0x1b4a   :  { %2165 = vmatprep.subr.bf16.mxu1 %v5969_v23 }
0x1b4d   :  { %2166 = vmatpush1.bf16.msra.mxu1 %v5970_v25 }
0x1b4e   :  { %2167 = vmatprep.subr.bf16.mxu1 %v5971_v61 }
0x1b51   :  { %2168 = vmatpush1.bf16.msra.mxu1 %v5972_v38 }
0x1b52   :  { %2169 = vmatprep.subr.bf16.mxu1 %v5973_v1 }
0x1b55   :  { %2170 = vmatpush1.bf16.msra.mxu1 %v5974_v48 }
0x1b56   :  { %2171 = vmatprep.subr.bf16.mxu1 %v5975_v50 }
0x1b59   :  { %2172 = vmatpush1.bf16.msra.mxu1 %v5976_v5 }
0x1b5a   :  { %2243 = vmatprep.subr.bf16.mxu1 %v5977_v44  ;;  %v5041_v44 = vld [vmem:[#allocation5 + $0x24] ss:$8 sps:$4 sm:$0xff]  }
0x1bef   :  { %v2073_v18 = vpop.f32.mrb[60].mxu1 }
0x1bf0   :  { %v5016_v63 = vsub.f32 %v2082_v41, %v2073_v18  ;;  %v2075_v56 = vpop.f32.mrb[61].mxu1  ;;  %v5044_v41 = vld [vmem:[#allocation5 + $0x20] ss:$8 sps:$4 sm:$0xff]   ;;  %v5047_v18 = vld [vmem:[#allocation5 + $0x34] ss:$8 sps:$4 sm:$0xff]  }
0x1bf1   :  { %v5020_v13 = vsub.f32 %v2083_v40, %v2075_v56  ;;  %v2077_v34 = vpop.f32.mrb[62].mxu1  ;;  %v5050_v40 = vld [vmem:[#allocation5 + $0x30] ss:$8 sps:$4 sm:$0xff]   ;;  %v5053_v56 = vld [vmem:[#allocation5 + $0x44] ss:$8 sps:$4 sm:$0xff]  }
0x1bf2   :  { %v5024_v35 = vsub.f32 %v2084_v0, %v2077_v34  ;;  %v2079_v49 = vpop.f32.mrb[63].mxu1  ;;  %v5056_v0 = vld [vmem:[#allocation5 + $0x40] ss:$8 sps:$4 sm:$0xff]   ;;  %v5059_v34 = vld [vmem:[#allocation5 + $0x54] ss:$8 sps:$4 sm:$0xff]  }
0x1bf3   :  { %v5026_v58 = vsub.f32 %v2085_v14, %v2079_v49  ;;  %v5062_v14 = vld [vmem:[#allocation5 + $0x50] ss:$8 sps:$4 sm:$0xff]   ;;  %v5065_v49 = vld [vmem:[#allocation5 + $0x64] ss:$8 sps:$4 sm:$0xff]  }
0x1bf4   :  { %v2090_v6 = vpack.c.bf16 %v5024_v35, %v5016_v63 }
0x1bf5   :  { %v2091_v29 = vpack.c.bf16 %v5026_v58, %v5020_v13 }
0x1bf7   :  { %2124 = vmatprep.mubr.bf16.mxu0 %v2091_v29  ;;  %v5071_v29 = vld [vmem:[#allocation5 + $0x74] ss:$8 sps:$4 sm:$0xff]  }
0x1bf8   :  { %2125 = vmatmul.mubr.bf16.vlgmr.msra.gmra.mrb[64].mxu0 %v2090_v6  ;;  %v5068_v6 = vld [vmem:[#allocation5 + $0x60] ss:$8 sps:$4 sm:$0xff]  }
0x1bf9   :  { %2195 = vmatpush1.bf16.msra.mxu0 %v5032_v16 }
0x1bfa   :  { %2196 = vmatprep.subr.bf16.mxu0 %v5035_v33 }
0x1bfd   :  { %2197 = vmatpush1.bf16.msra.mxu0 %v5038_v46 }
0x1bfe   :  { %2198 = vmatprep.subr.bf16.mxu0 %v5041_v44 }
0x1c01   :  { %2199 = vmatpush1.bf16.msra.mxu0 %v5044_v41 }
0x1c02   :  { %2200 = vmatprep.subr.bf16.mxu0 %v5047_v18 }
0x1c05   :  { %2201 = vmatpush1.bf16.msra.mxu0 %v5050_v40 }
0x1c06   :  { %2202 = vmatprep.subr.bf16.mxu0 %v5053_v56 }
0x1c09   :  { %2203 = vmatpush1.bf16.msra.mxu0 %v5056_v0 }
0x1c0a   :  { %2204 = vmatprep.subr.bf16.mxu0 %v5059_v34 }
0x1c0d   :  { %2205 = vmatpush1.bf16.msra.mxu0 %v5062_v14 }
0x1c0e   :  { %2206 = vmatprep.subr.bf16.mxu0 %v5065_v49 }
0x1c11   :  { %2207 = vmatpush1.bf16.msra.mxu0 %v5068_v6 }
0x1c12   :  { %2208 = vmatprep.subr.bf16.mxu0 %v5071_v29 }
0x1c15   :  { %2209 = vmatpush1.bf16.msra.mxu0 %v4522_v21  ;;  %v5091_v21 = vld [vmem:[#allocation5 + $0x4] ss:$8 sps:$4 sm:$0xff]  }
0x1c16   :  { %2210 = vmatprep.subr.bf16.mxu0 %v4525_v51 }
0x1c19   :  { %2211 = vmatpush1.bf16.msra.mxu0 %v4528_v53 }
0x1c1a   :  { %2212 = vmatprep.subr.bf16.mxu0 %v4531_v54 }
0x1c1d   :  { %2213 = vmatpush1.bf16.msra.mxu0 %v4534_v55 }
0x1c1e   :  { %2214 = vmatprep.subr.bf16.mxu0 %v4537_v3 }
0x1c21   :  { %2215 = vmatpush1.bf16.msra.mxu0 %v4540_v4 }
0x1c22   :  { %2216 = vmatprep.subr.bf16.mxu0 %v4543_v39 }
0x1c25   :  { %2217 = vmatpush1.bf16.msra.mxu0 %v4546_v30 }
0x1c26   :  { %2218 = vmatprep.subr.bf16.mxu0 %v4549_v17  ;;  %v5094_v17 = vld [vmem:[#allocation7] ss:$8 sps:$4 sm:$0xff]  }
0x1c29   :  { %2219 = vmatpush1.bf16.msra.mxu0 %v4552_v45  ;;  %v5097_v45 = vld [vmem:[#allocation7 + $0x14] ss:$8 sps:$4 sm:$0xff]  }
0x1c2a   :  { %2220 = vmatprep.subr.bf16.mxu0 %v4555_v32  ;;  %v5100_v32 = vld [vmem:[#allocation7 + $0x10] ss:$8 sps:$4 sm:$0xff]  }
0x1c2d   :  { %2221 = vmatpush1.bf16.msra.mxu0 %v4558_v20  ;;  %v5103_v20 = vld [vmem:[#allocation7 + $0x24] ss:$8 sps:$4 sm:$0xff]  }
0x1c2e   :  { %2222 = vmatprep.subr.bf16.mxu0 %v4561_v22  ;;  %v5106_v22 = vld [vmem:[#allocation7 + $0x20] ss:$8 sps:$4 sm:$0xff]  }
0x1c31   :  { %2223 = vmatpush1.bf16.msra.mxu0 %v4564_v24  ;;  %v5109_v24 = vld [vmem:[#allocation7 + $0x34] ss:$8 sps:$4 sm:$0xff]  }
0x1c32   :  { %2224 = vmatprep.subr.bf16.mxu0 %v4567_v26  ;;  %v5137_v26 = vld [vmem:[#allocation7 + $0x4] ss:$8 sps:$4 sm:$0xff]  }
0x1c33   :  { %5978 = vst [vmem:[#allocation21_spill] sm:$0xff] %v5137_v26 }
0x1c35   :  { %2225 = vmatpush1.bf16.msra.mxu0 %v4570_v28  ;;  %v2184_v28 = vadd.f32 %v5938_v12, %v5016_v63  ;;  %v5198_v63 = vld [vmem:[#allocation5 + $0xb0] ss:$8 sps:$4 sm:$0xff]  }
0x1c36   :  { %2296 = vmatprep.subr.bf16.mxu0 %v5091_v21 }
0x1ccb   :  { %v2126_v51 = vpop.f32.mrb[64].mxu0 }
0x1ccc   :  { %v2128_v53 = vpop.f32.mrb[65].mxu0 }
0x1ccd   :  { %v2130_v54 = vpop.f32.mrb[66].mxu0  ;;  %v2136_v4 = vmax.f32 %v2128_v53, 0.0  ;;  %v5213_v53 = vld [vmem:[#allocation5 + $0xe4] ss:$8 sps:$4 sm:$0xff]  }
0x1cce   :  { %v2139_v55 = vpack.c.bf16 %v2130_v54, %v2126_v51  ;;  %v2132_v3 = vpop.f32.mrb[67].mxu0  ;;  %v5210_v51 = vld [vmem:[#allocation5 + $0xd0] ss:$8 sps:$4 sm:$0xff]   ;;  %v5216_v54 = vld [vmem:[#allocation5 + $0xe0] ss:$8 sps:$4 sm:$0xff]  }
0x1ccf   :  { %v2138_v39 = vmax.f32 %v2132_v3, 0.0  ;;  %v5222_v3 = vld [vmem:[#allocation5 + $0xf0] ss:$8 sps:$4 sm:$0xff]  }
0x1cd1   :  { %v2140_v30 = vpack.c.bf16 %v2138_v39, %v2136_v4 }
0x1cd3   :  { %2173 = vmatprep.mubr.bf16.mxu1 %v2140_v30 }
0x1cd4   :  { %2174 = vmatmul.mubr.bf16.vlgmr.msra.gmra.mrb[64].mxu1 %v2139_v55  ;;  %v5219_v55 = vld [vmem:[#allocation5 + $0xf4] ss:$8 sps:$4 sm:$0xff]  }
0x1cd5   :  { %2244 = vmatpush1.bf16.msra.mxu1 %v5094_v17 }
0x1cd6   :  { %2245 = vmatprep.subr.bf16.mxu1 %v5097_v45 }
0x1cd9   :  { %2246 = vmatpush1.bf16.msra.mxu1 %v5100_v32 }
0x1cda   :  { %2247 = vmatprep.subr.bf16.mxu1 %v5103_v20 }
0x1cdd   :  { %2248 = vmatpush1.bf16.msra.mxu1 %v5106_v22 }
0x1cde   :  { %2249 = vmatprep.subr.bf16.mxu1 %v5109_v24 }
0x1ce1   :  { %2250 = vmatpush1.bf16.msra.mxu1 %v4580_v2 }
0x1ce2   :  { %2251 = vmatprep.subr.bf16.mxu1 %v4583_v7  ;;  %v2185_v7 = vadd.f32 %v5939_v36, %v5020_v13  ;;  %v5201_v13 = vld [vmem:[#allocation5 + $0xc4] ss:$8 sps:$4 sm:$0xff]  }
0x1ce5   :  { %2252 = vmatpush1.bf16.msra.mxu1 %v4586_v10 }
0x1ce6   :  { %2253 = vmatprep.subr.bf16.mxu1 %v4589_v43 }
0x1ce9   :  { %2254 = vmatpush1.bf16.msra.mxu1 %v4592_v15  ;;  %v2186_v15 = vadd.f32 %v4759_v9, %v5024_v35  ;;  %v5204_v35 = vld [vmem:[#allocation5 + $0xc0] ss:$8 sps:$4 sm:$0xff]  }
0x1cea   :  { %2255 = vmatprep.subr.bf16.mxu1 %v4595_v57 }
0x1ced   :  { %2256 = vmatpush1.bf16.msra.mxu1 %v4598_v60 }
0x1cee   :  { %2257 = vmatprep.subr.bf16.mxu1 %v5959_v59  ;;  %v2187_v59 = vadd.f32 %v4768_v52, %v5026_v58  ;;  %v5207_v58 = vld [vmem:[#allocation5 + $0xd4] ss:$8 sps:$4 sm:$0xff]  }
0x1cf1   :  { %2258 = vmatpush1.bf16.msra.mxu1 %v5960_v27 }
0x1cf2   :  { %2259 = vmatprep.subr.bf16.mxu1 %v5961_v31 }
0x1cf5   :  { %2260 = vmatpush1.bf16.msra.mxu1 %v5962_v47 }
0x1cf6   :  { %2261 = vmatprep.subr.bf16.mxu1 %v5963_v42 }
0x1cf9   :  { %2262 = vmatpush1.bf16.msra.mxu1 %v5964_v62 }
0x1cfa   :  { %2263 = vmatprep.subr.bf16.mxu1 %v5965_v19  ;;  %v5174_v19 = vld [vmem:[#allocation5 + $0x70] ss:$8 sps:$4 sm:$0xff]  }
0x1cfd   :  { %2264 = vmatpush1.bf16.msra.mxu1 %v5966_v8  ;;  %v5177_v8 = vld [vmem:[#allocation5 + $0x84] ss:$8 sps:$4 sm:$0xff]  }
0x1cfe   :  { %2265 = vmatprep.subr.bf16.mxu1 %v5967_v11  ;;  %v5180_v11 = vld [vmem:[#allocation5 + $0x80] ss:$8 sps:$4 sm:$0xff]  }
0x1d01   :  { %2266 = vmatpush1.bf16.msra.mxu1 %v5968_v37  ;;  %v5183_v37 = vld [vmem:[#allocation5 + $0x94] ss:$8 sps:$4 sm:$0xff]  }
0x1d02   :  { %2267 = vmatprep.subr.bf16.mxu1 %v5969_v23  ;;  %v5186_v23 = vld [vmem:[#allocation5 + $0x90] ss:$8 sps:$4 sm:$0xff]  }
0x1d05   :  { %2268 = vmatpush1.bf16.msra.mxu1 %v5970_v25  ;;  %v5189_v25 = vld [vmem:[#allocation5 + $0xa4] ss:$8 sps:$4 sm:$0xff]  }
0x1d06   :  { %2269 = vmatprep.subr.bf16.mxu1 %v5971_v61  ;;  %v5192_v61 = vld [vmem:[#allocation5 + $0xa0] ss:$8 sps:$4 sm:$0xff]  }
0x1d09   :  { %2270 = vmatpush1.bf16.msra.mxu1 %v5972_v38  ;;  %v5195_v38 = vld [vmem:[#allocation5 + $0xb4] ss:$8 sps:$4 sm:$0xff]  }
0x1d0a   :  { %2271 = vmatprep.subr.bf16.mxu1 %v5973_v1 }
0x1d0d   :  { %2272 = vmatpush1.bf16.msra.mxu1 %v5974_v48 }
0x1d0e   :  { %2273 = vmatprep.subr.bf16.mxu1 %v5975_v50 }
0x1d11   :  { %2274 = vmatpush1.bf16.msra.mxu1 %v5976_v5 }
0x1d12   :  { %2345 = vmatprep.subr.bf16.mxu1 %v5137_v26 }
0x1da7   :  { %v2175_v2 = vpop.f32.mrb[64].mxu1 }
0x1da8   :  { %v5144_v10 = vsub.f32 %v2184_v28, %v2175_v2  ;;  %v2177_v43 = vpop.f32.mrb[65].mxu1 }
0x1da9   :  { %v5148_v57 = vsub.f32 %v2185_v7, %v2177_v43  ;;  %v2179_v60 = vpop.f32.mrb[66].mxu1 }
0x1daa   :  { %v5152_v27 = vsub.f32 %v2186_v15, %v2179_v60  ;;  %v2181_v31 = vpop.f32.mrb[67].mxu1  ;;  %v5232_v60 = vld [vmem:[#allocation7 + $0x30] ss:$8 sps:$4 sm:$0xff]  }
0x1dab   :  { %v5154_v47 = vsub.f32 %v2187_v59, %v2181_v31  ;;  %v5235_v59 = vld [vmem:[#allocation7 + $0x44] ss:$8 sps:$4 sm:$0xff]   ;;  %v5238_v31 = vld [vmem:[#allocation7 + $0x40] ss:$8 sps:$4 sm:$0xff]  }
0x1dac   :  { %v2192_v42 = vpack.c.bf16 %v5152_v27, %v5144_v10 }
0x1dad   :  { %v2193_v62 = vpack.c.bf16 %v5154_v47, %v5148_v57 }
0x1daf   :  { %2226 = vmatprep.mubr.bf16.mxu0 %v2193_v62  ;;  %v5244_v62 = vld [vmem:[#allocation7 + $0x50] ss:$8 sps:$4 sm:$0xff]  }
0x1db0   :  { %2227 = vmatmul.mubr.bf16.vlgmr.msra.gmra.mrb[68].mxu0 %v2192_v42  ;;  %v5241_v42 = vld [vmem:[#allocation7 + $0x54] ss:$8 sps:$4 sm:$0xff]  }
0x1db1   :  { %2297 = vmatpush1.bf16.msra.mxu0 %v5032_v16 }
0x1db2   :  { %2298 = vmatprep.subr.bf16.mxu0 %v5035_v33 }
0x1db5   :  { %2299 = vmatpush1.bf16.msra.mxu0 %v5038_v46 }
0x1db6   :  { %2300 = vmatprep.subr.bf16.mxu0 %v5041_v44 }
0x1db9   :  { %2301 = vmatpush1.bf16.msra.mxu0 %v5044_v41 }
0x1dba   :  { %2302 = vmatprep.subr.bf16.mxu0 %v5047_v18 }
0x1dbd   :  { %2303 = vmatpush1.bf16.msra.mxu0 %v5050_v40 }
0x1dbe   :  { %2304 = vmatprep.subr.bf16.mxu0 %v5053_v56 }
0x1dc1   :  { %2305 = vmatpush1.bf16.msra.mxu0 %v5056_v0 }
0x1dc2   :  { %2306 = vmatprep.subr.bf16.mxu0 %v5059_v34 }
0x1dc5   :  { %2307 = vmatpush1.bf16.msra.mxu0 %v5062_v14 }
0x1dc6   :  { %2308 = vmatprep.subr.bf16.mxu0 %v5065_v49 }
0x1dc9   :  { %2309 = vmatpush1.bf16.msra.mxu0 %v5068_v6 }
0x1dca   :  { %2310 = vmatprep.subr.bf16.mxu0 %v5071_v29 }
0x1dcd   :  { %2311 = vmatpush1.bf16.msra.mxu0 %v5174_v19 }
0x1dce   :  { %2312 = vmatprep.subr.bf16.mxu0 %v5177_v8 }
0x1dd1   :  { %2313 = vmatpush1.bf16.msra.mxu0 %v5180_v11 }
0x1dd2   :  { %2314 = vmatprep.subr.bf16.mxu0 %v5183_v37 }
0x1dd5   :  { %2315 = vmatpush1.bf16.msra.mxu0 %v5186_v23 }
0x1dd6   :  { %2316 = vmatprep.subr.bf16.mxu0 %v5189_v25 }
0x1dd9   :  { %2317 = vmatpush1.bf16.msra.mxu0 %v5192_v61 }
0x1dda   :  { %2318 = vmatprep.subr.bf16.mxu0 %v5195_v38 }
0x1ddd   :  { %2319 = vmatpush1.bf16.msra.mxu0 %v5198_v63 }
0x1dde   :  { %2320 = vmatprep.subr.bf16.mxu0 %v5201_v13 }
0x1de1   :  { %2321 = vmatpush1.bf16.msra.mxu0 %v5204_v35 }
0x1de2   :  { %2322 = vmatprep.subr.bf16.mxu0 %v5207_v58 }
0x1de5   :  { %2323 = vmatpush1.bf16.msra.mxu0 %v5210_v51 }
0x1de6   :  { %2324 = vmatprep.subr.bf16.mxu0 %v5213_v53 }
0x1de9   :  { %2325 = vmatpush1.bf16.msra.mxu0 %v5216_v54 }
0x1dea   :  { %2326 = vmatprep.subr.bf16.mxu0 %v5219_v55 }
0x1ded   :  { %2327 = vmatpush1.bf16.msra.mxu0 %v5222_v3 }
0x1dee   :  { %2398 = vmatprep.subr.bf16.mxu0 %v5091_v21 }
0x1e83   :  { %v2228_v4 = vpop.f32.mrb[68].mxu0 }
0x1e84   :  { %v2230_v39 = vpop.f32.mrb[69].mxu0 }
0x1e85   :  { %v2232_v30 = vpop.f32.mrb[70].mxu0  ;;  %v2238_v7 = vmax.f32 %v2230_v39, 0.0  ;;  %v5250_v39 = vld [vmem:[#allocation7 + $0x60] ss:$8 sps:$4 sm:$0xff]  }
0x1e86   :  { %v2241_v28 = vpack.c.bf16 %v2232_v30, %v2228_v4  ;;  %v2234_v2 = vpop.f32.mrb[71].mxu0  ;;  %v5247_v4 = vld [vmem:[#allocation7 + $0x64] ss:$8 sps:$4 sm:$0xff]   ;;  %v5253_v30 = vld [vmem:[#allocation7 + $0x74] ss:$8 sps:$4 sm:$0xff]  }
0x1e87   :  { %v2240_v43 = vmax.f32 %v2234_v2, 0.0  ;;  %5979 = vst [vmem:[#allocation22_spill] sm:$0xff] %v5253_v30  ;;  %v5259_v2 = vld [vmem:[#allocation7 + $0x84] ss:$8 sps:$4 sm:$0xff]  }
0x1e88   :  { %5981 = vst [vmem:[#allocation29_spill] sm:$0xff] %v5259_v2 }
0x1e89   :  { %v2242_v15 = vpack.c.bf16 %v2240_v43, %v2238_v7  ;;  %v5262_v7 = vld [vmem:[#allocation7 + $0x80] ss:$8 sps:$4 sm:$0xff]   ;;  %v5265_v43 = vld [vmem:[#allocation7 + $0x94] ss:$8 sps:$4 sm:$0xff]  }
0x1e8a   :  { %5982 = vst [vmem:[#allocation30_spill] sm:$0xff] %v5262_v7  ;;  %5983 = vst [vmem:[#allocation31_spill] sm:$0xff] %v5265_v43 }
0x1e8b   :  { %2275 = vmatprep.mubr.bf16.mxu1 %v2242_v15  ;;  %v5268_v15 = vld [vmem:[#allocation7 + $0x90] ss:$8 sps:$4 sm:$0xff]  }
0x1e8c   :  { %2276 = vmatmul.mubr.bf16.vlgmr.msra.gmra.mrb[68].mxu1 %v2241_v28  ;;  %v5256_v28 = vld [vmem:[#allocation7 + $0x70] ss:$8 sps:$4 sm:$0xff]   ;;  %5984 = vst [vmem:[#allocation23_spill] sm:$0xff] %v5268_v15 }
0x1e8d   :  { %2346 = vmatpush1.bf16.msra.mxu1 %v5094_v17  ;;  %5980 = vst [vmem:[#allocation28_spill] sm:$0xff] %v5256_v28 }
0x1e8e   :  { %2347 = vmatprep.subr.bf16.mxu1 %v5097_v45 }
0x1e91   :  { %2348 = vmatpush1.bf16.msra.mxu1 %v5100_v32 }
0x1e92   :  { %2349 = vmatprep.subr.bf16.mxu1 %v5103_v20 }
0x1e95   :  { %2350 = vmatpush1.bf16.msra.mxu1 %v5106_v22 }
0x1e96   :  { %2351 = vmatprep.subr.bf16.mxu1 %v5109_v24 }
0x1e99   :  { %2352 = vmatpush1.bf16.msra.mxu1 %v5232_v60 }
0x1e9a   :  { %2353 = vmatprep.subr.bf16.mxu1 %v5235_v59 }
0x1e9d   :  { %2354 = vmatpush1.bf16.msra.mxu1 %v5238_v31 }
0x1e9e   :  { %2355 = vmatprep.subr.bf16.mxu1 %v5241_v42 }
0x1ea1   :  { %2356 = vmatpush1.bf16.msra.mxu1 %v5244_v62 }
0x1ea2   :  { %2357 = vmatprep.subr.bf16.mxu1 %v5247_v4 }
0x1ea5   :  { %2358 = vmatpush1.bf16.msra.mxu1 %v5250_v39 }
0x1ea6   :  { %2359 = vmatprep.subr.bf16.mxu1 %v5253_v30  ;;  %v5271_v30 = vld [vmem:[#allocation7 + $0xa4] ss:$8 sps:$4 sm:$0xff]  }
0x1ea7   :  { %5985 = vst [vmem:[#allocation19_spill] sm:$0xff] %v5271_v30 }
0x1ea9   :  { %2360 = vmatpush1.bf16.msra.mxu1 %v5256_v28  ;;  %v5274_v28 = vld [vmem:[#allocation7 + $0xa0] ss:$8 sps:$4 sm:$0xff]  }
0x1eaa   :  { %2361 = vmatprep.subr.bf16.mxu1 %v5259_v2  ;;  %5986 = vst [vmem:[#allocation20_spill] sm:$0xff] %v5274_v28  ;;  %v5277_v2 = vld [vmem:[#allocation7 + $0xb4] ss:$8 sps:$4 sm:$0xff]  }
0x1eab   :  { %5987 = vst [vmem:[#allocation35_spill] sm:$0xff] %v5277_v2 }
0x1ead   :  { %2362 = vmatpush1.bf16.msra.mxu1 %v5262_v7  ;;  %v5280_v7 = vld [vmem:[#allocation7 + $0xb0] ss:$8 sps:$4 sm:$0xff]  }
0x1eae   :  { %2363 = vmatprep.subr.bf16.mxu1 %v5265_v43  ;;  %5988 = vst [vmem:[#allocation36_spill] sm:$0xff] %v5280_v7  ;;  %v5283_v43 = vld [vmem:[#allocation7 + $0xc4] ss:$8 sps:$4 sm:$0xff]  }
0x1eaf   :  { %5989 = vst [vmem:[#allocation37_spill] sm:$0xff] %v5283_v43 }
0x1eb1   :  { %2364 = vmatpush1.bf16.msra.mxu1 %v5268_v15  ;;  %v5286_v15 = vld [vmem:[#allocation7 + $0xc0] ss:$8 sps:$4 sm:$0xff]  }
0x1eb2   :  { %2365 = vmatprep.subr.bf16.mxu1 %v5271_v30  ;;  %5990 = vst [vmem:[#allocation38_spill] sm:$0xff] %v5286_v15  ;;  %v5289_v30 = vld [vmem:[#allocation7 + $0xd4] ss:$8 sps:$4 sm:$0xff]  }
0x1eb3   :  { %5991 = vst [vmem:[#allocation39_spill] sm:$0xff] %v5289_v30 }
0x1eb5   :  { %2366 = vmatpush1.bf16.msra.mxu1 %v5274_v28  ;;  %v5292_v28 = vld [vmem:[#allocation7 + $0xd0] ss:$8 sps:$4 sm:$0xff]  }
0x1eb6   :  { %2367 = vmatprep.subr.bf16.mxu1 %v5277_v2  ;;  %5992 = vst [vmem:[#allocation13_spill] sm:$0xff] %v5292_v28 }
0x1eb9   :  { %2368 = vmatpush1.bf16.msra.mxu1 %v5280_v7 }
0x1eba   :  { %2369 = vmatprep.subr.bf16.mxu1 %v5283_v43 }
0x1ebd   :  { %2370 = vmatpush1.bf16.msra.mxu1 %v5286_v15  ;;  %v2286_v15 = vadd.f32 %v5938_v12, %v5144_v10 }
0x1ebe   :  { %2371 = vmatprep.subr.bf16.mxu1 %v5289_v30  ;;  %v2287_v30 = vadd.f32 %v5939_v36, %v5148_v57 }
0x1ec1   :  { %2372 = vmatpush1.bf16.msra.mxu1 %v5292_v28 }
0x1ec2   :  { %2373 = vmatprep.subr.bf16.mxu1 %v5973_v1  ;;  %v2288_v1 = vadd.f32 %v4759_v9, %v5152_v27 }
0x1ec5   :  { %2374 = vmatpush1.bf16.msra.mxu1 %v5974_v48 }
0x1ec6   :  { %2375 = vmatprep.subr.bf16.mxu1 %v5975_v50 }
0x1ec9   :  { %2376 = vmatpush1.bf16.msra.mxu1 %v5976_v5  ;;  %v2289_v5 = vadd.f32 %v4768_v52, %v5154_v47 }
0x1eca   :  { %2447 = vmatprep.subr.bf16.mxu1 %v5137_v26 }
0x1f5f   :  { %v2277_v43 = vpop.f32.mrb[68].mxu1 }
0x1f60   :  { %v5304_v7 = vsub.f32 %v2286_v15, %v2277_v43  ;;  %v2279_v28 = vpop.f32.mrb[69].mxu1  ;;  %v5994_v43 = vld [vmem:[#allocation28_spill] sm:$0xff]  ;;  %v5995_v15 = vld [vmem:[#allocation29_spill] sm:$0xff] }
0x1f61   :  { %v5308_v48 = vsub.f32 %v2287_v30, %v2279_v28  ;;  %v2281_v50 = vpop.f32.mrb[70].mxu1 }
0x1f62   :  { %v5312_v26 = vsub.f32 %v2288_v1, %v2281_v50  ;;  %v2283_v2 = vpop.f32.mrb[71].mxu1  ;;  %v5996_v1 = vld [vmem:[#allocation30_spill] sm:$0xff]  ;;  %v5997_v50 = vld [vmem:[#allocation31_spill] sm:$0xff] }
0x1f63   :  { %v5314_v12 = vsub.f32 %v2289_v5, %v2283_v2  ;;  %v5998_v5 = vld [vmem:[#allocation23_spill] sm:$0xff] }
0x1f64   :  { %v2294_v36 = vpack.c.bf16 %v5312_v26, %v5304_v7 }
0x1f65   :  { %v2295_v10 = vpack.c.bf16 %v5314_v12, %v5308_v48 }
0x1f67   :  { %2328 = vmatprep.mubr.bf16.mxu0 %v2295_v10  ;;  %v6000_v10 = vld [vmem:[#allocation20_spill] sm:$0xff] }
0x1f68   :  { %2329 = vmatmul.mubr.bf16.vlgmr.msra.gmra.mrb[72].mxu0 %v2294_v36  ;;  %v5999_v36 = vld [vmem:[#allocation19_spill] sm:$0xff] }
0x1f69   :  { %2399 = vmatpush1.bf16.msra.mxu0 %v5032_v16 }
0x1f6a   :  { %2400 = vmatprep.subr.bf16.mxu0 %v5035_v33 }
0x1f6d   :  { %2401 = vmatpush1.bf16.msra.mxu0 %v5038_v46 }
0x1f6e   :  { %2402 = vmatprep.subr.bf16.mxu0 %v5041_v44 }
0x1f71   :  { %2403 = vmatpush1.bf16.msra.mxu0 %v5044_v41 }
0x1f72   :  { %2404 = vmatprep.subr.bf16.mxu0 %v5047_v18 }
0x1f75   :  { %2405 = vmatpush1.bf16.msra.mxu0 %v5050_v40 }
0x1f76   :  { %2406 = vmatprep.subr.bf16.mxu0 %v5053_v56 }
0x1f79   :  { %2407 = vmatpush1.bf16.msra.mxu0 %v5056_v0 }
0x1f7a   :  { %2408 = vmatprep.subr.bf16.mxu0 %v5059_v34 }
0x1f7d   :  { %2409 = vmatpush1.bf16.msra.mxu0 %v5062_v14 }
0x1f7e   :  { %2410 = vmatprep.subr.bf16.mxu0 %v5065_v49 }
0x1f81   :  { %2411 = vmatpush1.bf16.msra.mxu0 %v5068_v6 }
0x1f82   :  { %2412 = vmatprep.subr.bf16.mxu0 %v5071_v29 }
0x1f85   :  { %2413 = vmatpush1.bf16.msra.mxu0 %v5174_v19 }
0x1f86   :  { %2414 = vmatprep.subr.bf16.mxu0 %v5177_v8 }
0x1f89   :  { %2415 = vmatpush1.bf16.msra.mxu0 %v5180_v11 }
0x1f8a   :  { %2416 = vmatprep.subr.bf16.mxu0 %v5183_v37 }
0x1f8d   :  { %2417 = vmatpush1.bf16.msra.mxu0 %v5186_v23 }
0x1f8e   :  { %2418 = vmatprep.subr.bf16.mxu0 %v5189_v25 }
0x1f91   :  { %2419 = vmatpush1.bf16.msra.mxu0 %v5192_v61 }
0x1f92   :  { %2420 = vmatprep.subr.bf16.mxu0 %v5195_v38 }
0x1f95   :  { %2421 = vmatpush1.bf16.msra.mxu0 %v5198_v63 }
0x1f96   :  { %2422 = vmatprep.subr.bf16.mxu0 %v5201_v13 }
0x1f99   :  { %2423 = vmatpush1.bf16.msra.mxu0 %v5204_v35 }
0x1f9a   :  { %2424 = vmatprep.subr.bf16.mxu0 %v5207_v58 }
0x1f9d   :  { %2425 = vmatpush1.bf16.msra.mxu0 %v5210_v51 }
0x1f9e   :  { %2426 = vmatprep.subr.bf16.mxu0 %v5213_v53 }
0x1fa1   :  { %2427 = vmatpush1.bf16.msra.mxu0 %v5216_v54 }
0x1fa2   :  { %2428 = vmatprep.subr.bf16.mxu0 %v5219_v55 }
0x1fa5   :  { %2429 = vmatpush1.bf16.msra.mxu0 %v5222_v3 }
0x1fa6   :  { %2500 = vmatprep.subr.bf16.mxu0 %v5091_v21  ;;  %v5993_v21 = vld [vmem:[#allocation22_spill] sm:$0xff] }
0x203b   :  { %v2330_v52 = vpop.f32.mrb[72].mxu0 }
0x203c   :  { %v2332_v9 = vpop.f32.mrb[73].mxu0 }
0x203d   :  { %v2334_v57 = vpop.f32.mrb[74].mxu0  ;;  %v2340_v30 = vmax.f32 %v2332_v9, 0.0  ;;  %v6002_v9 = vld [vmem:[#allocation36_spill] sm:$0xff] }
0x203e   :  { %v2343_v27 = vpack.c.bf16 %v2334_v57, %v2330_v52  ;;  %v2336_v47 = vpop.f32.mrb[75].mxu0  ;;  %v6001_v52 = vld [vmem:[#allocation35_spill] sm:$0xff]  ;;  %v6003_v57 = vld [vmem:[#allocation37_spill] sm:$0xff] }
0x203f   :  { %v2342_v28 = vmax.f32 %v2336_v47, 0.0  ;;  %v6005_v47 = vld [vmem:[#allocation39_spill] sm:$0xff] }
0x2041   :  { %v2344_v2 = vpack.c.bf16 %v2342_v28, %v2340_v30  ;;  %v6006_v30 = vld [vmem:[#allocation13_spill] sm:$0xff] }
0x2042   :  { %v5379_v28 = vld [vmem:[#allocation7 + $0xe4] ss:$8 sps:$4 sm:$0xff]  }
0x2043   :  { %2377 = vmatprep.mubr.bf16.mxu1 %v2344_v2  ;;  %6007 = vst [vmem:[#allocation32_spill] sm:$0xff] %v5379_v28  ;;  %v5382_v2 = vld [vmem:[#allocation7 + $0xe0] ss:$8 sps:$4 sm:$0xff]  }
0x2044   :  { %2378 = vmatmul.mubr.bf16.vlgmr.msra.gmra.mrb[72].mxu1 %v2343_v27  ;;  %v6004_v27 = vld [vmem:[#allocation38_spill] sm:$0xff]  ;;  %6008 = vst [vmem:[#allocation33_spill] sm:$0xff] %v5382_v2 }
0x2045   :  { %2448 = vmatpush1.bf16.msra.mxu1 %v5094_v17 }
0x2046   :  { %2449 = vmatprep.subr.bf16.mxu1 %v5097_v45 }
0x2049   :  { %2450 = vmatpush1.bf16.msra.mxu1 %v5100_v32 }
0x204a   :  { %2451 = vmatprep.subr.bf16.mxu1 %v5103_v20 }
0x204d   :  { %2452 = vmatpush1.bf16.msra.mxu1 %v5106_v22 }
0x204e   :  { %2453 = vmatprep.subr.bf16.mxu1 %v5109_v24 }
0x2051   :  { %2454 = vmatpush1.bf16.msra.mxu1 %v5232_v60 }
0x2052   :  { %2455 = vmatprep.subr.bf16.mxu1 %v5235_v59 }
0x2055   :  { %2456 = vmatpush1.bf16.msra.mxu1 %v5238_v31 }
0x2056   :  { %2457 = vmatprep.subr.bf16.mxu1 %v5241_v42 }
0x2059   :  { %2458 = vmatpush1.bf16.msra.mxu1 %v5244_v62 }
0x205a   :  { %2459 = vmatprep.subr.bf16.mxu1 %v5247_v4 }
0x205d   :  { %2460 = vmatpush1.bf16.msra.mxu1 %v5250_v39 }
0x205e   :  { %2461 = vmatprep.subr.bf16.mxu1 %v5993_v21 }
0x2061   :  { %2462 = vmatpush1.bf16.msra.mxu1 %v5994_v43 }
0x2062   :  { %2463 = vmatprep.subr.bf16.mxu1 %v5995_v15 }
0x2065   :  { %2464 = vmatpush1.bf16.msra.mxu1 %v5996_v1 }
0x2066   :  { %2465 = vmatprep.subr.bf16.mxu1 %v5997_v50 }
0x2069   :  { %2466 = vmatpush1.bf16.msra.mxu1 %v5998_v5 }
0x206a   :  { %2467 = vmatprep.subr.bf16.mxu1 %v5999_v36  ;;  %v5420_v36 = vld [vmem:[%s5522_s1 + $0x18] sm:$0xff] }
0x206d   :  { %2468 = vmatpush1.bf16.msra.mxu1 %v6000_v10  ;;  %v5385_v10 = vld [vmem:[#allocation7 + $0xf4] ss:$8 sps:$4 sm:$0xff]  }
0x206e   :  { %2469 = vmatprep.subr.bf16.mxu1 %v6001_v52  ;;  %6009 = vst [vmem:[#allocation24_spill] sm:$0xff] %v5385_v10 }
0x2071   :  { %2470 = vmatpush1.bf16.msra.mxu1 %v6002_v9  ;;  %v5388_v9 = vld [vmem:[#allocation7 + $0xf0] ss:$8 sps:$4 sm:$0xff]  }
0x2072   :  { %2471 = vmatprep.subr.bf16.mxu1 %v6003_v57  ;;  %6010 = vst [vmem:[#allocation25_spill] sm:$0xff] %v5388_v9  ;;  %v5411_v57 = vld [vmem:[%s5522_s1 + $0x10] sm:$0xff] }
0x2075   :  { %2472 = vmatpush1.bf16.msra.mxu1 %v6004_v27  ;;  %v6011_v27 = vld [vmem:[#allocation21_spill] sm:$0xff] }
0x2076   :  { %2473 = vmatprep.subr.bf16.mxu1 %v6005_v47 }
0x2079   :  { %2474 = vmatpush1.bf16.msra.mxu1 %v6006_v30  ;;  %v5395_v30 = vld [vmem:[%s5522_s1] sm:$0xff] }
0x207a   :  { %2475 = vmatprep.subr.bf16.mxu1 %v5379_v28  ;;  %6012 = vst [vmem:[#allocation26_spill] sm:$0xff] %v5395_v30  ;;  %v2388_v28 = vadd.f32 %v5395_v30, %v5304_v7  ;;  %v2390_v7 = vadd.f32 %v5411_v57, %v5312_v26 }
0x207d   :  { %2476 = vmatpush1.bf16.msra.mxu1 %v5382_v2  ;;  %v5402_v2 = vld [vmem:[%s5522_s1 + $0x8] sm:$0xff]  ;;  %s3095_s1 = smov [#allocation8]  }
0x207e   :  { %2477 = vmatprep.subr.bf16.mxu1 %v5385_v10  ;;  %6013 = vst [vmem:[#allocation27_spill] sm:$0xff] %v5402_v2  ;;  %v2389_v10 = vadd.f32 %v5402_v2, %v5308_v48  ;;  %v2391_v48 = vadd.f32 %v5420_v36, %v5314_v12  ;;  %s2609_s5 = sshll.u32 %s3095_s1, 4  ;;  %s2610_s5 = int_to_ptr.vmem [resolvable:$true] %s2609_s5 }
0x207f   :  { %s3060_s6 = scalar_lea.vmem %s2610_s5, 512  ;;  %p3065_p11 = scmp.lt.s32.totalorder %s2610_s5, %s2610_s5 }
0x2080   :  { %p3061_p10 = scmp.ne.s32.totalorder %s2610_s5, %s3060_s6  ;;  %p3066_p12 = scmp.lt.s32.totalorder %s3060_s6, %s3060_s6 }
0x2081   :  { %2478 = vmatpush1.bf16.msra.mxu1 %v5388_v9 }
0x2082   :  { %2549 = vmatprep.subr.bf16.mxu1 %v6011_v27  ;;  %p3067_p13 = por %p3066_p12, %p3065_p11 }
0x2084   :  { %p3068_p0 = pnand %p3067_p13, %p3061_p10 }
0x2117   :  { %v2379_v47 = vpop.f32.mrb[72].mxu1 }
0x2118   :  { %v5406_v9 = vsub.f32 %v2388_v28, %v2379_v47  ;;  %v2381_v27 = vpop.f32.mrb[73].mxu1 }
0x2119   :  { %v5415_v30 = vsub.f32 %v2389_v10, %v2381_v27  ;;  %v2383_v52 = vpop.f32.mrb[74].mxu1 }
0x211a   :  { %v5424_v47 = vsub.f32 %v2390_v7, %v2383_v52  ;;  %v2385_v28 = vpop.f32.mrb[75].mxu1 }
0x211b   :  { %v5426_v2 = vsub.f32 %v2391_v48, %v2385_v28 }
0x211c   :  { %v2396_v5 = vpack.c.bf16 %v5424_v47, %v5406_v9 }
0x211d   :  { %v2397_v26 = vpack.c.bf16 %v5426_v2, %v5415_v30 }
0x211f   :  { %2430 = vmatprep.mubr.bf16.mxu0 %v2397_v26 }
0x2120   :  { %2431 = vmatmul.mubr.bf16.vlgmr.msra.gmra.mrb[76].mxu0 %v2396_v5 }
0x2121   :  { %2501 = vmatpush1.bf16.msra.mxu0 %v5032_v16 }
0x2122   :  { %2502 = vmatprep.subr.bf16.mxu0 %v5035_v33 }
0x2125   :  { %2503 = vmatpush1.bf16.msra.mxu0 %v5038_v46 }
0x2126   :  { %2504 = vmatprep.subr.bf16.mxu0 %v5041_v44 }
0x2129   :  { %2505 = vmatpush1.bf16.msra.mxu0 %v5044_v41 }
0x212a   :  { %2506 = vmatprep.subr.bf16.mxu0 %v5047_v18 }
0x212d   :  { %2507 = vmatpush1.bf16.msra.mxu0 %v5050_v40 }
0x212e   :  { %2508 = vmatprep.subr.bf16.mxu0 %v5053_v56 }
0x2131   :  { %2509 = vmatpush1.bf16.msra.mxu0 %v5056_v0  ;;  %v6014_v0 = vld [vmem:[#allocation23_spill] sm:$0xff] }
0x2132   :  { %2510 = vmatprep.subr.bf16.mxu0 %v5059_v34  ;;  %v6015_v34 = vld [vmem:[#allocation19_spill] sm:$0xff] }
0x2135   :  { %2511 = vmatpush1.bf16.msra.mxu0 %v5062_v14  ;;  %v6016_v14 = vld [vmem:[#allocation20_spill] sm:$0xff] }
0x2136   :  { %2512 = vmatprep.subr.bf16.mxu0 %v5065_v49  ;;  %v6017_v49 = vld [vmem:[#allocation35_spill] sm:$0xff] }
0x2139   :  { %2513 = vmatpush1.bf16.msra.mxu0 %v5068_v6  ;;  %v6018_v6 = vld [vmem:[#allocation36_spill] sm:$0xff] }
0x213a   :  { %2514 = vmatprep.subr.bf16.mxu0 %v5071_v29  ;;  %v6019_v29 = vld [vmem:[#allocation37_spill] sm:$0xff] }
0x213d   :  { %2515 = vmatpush1.bf16.msra.mxu0 %v5174_v19  ;;  %v6026_v19 = vld [vmem:[#allocation25_spill] sm:$0xff] }
0x213e   :  { %2516 = vmatprep.subr.bf16.mxu0 %v5177_v8  ;;  %v6027_v8 = vld [vmem:[#allocation26_spill] sm:$0xff] }
0x2141   :  { %2517 = vmatpush1.bf16.msra.mxu0 %v5180_v11  ;;  %v2490_v11 = vadd.f32 %v6027_v8, %v5406_v9 }
0x2142   :  { %2518 = vmatprep.subr.bf16.mxu0 %v5183_v37 }
0x2145   :  { %2519 = vmatpush1.bf16.msra.mxu0 %v5186_v23  ;;  %v6028_v23 = vld [vmem:[#allocation27_spill] sm:$0xff] }
0x2146   :  { %2520 = vmatprep.subr.bf16.mxu0 %v5189_v25  ;;  %v2491_v25 = vadd.f32 %v6028_v23, %v5415_v30 }
0x2149   :  { %2521 = vmatpush1.bf16.msra.mxu0 %v5192_v61 }
0x214a   :  { %2522 = vmatprep.subr.bf16.mxu0 %v5195_v38 }
0x214d   :  { %2523 = vmatpush1.bf16.msra.mxu0 %v5198_v63  ;;  %v2492_v63 = vadd.f32 %v5411_v57, %v5424_v47 }
0x214e   :  { %2524 = vmatprep.subr.bf16.mxu0 %v5201_v13 }
0x2151   :  { %2525 = vmatpush1.bf16.msra.mxu0 %v5204_v35 }
0x2152   :  { %2526 = vmatprep.subr.bf16.mxu0 %v5207_v58  ;;  %v2493_v58 = vadd.f32 %v5420_v36, %v5426_v2 }
0x2155   :  { %2527 = vmatpush1.bf16.msra.mxu0 %v5210_v51 }
0x2156   :  { %2528 = vmatprep.subr.bf16.mxu0 %v5213_v53 }
0x2159   :  { %2529 = vmatpush1.bf16.msra.mxu0 %v5216_v54 }
0x215a   :  { %2530 = vmatprep.subr.bf16.mxu0 %v5219_v55 }
0x215d   :  { %2531 = vmatpush1.bf16.msra.mxu0 %v5222_v3 }
0x21f3   :  { %v2432_v16 = vpop.f32.mrb[76].mxu0 }
0x21f4   :  { %v2434_v33 = vpop.f32.mrb[77].mxu0 }
0x21f5   :  { %v2436_v46 = vpop.f32.mrb[78].mxu0  ;;  %v2442_v18 = vmax.f32 %v2434_v33, 0.0 }
0x21f6   :  { %v2445_v44 = vpack.c.bf16 %v2436_v46, %v2432_v16  ;;  %v2438_v41 = vpop.f32.mrb[79].mxu0 }
0x21f7   :  { %v2444_v40 = vmax.f32 %v2438_v41, 0.0 }
0x21f9   :  { %v2446_v56 = vpack.c.bf16 %v2444_v40, %v2442_v18 }
0x21fb   :  { %2479 = vmatprep.mubr.bf16.mxu1 %v2446_v56 }
0x21fc   :  { %2480 = vmatmul.mubr.bf16.vlgmr.msra.gmra.mrb[76].mxu1 %v2445_v44 }
0x21fd   :  { %2550 = vmatpush1.bf16.msra.mxu1 %v5094_v17  ;;  %v6020_v17 = vld [vmem:[#allocation38_spill] sm:$0xff] }
0x21fe   :  { %2551 = vmatprep.subr.bf16.mxu1 %v5097_v45  ;;  %v6021_v45 = vld [vmem:[#allocation39_spill] sm:$0xff] }
0x2201   :  { %2552 = vmatpush1.bf16.msra.mxu1 %v5100_v32  ;;  %v6022_v32 = vld [vmem:[#allocation13_spill] sm:$0xff] }
0x2202   :  { %2553 = vmatprep.subr.bf16.mxu1 %v5103_v20  ;;  %v6023_v20 = vld [vmem:[#allocation32_spill] sm:$0xff] }
0x2205   :  { %2554 = vmatpush1.bf16.msra.mxu1 %v5106_v22  ;;  %v6024_v22 = vld [vmem:[#allocation33_spill] sm:$0xff] }
0x2206   :  { %2555 = vmatprep.subr.bf16.mxu1 %v5109_v24  ;;  %v6025_v24 = vld [vmem:[#allocation24_spill] sm:$0xff] }
0x2209   :  { %2556 = vmatpush1.bf16.msra.mxu1 %v5232_v60 }
0x220a   :  { %2557 = vmatprep.subr.bf16.mxu1 %v5235_v59 }
0x220d   :  { %2558 = vmatpush1.bf16.msra.mxu1 %v5238_v31 }
0x220e   :  { %2559 = vmatprep.subr.bf16.mxu1 %v5241_v42 }
0x2211   :  { %2560 = vmatpush1.bf16.msra.mxu1 %v5244_v62 }
0x2212   :  { %2561 = vmatprep.subr.bf16.mxu1 %v5247_v4 }
0x2215   :  { %2562 = vmatpush1.bf16.msra.mxu1 %v5250_v39 }
0x2216   :  { %2563 = vmatprep.subr.bf16.mxu1 %v5993_v21 }
0x2219   :  { %2564 = vmatpush1.bf16.msra.mxu1 %v5994_v43 }
0x221a   :  { %2565 = vmatprep.subr.bf16.mxu1 %v5995_v15 }
0x221d   :  { %2566 = vmatpush1.bf16.msra.mxu1 %v5996_v1 }
0x221e   :  { %2567 = vmatprep.subr.bf16.mxu1 %v5997_v50 }
0x2221   :  { %2568 = vmatpush1.bf16.msra.mxu1 %v6014_v0 }
0x2222   :  { %2569 = vmatprep.subr.bf16.mxu1 %v6015_v34 }
0x2225   :  { %2570 = vmatpush1.bf16.msra.mxu1 %v6016_v14 }
0x2226   :  { %2571 = vmatprep.subr.bf16.mxu1 %v6017_v49 }
0x2229   :  { %2572 = vmatpush1.bf16.msra.mxu1 %v6018_v6 }
0x222a   :  { %2573 = vmatprep.subr.bf16.mxu1 %v6019_v29 }
0x222d   :  { %2574 = vmatpush1.bf16.msra.mxu1 %v6020_v17 }
0x222e   :  { %2575 = vmatprep.subr.bf16.mxu1 %v6021_v45 }
0x2231   :  { %2576 = vmatpush1.bf16.msra.mxu1 %v6022_v32 }
0x2232   :  { %2577 = vmatprep.subr.bf16.mxu1 %v6023_v20 }
0x2235   :  { %2578 = vmatpush1.bf16.msra.mxu1 %v6024_v22 }
0x2236   :  { %2579 = vmatprep.subr.bf16.mxu1 %v6025_v24 }
0x2239   :  { %2580 = vmatpush1.bf16.msra.mxu1 %v6026_v19 }
0x22cf   :  { %v2481_v37 = vpop.f32.mrb[76].mxu1 }
0x22d0   :  { %v2494_v61 = vsub.f32 %v2490_v11, %v2481_v37  ;;  %v2483_v38 = vpop.f32.mrb[77].mxu1 }
0x22d1   :  { %v2495_v13 = vsub.f32 %v2491_v25, %v2483_v38  ;;  %v2485_v35 = vpop.f32.mrb[78].mxu1 }
0x22d2   :  { %v2496_v51 = vsub.f32 %v2492_v63, %v2485_v35  ;;  %v2487_v53 = vpop.f32.mrb[79].mxu1  ;;  %v2592_v21 = vadd.f32 %v6027_v8, %v2494_v61 }
0x22d3   :  { %v2497_v54 = vsub.f32 %v2493_v58, %v2487_v53  ;;  %v2593_v15 = vadd.f32 %v6028_v23, %v2495_v13 }
0x22d4   :  { %v2498_v55 = vpack.c.bf16 %v2496_v51, %v2494_v61  ;;  %v2594_v5 = vadd.f32 %v5411_v57, %v2496_v51 }
0x22d5   :  { %v2499_v3 = vpack.c.bf16 %v2497_v54, %v2495_v13  ;;  %v2595_v9 = vadd.f32 %v5420_v36, %v2497_v54 }
0x22d7   :  { %2532 = vmatprep.mubr.bf16.mxu0 %v2499_v3 }
0x22d8   :  { %2533 = vmatmul.mubr.bf16.vlgmr.msra.gmra.mrb[80].mxu0 %v2498_v55 }
0x23ab   :  { %v2534_v60 = vpop.f32.mrb[80].mxu0 }
0x23ac   :  { %v2536_v59 = vpop.f32.mrb[81].mxu0 }
0x23ad   :  { %v2538_v31 = vpop.f32.mrb[82].mxu0  ;;  %v2544_v4 = vmax.f32 %v2536_v59, 0.0 }
0x23ae   :  { %v2547_v42 = vpack.c.bf16 %v2538_v31, %v2534_v60  ;;  %v2540_v62 = vpop.f32.mrb[83].mxu0 }
0x23af   :  { %v2546_v39 = vmax.f32 %v2540_v62, 0.0 }
0x23b1   :  { %v2548_v12 = vpack.c.bf16 %v2546_v39, %v2544_v4 }
0x23b3   :  { %2581 = vmatprep.mubr.bf16.mxu1 %v2548_v12 }
0x23b4   :  { %2582 = vmatmul.mubr.bf16.vlgmr.msra.gmra.mrb[80].mxu1 %v2547_v42 }
0x2487   :  { %v2583_v43 = vpop.f32.mrb[80].mxu1 }
0x2488   :  { %v2596_v1 = vsub.f32 %v2592_v21, %v2583_v43  ;;  %v2585_v50 = vpop.f32.mrb[81].mxu1 }
0x2489   :  { %v2597_v10 = vsub.f32 %v2593_v15, %v2585_v50  ;;  %v2587_v52 = vpop.f32.mrb[82].mxu1 }
0x248a   :  { %2600 = vst [vmem:[#allocation8] sm:$0xff] %v2596_v1  ;;  %v2598_v30 = vsub.f32 %v2594_v5, %v2587_v52  ;;  %v2589_v2 = vpop.f32.mrb[83].mxu1 }
0x248b   :  { %2601 = vst [vmem:[#allocation8 + $0x8] sm:$0xff] %v2597_v10  ;;  %v2599_v27 = vsub.f32 %v2595_v9, %v2589_v2 }
0x248c   :  { %2602 = vst [vmem:[#allocation8 + $0x10] sm:$0xff] %v2598_v30 }
0x248d   :  { %2603 = vst [vmem:[#allocation8 + $0x18] sm:$0xff] %v2599_v27 }
0x248e   :  { %3071 = shalt.err (!%p3068_p0)
}
0x248f   :  { %s3072_s9 = scalar_lea.hbm %s5525_s4, 512 }
0x2490   :  { %p3073_p1 = scmp.ne.s32.totalorder %s5525_s4, %s3072_s9  ;;  %p3076_p2 = scmp.lt.u32.totalorder %s3072_s9, %s5525_s4 }
0x2492   :  { %p3078_p3 = pnand %p3076_p2, %p3073_p1 }
0x2494   :  { %3081 = shalt.err (!%p3078_p3)
}
0x2495   :  { %2615 = dma.vmem_to_hbm [thread:$0]  %s2610_s5, 512, %s5525_s4, [#allocation4], %s3092_s2, %s3092_s2, %s3093_s13  }
0x2496   :  { %3086 = dma.done.wait [#allocation4], 512  }
0x2497   :  { %3087 = vsyncadd [#allocation4], 4294966784 }
0x2498   :  { %2619 = vsyncpa [#allocation3], 1 }
0x2499   :  { %2620 = vsyncpa [#allocation6], 1 }
0x249a   :  { %2621 = vsyncpa [#allocation4], 1 }

</bundles_post_ra>
